<compile_context>
chip_gen: v5e
topology: v5e:2x2
jax: 0.10.0
libtpu: 0.0.40
codegen_flags: <defaults>
</compile_context>

<pallas_src>
import functools

import numpy as np

import jax
import jax.numpy as jnp
from jax import lax
from jax.experimental import pallas as pl
from jax.experimental.pallas import tpu as pltpu

LANES = 128          # lane width / channel padding granularity
ROW_ALIGN = 16       # bf16 sublane packing: keep row counts 16-aligned
ROW_TILE = 256       # in-kernel row tile (register-resident accumulator)
FINAL_ROW_TILE = 256  # grid row tile of the final (tanh) layer

# (kernel_size, stride, final_layer) per layer -- mirrors the PyTorch module.
_LAYER_CFG = ((3, 2, False), (4, 1, False), (3, 2, False), (4, 2, True))


def _round_up(x, m):
    return (x + m - 1) // m * m


def _pack_factors(cin):
    """(taps per contraction group, contraction lane width)."""
    if cin >= LANES:
        return 1, _round_up(cin, LANES)
    return LANES // cin, LANES


def _layer_geom(h, w, k, s):
    hd = (h - 1) * s + 1              # zero-inserted (dilated) spatial size
    wd = (w - 1) * s + 1
    hp = hd + 2 * (k - 1)             # + full-convolution padding
    wp = wd + 2 * (k - 1)
    oh = hd + k - 1                   # conv-transpose output size
    ow = wd + k - 1
    return hp, wp, oh, ow


def _row_tiles(rows, tile):
    tiles, start = [], 0
    while start < rows:
        size = min(tile, rows - start)
        tiles.append((start, size))
        start += size
    return tuple(tiles)


# ---------------------------------------------------------------------------
# Pallas kernels
# ---------------------------------------------------------------------------
def _convt_bn_relu_kernel(xp_ref, w_ref, gamma_ref, beta_ref, mask_ref,
                          out_ref, acc_ref, *, n_groups, tiles, inv_count, eps):
    """Tap-packed ConvTranspose2d + training-mode BatchNorm2d + ReLU."""
    coutp = acc_ref.shape[-1]
    s_sum = jnp.zeros((1, coutp), jnp.float32)
    s_sq = jnp.zeros((1, coutp), jnp.float32)

    # Phase 1: MXU matmuls with the f32 accumulator held as a value per row
    # tile; BN sum / sum-of-squares folded in; one acc store per tile.
    for start, size in tiles:
        acc = jnp.zeros((size, coutp), jnp.float32)
        for g in range(n_groups):
            acc = acc + jnp.dot(xp_ref[g, pl.ds(start, size), :], w_ref[g],
                                preferred_element_type=jnp.float32)
        m = mask_ref[pl.ds(start, size), :]          # 1.0 on valid output rows
        zm = acc * m
        s_sum = s_sum + jnp.sum(zm, axis=0, keepdims=True)
        s_sq = s_sq + jnp.sum(zm * acc, axis=0, keepdims=True)
        acc_ref[pl.ds(start, size), :] = acc

    # Batch statistics over valid pixels (biased variance, as in PyTorch).
    mean = s_sum * inv_count
    var = jnp.maximum(s_sq * inv_count - mean * mean, 0.0)
    scale = gamma_ref[...] * lax.rsqrt(var + eps)    # zero on padded channels
    shift = beta_ref[...] - mean * scale

    # Phase 2: single re-read of the accumulator, normalize + ReLU, bf16 out.
    for start, size in tiles:
        z = acc_ref[pl.ds(start, size), :]
        out_ref[pl.ds(start, size), :] = jnp.maximum(
            z * scale + shift, 0.0).astype(out_ref.dtype)


def _convt_tanh_kernel(xp_ref, w_ref, b_ref, out_ref, *, n_groups, cout):
    """Final layer: tap-packed ConvTranspose2d + bias + Tanh, lane-dense out."""
    tile = xp_ref.shape[1]
    coutp = w_ref.shape[-1]
    acc = jnp.zeros((tile, coutp), jnp.float32)
    for g in range(n_groups):
        acc = acc + jnp.dot(xp_ref[g], w_ref[g],
                            preferred_element_type=jnp.float32)
    out_ref[...] = jnp.tanh(acc[:, :cout] + b_ref[...])


# ---------------------------------------------------------------------------
# pallas_call wrappers
# ---------------------------------------------------------------------------
def _convt_bn_relu(xp, wg, gamma_p, beta_p, mask, *, inv_count, eps=1e-5):
    # Whole layer is one VMEM-resident step (footprint < 2 MiB at these
    # sizes); BN batch statistics couple every output row so a row grid would
    # need a two-phase structure.
    # TODO(synk): gridded two-phase BN kernel for large batches on v7x
    # (64 MiB VMEM, 2 TensorCores).
    n_groups, rows, _ = xp.shape
    coutp = wg.shape[-1]
    kernel = functools.partial(
        _convt_bn_relu_kernel, n_groups=n_groups,
        tiles=_row_tiles(rows, ROW_TILE), inv_count=inv_count, eps=eps)
    return pl.pallas_call(
        kernel,
        out_shape=jax.ShapeDtypeStruct((rows, coutp), jnp.bfloat16),
        scratch_shapes=[pltpu.VMEM((rows, coutp), jnp.float32)],
    )(xp, wg, gamma_p, beta_p, mask)


def _convt_tanh(xp, wg, bias_p):
    n_groups, rows, kp = xp.shape
    coutp = wg.shape[-1]
    cout = bias_p.shape[-1]
    tile = FINAL_ROW_TILE
    assert rows % tile == 0
    kernel = functools.partial(_convt_tanh_kernel, n_groups=n_groups, cout=cout)
    return pl.pallas_call(
        kernel,
        out_shape=jax.ShapeDtypeStruct((rows, cout), jnp.float32),
        grid=(rows // tile,),
        in_specs=[
            pl.BlockSpec((n_groups, tile, kp), lambda i: (0, i, 0)),
            pl.BlockSpec((n_groups, kp, coutp), lambda i: (0, 0, 0)),
            pl.BlockSpec((1, cout), lambda i: (0, 0)),
        ],
        out_specs=pl.BlockSpec((tile, cout), lambda i: (i, 0)),
        compiler_params=pltpu.CompilerParams(
            dimension_semantics=("parallel",)),
    )(xp, wg, bias_p)


# ---------------------------------------------------------------------------
# One-time parameter prep (hoisted out of the forward pass)
# ---------------------------------------------------------------------------
def init_generator_params(key, z_dim=10, im_channels=1, hidden_dim=64):
    """Raw PyTorch-layout parameters (ConvTranspose2d weight (Cin,Cout,k,k))."""
    chans = [z_dim, hidden_dim * 4, hidden_dim * 2, hidden_dim, im_channels]
    params = []
    for li, (k, _s, final) in enumerate(_LAYER_CFG):
        cin, cout = chans[li], chans[li + 1]
        key, kw_, kb, kg, kbt = jax.random.split(key, 5)
        w = 0.05 * jax.random.normal(kw_, (cin, cout, k, k), jnp.float32)
        b = 0.05 * jax.random.normal(kb, (cout,), jnp.float32)
        if final:
            params.append((w, b))
        else:
            gamma = 1.0 + 0.1 * jax.random.normal(kg, (cout,), jnp.float32)
            beta = 0.1 * jax.random.normal(kbt, (cout,), jnp.float32)
            params.append((w, b, gamma, beta))
    return params


def _pad_vec(v, width):
    c = v.shape[0]
    return jnp.pad(v, (0, width - c)).reshape(1, width).astype(jnp.float32)


def _pack_weight(w, k, gp, kp, coutp):
    """(Cin,Cout,k,k) -> tap-packed RHS (n_groups, kp, coutp) bf16 (flipped taps)."""
    cin, cout = int(w.shape[0]), int(w.shape[1])
    kk = k * k
    n_groups = -(-kk // gp)
    wf = jnp.transpose(w[:, :, ::-1, ::-1], (2, 3, 0, 1)).reshape(kk, cin, cout)
    groups = []
    for g in range(n_groups):
        rows = []
        for j in range(gp):
            t = g * gp + j
            rows.append(wf[t] if t < kk else jnp.zeros((cin, cout), wf.dtype))
        gm = jnp.concatenate(rows, axis=0)                     # (gp*cin, cout)
        gm = jnp.pad(gm, ((0, kp - gp * cin), (0, coutp - cout)))
        groups.append(gm)
    return jnp.stack(groups, axis=0).astype(jnp.bfloat16)


def pack_generator_params(params):
    """Flip/transpose/tap-pack/lane-pad/cast weights once, outside the forward.
    Conv biases of BN layers are dropped (cancelled by BN mean subtraction)."""
    packed = []
    for li, (k, _s, final) in enumerate(_LAYER_CFG):
        w = params[li][0]
        cin, cout = int(w.shape[0]), int(w.shape[1])
        gp, kp = _pack_factors(cin)
        coutp = _round_up(cout, LANES)
        wg = _pack_weight(w, k, gp, kp, coutp)
        if final:
            packed.append({"w": wg, "bias": _pad_vec(params[li][1], cout)})
        else:
            _w, _b, gamma, beta = params[li]
            packed.append({"w": wg, "gamma": _pad_vec(gamma, coutp),
                           "beta": _pad_vec(beta, coutp)})
    return packed


# ---------------------------------------------------------------------------
# Per-layer JAX-side prep (dilate + pad + tap-shift + lane-pack, one fusion)
# ---------------------------------------------------------------------------
def _pack_lhs(x_nhwc, k, s, hp, wp, rows_out, gp, kp):
    """NHWC (real channels) -> tap-packed LHS (n_groups, rows_out, kp) bf16.

    The tap row-shifts (kh*wp + kw) are baked in here so every in-kernel row
    slice starts on an aligned boundary."""
    n, _h, _w, c = x_nhwc.shape
    cfg = ((0, 0, 0), (k - 1, k - 1, s - 1), (k - 1, k - 1, s - 1), (0, 0, 0))
    xpd = lax.pad(x_nhwc, jnp.zeros((), x_nhwc.dtype), cfg)    # dilate + pad
    flat = xpd.reshape(n * hp * wp, c)
    total = rows_out + (k - 1) * (wp + 1)                      # max tap shift
    flat = jnp.pad(flat, ((0, total - n * hp * wp), (0, 0)))
    kk = k * k
    n_groups = -(-kk // gp)
    groups = []
    for g in range(n_groups):
        slots = []
        for j in range(gp):
            t = g * gp + j
            if t < kk:
                d = (t // k) * wp + (t % k)
                slots.append(flat[d:d + rows_out])
            else:
                slots.append(jnp.zeros((rows_out, c), flat.dtype))
        gs = jnp.concatenate(slots, axis=1)                    # (rows_out, gp*c)
        if kp > gp * c:
            gs = jnp.pad(gs, ((0, 0), (0, kp - gp * c)))
        groups.append(gs)
    return jnp.stack(groups, axis=0).astype(jnp.bfloat16)


def _valid_row_mask(n, hp, wp, oh, ow, rows_out):
    """1.0 on rows that are real output pixels (trace-time constant)."""
    m = np.zeros((rows_out, 1), np.float32)
    idx = np.arange(n * hp * wp)
    yy = (idx % (hp * wp)) // wp
    xx = idx % wp
    m[:n * hp * wp, 0] = ((yy < oh) & (xx < ow)).astype(np.float32)
    return jnp.asarray(m)


# ---------------------------------------------------------------------------
# Generator forward
# ---------------------------------------------------------------------------
def make_generator_forward(z_dim=10, im_channels=1, hidden_dim=64):
    chans = [z_dim, hidden_dim * 4, hidden_dim * 2, hidden_dim, im_channels]

    # TODO(synk): whole-network single-kernel fusion (and fully lane-dense
    # final layer with output columns in lanes) needs an in-kernel strided
    # dilation scatter; kept as one small XLA pad/pack fusion per layer for
    # lowering robustness.
    @jax.jit
    def forward(noise_nchw, packed):
        n = noise_nchw.shape[0]
        x = jnp.transpose(noise_nchw.astype(jnp.float32), (0, 2, 3, 1))  # NHWC
        h = w = 1
        for li, (k, s, final) in enumerate(_LAYER_CFG):
            cin, cout = chans[li], chans[li + 1]
            gp, kp = _pack_factors(cin)
            hp, wp, oh, ow = _layer_geom(h, w, k, s)
            rows_valid = n * hp * wp
            rows_out = _round_up(rows_valid,
                                 FINAL_ROW_TILE if final else ROW_ALIGN)
            xp = _pack_lhs(x, k, s, hp, wp, rows_out, gp, kp)
            if not final:
                mask = _valid_row_mask(n, hp, wp, oh, ow, rows_out)
                rows = _convt_bn_relu(
                    xp, packed[li]["w"], packed[li]["gamma"],
                    packed[li]["beta"], mask,
                    inv_count=1.0 / float(n * oh * ow))
                x = rows[:rows_valid].reshape(n, hp, wp, -1)[:, :oh, :ow, :cout]
            else:
                rows = _convt_tanh(xp, packed[li]["w"], packed[li]["bias"])
                x = rows[:rows_valid].reshape(n, hp, wp, cout)[:, :oh, :ow, :]
            h, w = oh, ow
        return jnp.transpose(x, (0, 3, 1, 2))                   # NHWC -> NCHW

    return forward


if __name__ == "__main__":
    key = jax.random.PRNGKey(0)
    k_params, k_noise = jax.random.split(key)

    # Small, constructor-consistent config: 1x1 noise -> 28x28 image.
    z_dim, im_channels, hidden_dim, batch = 10, 1, 16, 2
    params = init_generator_params(
        k_params, z_dim=z_dim, im_channels=im_channels, hidden_dim=hidden_dim)
    packed = pack_generator_params(params)
    forward = make_generator_forward(z_dim, im_channels, hidden_dim)

    noise = jax.random.normal(k_noise, (batch, z_dim, 1, 1), jnp.float32)
    out = jax.block_until_ready(forward(noise, packed))

    assert out.shape == (batch, im_channels, 28, 28), out.shape
    assert bool(jnp.all(jnp.isfinite(out)))
    assert bool(jnp.all(jnp.abs(out) <= 1.0 + 1e-6))   # tanh range
    print("KERNEL_OK")
</pallas_src>

<mosaic_0001>
module attributes {stable_mosaic.version = 11 : i64} {
  func.func @_convt_bn_relu_kernel(%arg0: memref<1x64x128xbf16, #tpu.memory_space<vmem>>, %arg1: memref<1x128x128xbf16, #tpu.memory_space<vmem>>, %arg2: memref<1x128xf32, #tpu.memory_space<vmem>>, %arg3: memref<1x128xf32, #tpu.memory_space<vmem>>, %arg4: memref<64x1xf32, #tpu.memory_space<vmem>>, %arg5: memref<64x128xbf16, #tpu.memory_space<vmem>>, %arg6: memref<64x128xf32, #tpu.memory_space<vmem>>) attributes {dimension_semantics = [], scalar_prefetch = 0 : i64, scratch_operands = 1 : i64, tpu.core_type = #tpu.core_type<tc>} {
    %cst = arith.constant 0.000000e+00 : f32
    %0 = vector.broadcast %cst : f32 to vector<1x128xf32>
    %cst_0 = arith.constant 0.000000e+00 : f32
    %1 = vector.broadcast %cst_0 : f32 to vector<1x128xf32>
    %cst_1 = arith.constant 0.000000e+00 : f32
    %2 = vector.broadcast %cst_1 : f32 to vector<64x128xf32>
    %c0 = arith.constant 0 : index
    %c0_2 = arith.constant 0 : index
    %c0_3 = arith.constant 0 : index
    %3 = vector.load %arg0[%c0, %c0_2, %c0_3] : memref<1x64x128xbf16, #tpu.memory_space<vmem>>, vector<1x64x128xbf16>
    %4 = vector.shape_cast %3 : vector<1x64x128xbf16> to vector<64x128xbf16>
    %c0_4 = arith.constant 0 : index
    %c0_5 = arith.constant 0 : index
    %c0_6 = arith.constant 0 : index
    %5 = vector.load %arg1[%c0_4, %c0_5, %c0_6] : memref<1x128x128xbf16, #tpu.memory_space<vmem>>, vector<1x128x128xbf16>
    %6 = vector.shape_cast %5 : vector<1x128x128xbf16> to vector<128x128xbf16>
    %cst_7 = arith.constant dense<0.000000e+00> : vector<64x128xf32>
    %7 = tpu.matmul %4, %6, %cst_7 {dimension_numbers = #tpu.dot_dimension_numbers<[1], [0], [0], [1], [0, 0, 1, 1], [], []>} : vector<64x128xbf16>, vector<128x128xbf16>, vector<64x128xf32> -> vector<64x128xf32>
    %8 = arith.addf %2, %7 : vector<64x128xf32>
    %c0_8 = arith.constant 0 : index
    %c0_9 = arith.constant 0 : index
    %9 = vector.load %arg4[%c0_8, %c0_9] : memref<64x1xf32, #tpu.memory_space<vmem>>, vector<64x1xf32>
    %10 = vector.broadcast %9 : vector<64x1xf32> to vector<64x128xf32>
    %11 = arith.mulf %8, %10 : vector<64x128xf32>
    %cst_10 = arith.constant dense<0.000000e+00> : vector<128xf32>
    %12 = vector.multi_reduction <add>, %11, %cst_10 [0] : vector<64x128xf32> to vector<128xf32>
    %13 = vector.shape_cast %12 : vector<128xf32> to vector<1x128xf32>
    %14 = arith.addf %0, %13 : vector<1x128xf32>
    %15 = arith.mulf %11, %8 : vector<64x128xf32>
    %cst_11 = arith.constant dense<0.000000e+00> : vector<128xf32>
    %16 = vector.multi_reduction <add>, %15, %cst_11 [0] : vector<64x128xf32> to vector<128xf32>
    %17 = vector.shape_cast %16 : vector<128xf32> to vector<1x128xf32>
    %18 = arith.addf %1, %17 : vector<1x128xf32>
    %c0_12 = arith.constant 0 : index
    %c0_13 = arith.constant 0 : index
    %19 = vector.load %arg6[%c0_12, %c0_13] : memref<64x128xf32, #tpu.memory_space<vmem>>, vector<64x128xf32>
    tpu.vector_store %arg6[%c0_12, %c0_13], %8 {strides = array<i32>} : memref<64x128xf32, #tpu.memory_space<vmem>>, vector<64x128xf32>,
    %cst_14 = arith.constant 0.055555556 : f32
    %20 = vector.broadcast %cst_14 : f32 to vector<1x128xf32>
    %21 = arith.mulf %14, %20 : vector<1x128xf32>
    %cst_15 = arith.constant 0.055555556 : f32
    %22 = vector.broadcast %cst_15 : f32 to vector<1x128xf32>
    %23 = arith.mulf %18, %22 : vector<1x128xf32>
    %24 = arith.mulf %21, %21 : vector<1x128xf32>
    %25 = arith.subf %23, %24 : vector<1x128xf32>
    %cst_16 = arith.constant 0.000000e+00 : f32
    %26 = vector.broadcast %cst_16 : f32 to vector<1x128xf32>
    %27 = arith.maximumf %25, %26 : vector<1x128xf32>
    %c0_17 = arith.constant 0 : index
    %c0_18 = arith.constant 0 : index
    %28 = vector.load %arg2[%c0_17, %c0_18] : memref<1x128xf32, #tpu.memory_space<vmem>>, vector<1x128xf32>
    %cst_19 = arith.constant 9.99999974E-6 : f32
    %29 = vector.broadcast %cst_19 : f32 to vector<1x128xf32>
    %30 = arith.addf %27, %29 : vector<1x128xf32>
    %31 = math.rsqrt %30 : vector<1x128xf32>
    %32 = arith.mulf %28, %31 : vector<1x128xf32>
    %c0_20 = arith.constant 0 : index
    %c0_21 = arith.constant 0 : index
    %33 = vector.load %arg3[%c0_20, %c0_21] : memref<1x128xf32, #tpu.memory_space<vmem>>, vector<1x128xf32>
    %34 = arith.mulf %21, %32 : vector<1x128xf32>
    %35 = arith.subf %33, %34 : vector<1x128xf32>
    %c0_22 = arith.constant 0 : index
    %c0_23 = arith.constant 0 : index
    %36 = vector.load %arg6[%c0_22, %c0_23] : memref<64x128xf32, #tpu.memory_space<vmem>>, vector<64x128xf32>
    %37 = vector.broadcast %32 : vector<1x128xf32> to vector<64x128xf32>
    %38 = arith.mulf %36, %37 : vector<64x128xf32>
    %39 = vector.broadcast %35 : vector<1x128xf32> to vector<64x128xf32>
    %40 = arith.addf %38, %39 : vector<64x128xf32>
    %cst_24 = arith.constant 0.000000e+00 : f32
    %41 = vector.broadcast %cst_24 : f32 to vector<64x128xf32>
    %42 = arith.maximumf %40, %41 : vector<64x128xf32>
    %43 = arith.truncf %42 : vector<64x128xf32> to vector<64x128xbf16>
    %c0_25 = arith.constant 0 : index
    %c0_26 = arith.constant 0 : index
    %44 = vector.load %arg5[%c0_25, %c0_26] : memref<64x128xbf16, #tpu.memory_space<vmem>>, vector<64x128xbf16>
    tpu.vector_store %arg5[%c0_25, %c0_26], %43 {strides = array<i32>} : memref<64x128xbf16, #tpu.memory_space<vmem>>, vector<64x128xbf16>,
    return
  }
}

module attributes {stable_mosaic.version = 11 : i64} {
  func.func @_convt_bn_relu_kernel(%arg0: memref<8x176x128xbf16, #tpu.memory_space<vmem>>, %arg1: memref<8x128x128xbf16, #tpu.memory_space<vmem>>, %arg2: memref<1x128xf32, #tpu.memory_space<vmem>>, %arg3: memref<1x128xf32, #tpu.memory_space<vmem>>, %arg4: memref<176x1xf32, #tpu.memory_space<vmem>>, %arg5: memref<176x128xbf16, #tpu.memory_space<vmem>>, %arg6: memref<176x128xf32, #tpu.memory_space<vmem>>) attributes {dimension_semantics = [], scalar_prefetch = 0 : i64, scratch_operands = 1 : i64, tpu.core_type = #tpu.core_type<tc>} {
    %cst = arith.constant 0.000000e+00 : f32
    %0 = vector.broadcast %cst : f32 to vector<1x128xf32>
    %cst_0 = arith.constant 0.000000e+00 : f32
    %1 = vector.broadcast %cst_0 : f32 to vector<1x128xf32>
    %cst_1 = arith.constant 0.000000e+00 : f32
    %2 = vector.broadcast %cst_1 : f32 to vector<176x128xf32>
    %c0 = arith.constant 0 : index
    %c0_2 = arith.constant 0 : index
    %c0_3 = arith.constant 0 : index
    %3 = vector.load %arg0[%c0, %c0_2, %c0_3] : memref<8x176x128xbf16, #tpu.memory_space<vmem>>, vector<1x176x128xbf16>
    %4 = vector.shape_cast %3 : vector<1x176x128xbf16> to vector<176x128xbf16>
    %c0_4 = arith.constant 0 : index
    %c0_5 = arith.constant 0 : index
    %c0_6 = arith.constant 0 : index
    %5 = vector.load %arg1[%c0_4, %c0_5, %c0_6] : memref<8x128x128xbf16, #tpu.memory_space<vmem>>, vector<1x128x128xbf16>
    %6 = vector.shape_cast %5 : vector<1x128x128xbf16> to vector<128x128xbf16>
    %cst_7 = arith.constant dense<0.000000e+00> : vector<176x128xf32>
    %7 = tpu.matmul %4, %6, %cst_7 {dimension_numbers = #tpu.dot_dimension_numbers<[1], [0], [0], [1], [0, 0, 1, 1], [], []>} : vector<176x128xbf16>, vector<128x128xbf16>, vector<176x128xf32> -> vector<176x128xf32>
    %8 = arith.addf %2, %7 : vector<176x128xf32>
    %c1 = arith.constant 1 : index
    %c0_8 = arith.constant 0 : index
    %c0_9 = arith.constant 0 : index
    %9 = vector.load %arg0[%c1, %c0_8, %c0_9] : memref<8x176x128xbf16, #tpu.memory_space<vmem>>, vector<1x176x128xbf16>
    %10 = vector.shape_cast %9 : vector<1x176x128xbf16> to vector<176x128xbf16>
    %c1_10 = arith.constant 1 : index
    %c0_11 = arith.constant 0 : index
    %c0_12 = arith.constant 0 : index
    %11 = vector.load %arg1[%c1_10, %c0_11, %c0_12] : memref<8x128x128xbf16, #tpu.memory_space<vmem>>, vector<1x128x128xbf16>
    %12 = vector.shape_cast %11 : vector<1x128x128xbf16> to vector<128x128xbf16>
    %cst_13 = arith.constant dense<0.000000e+00> : vector<176x128xf32>
    %13 = tpu.matmul %10, %12, %cst_13 {dimension_numbers = #tpu.dot_dimension_numbers<[1], [0], [0], [1], [0, 0, 1, 1], [], []>} : vector<176x128xbf16>, vector<128x128xbf16>, vector<176x128xf32> -> vector<176x128xf32>
    %14 = arith.addf %8, %13 : vector<176x128xf32>
    %c2 = arith.constant 2 : index
    %c0_14 = arith.constant 0 : index
    %c0_15 = arith.constant 0 : index
    %15 = vector.load %arg0[%c2, %c0_14, %c0_15] : memref<8x176x128xbf16, #tpu.memory_space<vmem>>, vector<1x176x128xbf16>
    %16 = vector.shape_cast %15 : vector<1x176x128xbf16> to vector<176x128xbf16>
    %c2_16 = arith.constant 2 : index
    %c0_17 = arith.constant 0 : index
    %c0_18 = arith.constant 0 : index
    %17 = vector.load %arg1[%c2_16, %c0_17, %c0_18] : memref<8x128x128xbf16, #tpu.memory_space<vmem>>, vector<1x128x128xbf16>
    %18 = vector.shape_cast %17 : vector<1x128x128xbf16> to vector<128x128xbf16>
    %cst_19 = arith.constant dense<0.000000e+00> : vector<176x128xf32>
    %19 = tpu.matmul %16, %18, %cst_19 {dimension_numbers = #tpu.dot_dimension_numbers<[1], [0], [0], [1], [0, 0, 1, 1], [], []>} : vector<176x128xbf16>, vector<128x128xbf16>, vector<176x128xf32> -> vector<176x128xf32>
    %20 = arith.addf %14, %19 : vector<176x128xf32>
    %c3 = arith.constant 3 : index
    %c0_20 = arith.constant 0 : index
    %c0_21 = arith.constant 0 : index
    %21 = vector.load %arg0[%c3, %c0_20, %c0_21] : memref<8x176x128xbf16, #tpu.memory_space<vmem>>, vector<1x176x128xbf16>
    %22 = vector.shape_cast %21 : vector<1x176x128xbf16> to vector<176x128xbf16>
    %c3_22 = arith.constant 3 : index
    %c0_23 = arith.constant 0 : index
    %c0_24 = arith.constant 0 : index
    %23 = vector.load %arg1[%c3_22, %c0_23, %c0_24] : memref<8x128x128xbf16, #tpu.memory_space<vmem>>, vector<1x128x128xbf16>
    %24 = vector.shape_cast %23 : vector<1x128x128xbf16> to vector<128x128xbf16>
    %cst_25 = arith.constant dense<0.000000e+00> : vector<176x128xf32>
    %25 = tpu.matmul %22, %24, %cst_25 {dimension_numbers = #tpu.dot_dimension_numbers<[1], [0], [0], [1], [0, 0, 1, 1], [], []>} : vector<176x128xbf16>, vector<128x128xbf16>, vector<176x128xf32> -> vector<176x128xf32>
    %26 = arith.addf %20, %25 : vector<176x128xf32>
    %c4 = arith.constant 4 : index
    %c0_26 = arith.constant 0 : index
    %c0_27 = arith.constant 0 : index
    %27 = vector.load %arg0[%c4, %c0_26, %c0_27] : memref<8x176x128xbf16, #tpu.memory_space<vmem>>, vector<1x176x128xbf16>
    %28 = vector.shape_cast %27 : vector<1x176x128xbf16> to vector<176x128xbf16>
    %c4_28 = arith.constant 4 : index
    %c0_29 = arith.constant 0 : index
    %c0_30 = arith.constant 0 : index
    %29 = vector.load %arg1[%c4_28, %c0_29, %c0_30] : memref<8x128x128xbf16, #tpu.memory_space<vmem>>, vector<1x128x128xbf16>
    %30 = vector.shape_cast %29 : vector<1x128x128xbf16> to vector<128x128xbf16>
    %cst_31 = arith.constant dense<0.000000e+00> : vector<176x128xf32>
    %31 = tpu.matmul %28, %30, %cst_31 {dimension_numbers = #tpu.dot_dimension_numbers<[1], [0], [0], [1], [0, 0, 1, 1], [], []>} : vector<176x128xbf16>, vector<128x128xbf16>, vector<176x128xf32> -> vector<176x128xf32>
    %32 = arith.addf %26, %31 : vector<176x128xf32>
    %c5 = arith.constant 5 : index
    %c0_32 = arith.constant 0 : index
    %c0_33 = arith.constant 0 : index
    %33 = vector.load %arg0[%c5, %c0_32, %c0_33] : memref<8x176x128xbf16, #tpu.memory_space<vmem>>, vector<1x176x128xbf16>
    %34 = vector.shape_cast %33 : vector<1x176x128xbf16> to vector<176x128xbf16>
    %c5_34 = arith.constant 5 : index
    %c0_35 = arith.constant 0 : index
    %c0_36 = arith.constant 0 : index
    %35 = vector.load %arg1[%c5_34, %c0_35, %c0_36] : memref<8x128x128xbf16, #tpu.memory_space<vmem>>, vector<1x128x128xbf16>
    %36 = vector.shape_cast %35 : vector<1x128x128xbf16> to vector<128x128xbf16>
    %cst_37 = arith.constant dense<0.000000e+00> : vector<176x128xf32>
    %37 = tpu.matmul %34, %36, %cst_37 {dimension_numbers = #tpu.dot_dimension_numbers<[1], [0], [0], [1], [0, 0, 1, 1], [], []>} : vector<176x128xbf16>, vector<128x128xbf16>, vector<176x128xf32> -> vector<176x128xf32>
    %38 = arith.addf %32, %37 : vector<176x128xf32>
    %c6 = arith.constant 6 : index
    %c0_38 = arith.constant 0 : index
    %c0_39 = arith.constant 0 : index
    %39 = vector.load %arg0[%c6, %c0_38, %c0_39] : memref<8x176x128xbf16, #tpu.memory_space<vmem>>, vector<1x176x128xbf16>
    %40 = vector.shape_cast %39 : vector<1x176x128xbf16> to vector<176x128xbf16>
    %c6_40 = arith.constant 6 : index
    %c0_41 = arith.constant 0 : index
    %c0_42 = arith.constant 0 : index
    %41 = vector.load %arg1[%c6_40, %c0_41, %c0_42] : memref<8x128x128xbf16, #tpu.memory_space<vmem>>, vector<1x128x128xbf16>
    %42 = vector.shape_cast %41 : vector<1x128x128xbf16> to vector<128x128xbf16>
    %cst_43 = arith.constant dense<0.000000e+00> : vector<176x128xf32>
    %43 = tpu.matmul %40, %42, %cst_43 {dimension_numbers = #tpu.dot_dimension_numbers<[1], [0], [0], [1], [0, 0, 1, 1], [], []>} : vector<176x128xbf16>, vector<128x128xbf16>, vector<176x128xf32> -> vector<176x128xf32>
    %44 = arith.addf %38, %43 : vector<176x128xf32>
    %c7 = arith.constant 7 : index
    %c0_44 = arith.constant 0 : index
    %c0_45 = arith.constant 0 : index
    %45 = vector.load %arg0[%c7, %c0_44, %c0_45] : memref<8x176x128xbf16, #tpu.memory_space<vmem>>, vector<1x176x128xbf16>
    %46 = vector.shape_cast %45 : vector<1x176x128xbf16> to vector<176x128xbf16>
    %c7_46 = arith.constant 7 : index
    %c0_47 = arith.constant 0 : index
    %c0_48 = arith.constant 0 : index
    %47 = vector.load %arg1[%c7_46, %c0_47, %c0_48] : memref<8x128x128xbf16, #tpu.memory_space<vmem>>, vector<1x128x128xbf16>
    %48 = vector.shape_cast %47 : vector<1x128x128xbf16> to vector<128x128xbf16>
    %cst_49 = arith.constant dense<0.000000e+00> : vector<176x128xf32>
    %49 = tpu.matmul %46, %48, %cst_49 {dimension_numbers = #tpu.dot_dimension_numbers<[1], [0], [0], [1], [0, 0, 1, 1], [], []>} : vector<176x128xbf16>, vector<128x128xbf16>, vector<176x128xf32> -> vector<176x128xf32>
    %50 = arith.addf %44, %49 : vector<176x128xf32>
    %c0_50 = arith.constant 0 : index
    %c0_51 = arith.constant 0 : index
    %51 = vector.load %arg4[%c0_50, %c0_51] : memref<176x1xf32, #tpu.memory_space<vmem>>, vector<176x1xf32>
    %52 = vector.broadcast %51 : vector<176x1xf32> to vector<176x128xf32>
    %53 = arith.mulf %50, %52 : vector<176x128xf32>
    %cst_52 = arith.constant dense<0.000000e+00> : vector<128xf32>
    %54 = vector.multi_reduction <add>, %53, %cst_52 [0] : vector<176x128xf32> to vector<128xf32>
    %55 = vector.shape_cast %54 : vector<128xf32> to vector<1x128xf32>
    %56 = arith.addf %0, %55 : vector<1x128xf32>
    %57 = arith.mulf %53, %50 : vector<176x128xf32>
    %cst_53 = arith.constant dense<0.000000e+00> : vector<128xf32>
    %58 = vector.multi_reduction <add>, %57, %cst_53 [0] : vector<176x128xf32> to vector<128xf32>
    %59 = vector.shape_cast %58 : vector<128xf32> to vector<1x128xf32>
    %60 = arith.addf %1, %59 : vector<1x128xf32>
    %c0_54 = arith.constant 0 : index
    %c0_55 = arith.constant 0 : index
    %61 = vector.load %arg6[%c0_54, %c0_55] : memref<176x128xf32, #tpu.memory_space<vmem>>, vector<176x128xf32>
    tpu.vector_store %arg6[%c0_54, %c0_55], %50 {strides = array<i32>} : memref<176x128xf32, #tpu.memory_space<vmem>>, vector<176x128xf32>,
    %cst_56 = arith.constant 0.013888889 : f32
    %62 = vector.broadcast %cst_56 : f32 to vector<1x128xf32>
    %63 = arith.mulf %56, %62 : vector<1x128xf32>
    %cst_57 = arith.constant 0.013888889 : f32
    %64 = vector.broadcast %cst_57 : f32 to vector<1x128xf32>
    %65 = arith.mulf %60, %64 : vector<1x128xf32>
    %66 = arith.mulf %63, %63 : vector<1x128xf32>
    %67 = arith.subf %65, %66 : vector<1x128xf32>
    %cst_58 = arith.constant 0.000000e+00 : f32
    %68 = vector.broadcast %cst_58 : f32 to vector<1x128xf32>
    %69 = arith.maximumf %67, %68 : vector<1x128xf32>
    %c0_59 = arith.constant 0 : index
    %c0_60 = arith.constant 0 : index
    %70 = vector.load %arg2[%c0_59, %c0_60] : memref<1x128xf32, #tpu.memory_space<vmem>>, vector<1x128xf32>
    %cst_61 = arith.constant 9.99999974E-6 : f32
    %71 = vector.broadcast %cst_61 : f32 to vector<1x128xf32>
    %72 = arith.addf %69, %71 : vector<1x128xf32>
    %73 = math.rsqrt %72 : vector<1x128xf32>
    %74 = arith.mulf %70, %73 : vector<1x128xf32>
    %c0_62 = arith.constant 0 : index
    %c0_63 = arith.constant 0 : index
    %75 = vector.load %arg3[%c0_62, %c0_63] : memref<1x128xf32, #tpu.memory_space<vmem>>, vector<1x128xf32>
    %76 = arith.mulf %63, %74 : vector<1x128xf32>
    %77 = arith.subf %75, %76 : vector<1x128xf32>
    %c0_64 = arith.constant 0 : index
    %c0_65 = arith.constant 0 : index
    %78 = vector.load %arg6[%c0_64, %c0_65] : memref<176x128xf32, #tpu.memory_space<vmem>>, vector<176x128xf32>
    %79 = vector.broadcast %74 : vector<1x128xf32> to vector<176x128xf32>
    %80 = arith.mulf %78, %79 : vector<176x128xf32>
    %81 = vector.broadcast %77 : vector<1x128xf32> to vector<176x128xf32>
    %82 = arith.addf %80, %81 : vector<176x128xf32>
    %cst_66 = arith.constant 0.000000e+00 : f32
    %83 = vector.broadcast %cst_66 : f32 to vector<176x128xf32>
    %84 = arith.maximumf %82, %83 : vector<176x128xf32>
    %85 = arith.truncf %84 : vector<176x128xf32> to vector<176x128xbf16>
    %c0_67 = arith.constant 0 : index
    %c0_68 = arith.constant 0 : index
    %86 = vector.load %arg5[%c0_67, %c0_68] : memref<176x128xbf16, #tpu.memory_space<vmem>>, vector<176x128xbf16>
    tpu.vector_store %arg5[%c0_67, %c0_68], %85 {strides = array<i32>} : memref<176x128xbf16, #tpu.memory_space<vmem>>, vector<176x128xbf16>,
    return
  }
}

module attributes {stable_mosaic.version = 11 : i64} {
  func.func @_convt_bn_relu_kernel(%arg0: memref<3x464x128xbf16, #tpu.memory_space<vmem>>, %arg1: memref<3x128x128xbf16, #tpu.memory_space<vmem>>, %arg2: memref<1x128xf32, #tpu.memory_space<vmem>>, %arg3: memref<1x128xf32, #tpu.memory_space<vmem>>, %arg4: memref<464x1xf32, #tpu.memory_space<vmem>>, %arg5: memref<464x128xbf16, #tpu.memory_space<vmem>>, %arg6: memref<464x128xf32, #tpu.memory_space<vmem>>) attributes {dimension_semantics = [], scalar_prefetch = 0 : i64, scratch_operands = 1 : i64, tpu.core_type = #tpu.core_type<tc>} {
    %cst = arith.constant 0.000000e+00 : f32
    %0 = vector.broadcast %cst : f32 to vector<1x128xf32>
    %cst_0 = arith.constant 0.000000e+00 : f32
    %1 = vector.broadcast %cst_0 : f32 to vector<1x128xf32>
    %cst_1 = arith.constant 0.000000e+00 : f32
    %2 = vector.broadcast %cst_1 : f32 to vector<256x128xf32>
    %c0 = arith.constant 0 : index
    %c0_2 = arith.constant 0 : index
    %c0_3 = arith.constant 0 : index
    %3 = vector.load %arg0[%c0, %c0_2, %c0_3] : memref<3x464x128xbf16, #tpu.memory_space<vmem>>, vector<1x256x128xbf16>
    %4 = vector.shape_cast %3 : vector<1x256x128xbf16> to vector<256x128xbf16>
    %c0_4 = arith.constant 0 : index
    %c0_5 = arith.constant 0 : index
    %c0_6 = arith.constant 0 : index
    %5 = vector.load %arg1[%c0_4, %c0_5, %c0_6] : memref<3x128x128xbf16, #tpu.memory_space<vmem>>, vector<1x128x128xbf16>
    %6 = vector.shape_cast %5 : vector<1x128x128xbf16> to vector<128x128xbf16>
    %cst_7 = arith.constant dense<0.000000e+00> : vector<256x128xf32>
    %7 = tpu.matmul %4, %6, %cst_7 {dimension_numbers = #tpu.dot_dimension_numbers<[1], [0], [0], [1], [0, 0, 1, 1], [], []>} : vector<256x128xbf16>, vector<128x128xbf16>, vector<256x128xf32> -> vector<256x128xf32>
    %8 = arith.addf %2, %7 : vector<256x128xf32>
    %c1 = arith.constant 1 : index
    %c0_8 = arith.constant 0 : index
    %c0_9 = arith.constant 0 : index
    %9 = vector.load %arg0[%c1, %c0_8, %c0_9] : memref<3x464x128xbf16, #tpu.memory_space<vmem>>, vector<1x256x128xbf16>
    %10 = vector.shape_cast %9 : vector<1x256x128xbf16> to vector<256x128xbf16>
    %c1_10 = arith.constant 1 : index
    %c0_11 = arith.constant 0 : index
    %c0_12 = arith.constant 0 : index
    %11 = vector.load %arg1[%c1_10, %c0_11, %c0_12] : memref<3x128x128xbf16, #tpu.memory_space<vmem>>, vector<1x128x128xbf16>
    %12 = vector.shape_cast %11 : vector<1x128x128xbf16> to vector<128x128xbf16>
    %cst_13 = arith.constant dense<0.000000e+00> : vector<256x128xf32>
    %13 = tpu.matmul %10, %12, %cst_13 {dimension_numbers = #tpu.dot_dimension_numbers<[1], [0], [0], [1], [0, 0, 1, 1], [], []>} : vector<256x128xbf16>, vector<128x128xbf16>, vector<256x128xf32> -> vector<256x128xf32>
    %14 = arith.addf %8, %13 : vector<256x128xf32>
    %c2 = arith.constant 2 : index
    %c0_14 = arith.constant 0 : index
    %c0_15 = arith.constant 0 : index
    %15 = vector.load %arg0[%c2, %c0_14, %c0_15] : memref<3x464x128xbf16, #tpu.memory_space<vmem>>, vector<1x256x128xbf16>
    %16 = vector.shape_cast %15 : vector<1x256x128xbf16> to vector<256x128xbf16>
    %c2_16 = arith.constant 2 : index
    %c0_17 = arith.constant 0 : index
    %c0_18 = arith.constant 0 : index
    %17 = vector.load %arg1[%c2_16, %c0_17, %c0_18] : memref<3x128x128xbf16, #tpu.memory_space<vmem>>, vector<1x128x128xbf16>
    %18 = vector.shape_cast %17 : vector<1x128x128xbf16> to vector<128x128xbf16>
    %cst_19 = arith.constant dense<0.000000e+00> : vector<256x128xf32>
    %19 = tpu.matmul %16, %18, %cst_19 {dimension_numbers = #tpu.dot_dimension_numbers<[1], [0], [0], [1], [0, 0, 1, 1], [], []>} : vector<256x128xbf16>, vector<128x128xbf16>, vector<256x128xf32> -> vector<256x128xf32>
    %20 = arith.addf %14, %19 : vector<256x128xf32>
    %c0_20 = arith.constant 0 : index
    %c0_21 = arith.constant 0 : index
    %21 = vector.load %arg4[%c0_20, %c0_21] : memref<464x1xf32, #tpu.memory_space<vmem>>, vector<256x1xf32>
    %22 = vector.broadcast %21 : vector<256x1xf32> to vector<256x128xf32>
    %23 = arith.mulf %20, %22 : vector<256x128xf32>
    %cst_22 = arith.constant dense<0.000000e+00> : vector<128xf32>
    %24 = vector.multi_reduction <add>, %23, %cst_22 [0] : vector<256x128xf32> to vector<128xf32>
    %25 = vector.shape_cast %24 : vector<128xf32> to vector<1x128xf32>
    %26 = arith.addf %0, %25 : vector<1x128xf32>
    %27 = arith.mulf %23, %20 : vector<256x128xf32>
    %cst_23 = arith.constant dense<0.000000e+00> : vector<128xf32>
    %28 = vector.multi_reduction <add>, %27, %cst_23 [0] : vector<256x128xf32> to vector<128xf32>
    %29 = vector.shape_cast %28 : vector<128xf32> to vector<1x128xf32>
    %30 = arith.addf %1, %29 : vector<1x128xf32>
    %c0_24 = arith.constant 0 : index
    %c0_25 = arith.constant 0 : index
    %31 = vector.load %arg6[%c0_24, %c0_25] : memref<464x128xf32, #tpu.memory_space<vmem>>, vector<256x128xf32>
    tpu.vector_store %arg6[%c0_24, %c0_25], %20 {strides = array<i32>} : memref<464x128xf32, #tpu.memory_space<vmem>>, vector<256x128xf32>,
    %cst_26 = arith.constant 0.000000e+00 : f32
    %32 = vector.broadcast %cst_26 : f32 to vector<208x128xf32>
    %c0_27 = arith.constant 0 : index
    %c256 = arith.constant 256 : index
    %c0_28 = arith.constant 0 : index
    %33 = vector.load %arg0[%c0_27, %c256, %c0_28] : memref<3x464x128xbf16, #tpu.memory_space<vmem>>, vector<1x208x128xbf16>
    %34 = vector.shape_cast %33 : vector<1x208x128xbf16> to vector<208x128xbf16>
    %c0_29 = arith.constant 0 : index
    %c0_30 = arith.constant 0 : index
    %c0_31 = arith.constant 0 : index
    %35 = vector.load %arg1[%c0_29, %c0_30, %c0_31] : memref<3x128x128xbf16, #tpu.memory_space<vmem>>, vector<1x128x128xbf16>
    %36 = vector.shape_cast %35 : vector<1x128x128xbf16> to vector<128x128xbf16>
    %cst_32 = arith.constant dense<0.000000e+00> : vector<208x128xf32>
    %37 = tpu.matmul %34, %36, %cst_32 {dimension_numbers = #tpu.dot_dimension_numbers<[1], [0], [0], [1], [0, 0, 1, 1], [], []>} : vector<208x128xbf16>, vector<128x128xbf16>, vector<208x128xf32> -> vector<208x128xf32>
    %38 = arith.addf %32, %37 : vector<208x128xf32>
    %c1_33 = arith.constant 1 : index
    %c256_34 = arith.constant 256 : index
    %c0_35 = arith.constant 0 : index
    %39 = vector.load %arg0[%c1_33, %c256_34, %c0_35] : memref<3x464x128xbf16, #tpu.memory_space<vmem>>, vector<1x208x128xbf16>
    %40 = vector.shape_cast %39 : vector<1x208x128xbf16> to vector<208x128xbf16>
    %c1_36 = arith.constant 1 : index
    %c0_37 = arith.constant 0 : index
    %c0_38 = arith.constant 0 : index
    %41 = vector.load %arg1[%c1_36, %c0_37, %c0_38] : memref<3x128x128xbf16, #tpu.memory_space<vmem>>, vector<1x128x128xbf16>
    %42 = vector.shape_cast %41 : vector<1x128x128xbf16> to vector<128x128xbf16>
    %cst_39 = arith.constant dense<0.000000e+00> : vector<208x128xf32>
    %43 = tpu.matmul %40, %42, %cst_39 {dimension_numbers = #tpu.dot_dimension_numbers<[1], [0], [0], [1], [0, 0, 1, 1], [], []>} : vector<208x128xbf16>, vector<128x128xbf16>, vector<208x128xf32> -> vector<208x128xf32>
    %44 = arith.addf %38, %43 : vector<208x128xf32>
    %c2_40 = arith.constant 2 : index
    %c256_41 = arith.constant 256 : index
    %c0_42 = arith.constant 0 : index
    %45 = vector.load %arg0[%c2_40, %c256_41, %c0_42] : memref<3x464x128xbf16, #tpu.memory_space<vmem>>, vector<1x208x128xbf16>
    %46 = vector.shape_cast %45 : vector<1x208x128xbf16> to vector<208x128xbf16>
    %c2_43 = arith.constant 2 : index
    %c0_44 = arith.constant 0 : index
    %c0_45 = arith.constant 0 : index
    %47 = vector.load %arg1[%c2_43, %c0_44, %c0_45] : memref<3x128x128xbf16, #tpu.memory_space<vmem>>, vector<1x128x128xbf16>
    %48 = vector.shape_cast %47 : vector<1x128x128xbf16> to vector<128x128xbf16>
    %cst_46 = arith.constant dense<0.000000e+00> : vector<208x128xf32>
    %49 = tpu.matmul %46, %48, %cst_46 {dimension_numbers = #tpu.dot_dimension_numbers<[1], [0], [0], [1], [0, 0, 1, 1], [], []>} : vector<208x128xbf16>, vector<128x128xbf16>, vector<208x128xf32> -> vector<208x128xf32>
    %50 = arith.addf %44, %49 : vector<208x128xf32>
    %c256_47 = arith.constant 256 : index
    %c0_48 = arith.constant 0 : index
    %51 = vector.load %arg4[%c256_47, %c0_48] : memref<464x1xf32, #tpu.memory_space<vmem>>, vector<208x1xf32>
    %52 = vector.broadcast %51 : vector<208x1xf32> to vector<208x128xf32>
    %53 = arith.mulf %50, %52 : vector<208x128xf32>
    %cst_49 = arith.constant dense<0.000000e+00> : vector<128xf32>
    %54 = vector.multi_reduction <add>, %53, %cst_49 [0] : vector<208x128xf32> to vector<128xf32>
    %55 = vector.shape_cast %54 : vector<128xf32> to vector<1x128xf32>
    %56 = arith.addf %26, %55 : vector<1x128xf32>
    %57 = arith.mulf %53, %50 : vector<208x128xf32>
    %cst_50 = arith.constant dense<0.000000e+00> : vector<128xf32>
    %58 = vector.multi_reduction <add>, %57, %cst_50 [0] : vector<208x128xf32> to vector<128xf32>
    %59 = vector.shape_cast %58 : vector<128xf32> to vector<1x128xf32>
    %60 = arith.addf %30, %59 : vector<1x128xf32>
    %c256_51 = arith.constant 256 : index
    %c0_52 = arith.constant 0 : index
    %61 = vector.load %arg6[%c256_51, %c0_52] : memref<464x128xf32, #tpu.memory_space<vmem>>, vector<208x128xf32>
    tpu.vector_store %arg6[%c256_51, %c0_52], %50 {strides = array<i32>} : memref<464x128xf32, #tpu.memory_space<vmem>>, vector<208x128xf32>,
    %cst_53 = arith.constant 2.958580e-03 : f32
    %62 = vector.broadcast %cst_53 : f32 to vector<1x128xf32>
    %63 = arith.mulf %56, %62 : vector<1x128xf32>
    %cst_54 = arith.constant 2.958580e-03 : f32
    %64 = vector.broadcast %cst_54 : f32 to vector<1x128xf32>
    %65 = arith.mulf %60, %64 : vector<1x128xf32>
    %66 = arith.mulf %63, %63 : vector<1x128xf32>
    %67 = arith.subf %65, %66 : vector<1x128xf32>
    %cst_55 = arith.constant 0.000000e+00 : f32
    %68 = vector.broadcast %cst_55 : f32 to vector<1x128xf32>
    %69 = arith.maximumf %67, %68 : vector<1x128xf32>
    %c0_56 = arith.constant 0 : index
    %c0_57 = arith.constant 0 : index
    %70 = vector.load %arg2[%c0_56, %c0_57] : memref<1x128xf32, #tpu.memory_space<vmem>>, vector<1x128xf32>
    %cst_58 = arith.constant 9.99999974E-6 : f32
    %71 = vector.broadcast %cst_58 : f32 to vector<1x128xf32>
    %72 = arith.addf %69, %71 : vector<1x128xf32>
    %73 = math.rsqrt %72 : vector<1x128xf32>
    %74 = arith.mulf %70, %73 : vector<1x128xf32>
    %c0_59 = arith.constant 0 : index
    %c0_60 = arith.constant 0 : index
    %75 = vector.load %arg3[%c0_59, %c0_60] : memref<1x128xf32, #tpu.memory_space<vmem>>, vector<1x128xf32>
    %76 = arith.mulf %63, %74 : vector<1x128xf32>
    %77 = arith.subf %75, %76 : vector<1x128xf32>
    %c0_61 = arith.constant 0 : index
    %c0_62 = arith.constant 0 : index
    %78 = vector.load %arg6[%c0_61, %c0_62] : memref<464x128xf32, #tpu.memory_space<vmem>>, vector<256x128xf32>
    %79 = vector.broadcast %74 : vector<1x128xf32> to vector<256x128xf32>
    %80 = arith.mulf %78, %79 : vector<256x128xf32>
    %81 = vector.broadcast %77 : vector<1x128xf32> to vector<256x128xf32>
    %82 = arith.addf %80, %81 : vector<256x128xf32>
    %cst_63 = arith.constant 0.000000e+00 : f32
    %83 = vector.broadcast %cst_63 : f32 to vector<256x128xf32>
    %84 = arith.maximumf %82, %83 : vector<256x128xf32>
    %85 = arith.truncf %84 : vector<256x128xf32> to vector<256x128xbf16>
    %c0_64 = arith.constant 0 : index
    %c0_65 = arith.constant 0 : index
    %86 = vector.load %arg5[%c0_64, %c0_65] : memref<464x128xbf16, #tpu.memory_space<vmem>>, vector<256x128xbf16>
    tpu.vector_store %arg5[%c0_64, %c0_65], %85 {strides = array<i32>} : memref<464x128xbf16, #tpu.memory_space<vmem>>, vector<256x128xbf16>,
    %c256_66 = arith.constant 256 : index
    %c0_67 = arith.constant 0 : index
    %87 = vector.load %arg6[%c256_66, %c0_67] : memref<464x128xf32, #tpu.memory_space<vmem>>, vector<208x128xf32>
    %88 = vector.broadcast %74 : vector<1x128xf32> to vector<208x128xf32>
    %89 = arith.mulf %87, %88 : vector<208x128xf32>
    %90 = vector.broadcast %77 : vector<1x128xf32> to vector<208x128xf32>
    %91 = arith.addf %89, %90 : vector<208x128xf32>
    %cst_68 = arith.constant 0.000000e+00 : f32
    %92 = vector.broadcast %cst_68 : f32 to vector<208x128xf32>
    %93 = arith.maximumf %91, %92 : vector<208x128xf32>
    %94 = arith.truncf %93 : vector<208x128xf32> to vector<208x128xbf16>
    %c256_69 = arith.constant 256 : index
    %c0_70 = arith.constant 0 : index
    %95 = vector.load %arg5[%c256_69, %c0_70] : memref<464x128xbf16, #tpu.memory_space<vmem>>, vector<208x128xbf16>
    tpu.vector_store %arg5[%c256_69, %c0_70], %94 {strides = array<i32>} : memref<464x128xbf16, #tpu.memory_space<vmem>>, vector<208x128xbf16>,
    return
  }
}

module attributes {stable_mosaic.version = 11 : i64} {
  func.func @_convt_tanh_kernel(%arg0: i32, %arg1: memref<2x256x128xbf16, #tpu.memory_space<vmem>>, %arg2: memref<2x128x128xbf16, #tpu.memory_space<vmem>>, %arg3: memref<1x1xf32, #tpu.memory_space<vmem>>, %arg4: memref<256x1xf32, #tpu.memory_space<vmem>>) attributes {dimension_semantics = [#tpu.dimension_semantics<parallel>], iteration_bounds = array<i64: 8>, scalar_prefetch = 0 : i64, scratch_operands = 0 : i64, tpu.core_type = #tpu.core_type<tc>, window_params = [{transform_indices = @transform_0, window_bounds = array<i64: 2, 256, 128>}, {pipeline_mode = #tpu.pipeline_mode<synchronous>, transform_indices = @transform_1, window_bounds = array<i64: 2, 128, 128>}, {pipeline_mode = #tpu.pipeline_mode<synchronous>, transform_indices = @transform_2, window_bounds = array<i64: 1, 1>}, {transform_indices = @transform_3, window_bounds = array<i64: 256, 1>}]} {
    %cst = arith.constant 0.000000e+00 : f32
    %0 = vector.broadcast %cst : f32 to vector<256x128xf32>
    %c0 = arith.constant 0 : index
    %c0_0 = arith.constant 0 : index
    %c0_1 = arith.constant 0 : index
    %1 = vector.load %arg1[%c0, %c0_0, %c0_1] : memref<2x256x128xbf16, #tpu.memory_space<vmem>>, vector<1x256x128xbf16>
    %2 = vector.shape_cast %1 : vector<1x256x128xbf16> to vector<256x128xbf16>
    %c0_2 = arith.constant 0 : index
    %c0_3 = arith.constant 0 : index
    %c0_4 = arith.constant 0 : index
    %3 = vector.load %arg2[%c0_2, %c0_3, %c0_4] : memref<2x128x128xbf16, #tpu.memory_space<vmem>>, vector<1x128x128xbf16>
    %4 = vector.shape_cast %3 : vector<1x128x128xbf16> to vector<128x128xbf16>
    %cst_5 = arith.constant dense<0.000000e+00> : vector<256x128xf32>
    %5 = tpu.matmul %2, %4, %cst_5 {dimension_numbers = #tpu.dot_dimension_numbers<[1], [0], [0], [1], [0, 0, 1, 1], [], []>} : vector<256x128xbf16>, vector<128x128xbf16>, vector<256x128xf32> -> vector<256x128xf32>
    %6 = arith.addf %0, %5 : vector<256x128xf32>
    %c1 = arith.constant 1 : index
    %c0_6 = arith.constant 0 : index
    %c0_7 = arith.constant 0 : index
    %7 = vector.load %arg1[%c1, %c0_6, %c0_7] : memref<2x256x128xbf16, #tpu.memory_space<vmem>>, vector<1x256x128xbf16>
    %8 = vector.shape_cast %7 : vector<1x256x128xbf16> to vector<256x128xbf16>
    %c1_8 = arith.constant 1 : index
    %c0_9 = arith.constant 0 : index
    %c0_10 = arith.constant 0 : index
    %9 = vector.load %arg2[%c1_8, %c0_9, %c0_10] : memref<2x128x128xbf16, #tpu.memory_space<vmem>>, vector<1x128x128xbf16>
    %10 = vector.shape_cast %9 : vector<1x128x128xbf16> to vector<128x128xbf16>
    %cst_11 = arith.constant dense<0.000000e+00> : vector<256x128xf32>
    %11 = tpu.matmul %8, %10, %cst_11 {dimension_numbers = #tpu.dot_dimension_numbers<[1], [0], [0], [1], [0, 0, 1, 1], [], []>} : vector<256x128xbf16>, vector<128x128xbf16>, vector<256x128xf32> -> vector<256x128xf32>
    %12 = arith.addf %6, %11 : vector<256x128xf32>
    %13 = vector.extract_strided_slice %12 {offsets = [0, 0], sizes = [256, 1], strides = [1, 1]} : vector<256x128xf32> to vector<256x1xf32>
    %c0_12 = arith.constant 0 : index
    %c0_13 = arith.constant 0 : index
    %14 = vector.load %arg3[%c0_12, %c0_13] : memref<1x1xf32, #tpu.memory_space<vmem>>, vector<1x1xf32>
    %15 = vector.broadcast %14 : vector<1x1xf32> to vector<256x1xf32>
    %16 = arith.addf %13, %15 : vector<256x1xf32>
    %17 = math.tanh %16 : vector<256x1xf32>
    %c0_14 = arith.constant 0 : index
    %c0_15 = arith.constant 0 : index
    %18 = vector.load %arg4[%c0_14, %c0_15] : memref<256x1xf32, #tpu.memory_space<vmem>>, vector<256x1xf32>
    tpu.vector_store %arg4[%c0_14, %c0_15], %17 {strides = array<i32>} : memref<256x1xf32, #tpu.memory_space<vmem>>, vector<256x1xf32>,
    return
  }
  func.func @transform_0(%arg0: i32) -> (i32, i32, i32) {
    %c0_i32 = arith.constant 0 : i32
    %c0_i32_0 = arith.constant 0 : i32
    %c0_i32_1 = arith.constant 0 : i32
    return %c0_i32, %arg0, %c0_i32_0 : i32, i32, i32
  }
  func.func @transform_1(%arg0: i32) -> (i32, i32, i32) {
    %c0_i32 = arith.constant 0 : i32
    %c0_i32_0 = arith.constant 0 : i32
    %c0_i32_1 = arith.constant 0 : i32
    %c0_i32_2 = arith.constant 0 : i32
    return %c0_i32, %c0_i32_0, %c0_i32_1 : i32, i32, i32
  }
  func.func @transform_2(%arg0: i32) -> (i32, i32) {
    %c0_i32 = arith.constant 0 : i32
    %c0_i32_0 = arith.constant 0 : i32
    %c0_i32_1 = arith.constant 0 : i32
    return %c0_i32, %c0_i32_0 : i32, i32
  }
  func.func @transform_3(%arg0: i32) -> (i32, i32) {
    %c0_i32 = arith.constant 0 : i32
    %c0_i32_0 = arith.constant 0 : i32
    return %arg0, %c0_i32 : i32, i32
  }
}

</mosaic_0001>

<bundles_post_ra>
// kernel: forward.4
= control target key start
LH: loop header
LB: loop body
LE: loop exit
PB: predicated region body
PF: predicated region fallthrough
CT: control target
= control target key end

     0   :  { %v437_v1 = vmov 0   ;;  %s581_s1 = inlined_call_operand.vmem [shape: bf16[1,128,128], index: 1, kind: input, shape index: {}]   ;;  %s582_s4 = inlined_call_operand.vmem [shape: f32[64,1], index: 4, kind: input, shape index: {}]   ;;  %s583_s0 = inlined_call_operand.vmem [shape: bf16[1,64,128], index: 0, kind: input, shape index: {}]   ;;  %s584_s2 = inlined_call_operand.vmem [shape: f32[1,128], index: 2, kind: input, shape index: {}]   ;;  %s585_s3 = inlined_call_operand.vmem [shape: f32[1,128], index: 3, kind: input, shape index: {}]   ;;  %s586_s5 = inlined_call_operand.vmem [shape: bf16[64,128], index: 5, kind: output, shape index: {}]  }
   0x1   :  { %v383_v0 = vld [vmem:[%s581_s1 + $0x38] sm:$0xff]  ;;  %432 = vset.pattern.permute.xlu0 %v437_v1  ;;  %433 = vset.pattern.permute.xlu1 %v437_v1  ;;  %v382_v2 = vld [vmem:[%s581_s1 + $0x30] sm:$0xff]  ;;  %v145_v3 = vld [vmem:[%s582_s4] sm:$0xff] }
   0x2   :  { %434 = vset.pattern.permute.xlu2 %v437_v1  ;;  %116 = vmatpush.bf16.msra.mxu0 %v383_v0  ;;  %v147_v4 = vld [vmem:[%s582_s4 + $0x10] sm:$0xff]  ;;  %v381_v5 = vld [vmem:[%s581_s1 + $0x28] sm:$0xff]  ;;  %v149_v6 = vld [vmem:[%s582_s4 + $0x20] sm:$0xff] }
   0x3   :  { %407 = vmatpush.bf16.msra.mxu1 %v383_v0  ;;  %408 = vmatpush.bf16.msra.mxu2 %v383_v0  ;;  %v146_v7 = vld [vmem:[%s582_s4 + $0x8] sm:$0xff]  ;;  %v148_v8 = vld [vmem:[%s582_s4 + $0x18] sm:$0xff]  ;;  %v380_v9 = vld [vmem:[%s581_s1 + $0x20] sm:$0xff] }
   0x4   :  { %409 = vmatpush.bf16.msra.mxu3 %v383_v0  ;;  %155 = vperm.xlu0 %432, %v145_v3   ;;  %v150_v10 = vld [vmem:[%s582_s4 + $0x28] sm:$0xff]  ;;  %v379_v11 = vld [vmem:[%s581_s1 + $0x18] sm:$0xff]  ;;  %v151_v12 = vld [vmem:[%s582_s4 + $0x30] sm:$0xff] }
   0x5   :  { %165 = vperm.xlu1 %433, %v147_v4   ;;  %175 = vperm.xlu2 %434, %v149_v6   ;;  %v152_v13 = vld [vmem:[%s582_s4 + $0x38] sm:$0xff]  ;;  %v378_v14 = vld [vmem:[%s581_s1 + $0x10] sm:$0xff]  ;;  %v377_v15 = vld [vmem:[%s581_s1 + $0x8] sm:$0xff] }
   0x6   :  { %117 = vmatpush.bf16.msra.mxu0 %v382_v2  ;;  %v376_v16 = vld [vmem:[%s581_s1] sm:$0xff]  ;;  %v373_v18 = vld [vmem:[%s583_s0 + $0x8] sm:$0xff]  ;;  %v374_v19 = vld [vmem:[%s583_s0 + $0x10] sm:$0xff] }
   0x7   :  { %410 = vmatpush.bf16.msra.mxu1 %v382_v2  ;;  %411 = vmatpush.bf16.msra.mxu2 %v382_v2  ;;  %v372_v17 = vld [vmem:[%s583_s0] sm:$0xff]  ;;  %v375_v20 = vld [vmem:[%s583_s0 + $0x18] sm:$0xff] }
   0x8   :  { %412 = vmatpush.bf16.msra.mxu3 %v382_v2 }
   0xa   :  { %118 = vmatpush.bf16.msra.mxu0 %v381_v5 }
   0xb   :  { %413 = vmatpush.bf16.msra.mxu1 %v381_v5  ;;  %414 = vmatpush.bf16.msra.mxu2 %v381_v5 }
   0xc   :  { %415 = vmatpush.bf16.msra.mxu3 %v381_v5  ;;  %160 = vperm.xlu0 %432, %v146_v7  }
   0xd   :  { %170 = vperm.xlu1 %433, %v148_v8   ;;  %180 = vperm.xlu2 %434, %v150_v10  }
   0xe   :  { %119 = vmatpush.bf16.msra.mxu0 %v380_v9 }
   0xf   :  { %416 = vmatpush.bf16.msra.mxu1 %v380_v9  ;;  %417 = vmatpush.bf16.msra.mxu2 %v380_v9 }
  0x10   :  { %418 = vmatpush.bf16.msra.mxu3 %v380_v9 }
  0x12   :  { %120 = vmatpush.bf16.msra.mxu0 %v379_v11 }
  0x13   :  { %419 = vmatpush.bf16.msra.mxu1 %v379_v11  ;;  %420 = vmatpush.bf16.msra.mxu2 %v379_v11 }
  0x14   :  { %421 = vmatpush.bf16.msra.mxu3 %v379_v11  ;;  %185 = vperm.xlu0 %432, %v151_v12  }
  0x15   :  { %190 = vperm.xlu1 %433, %v152_v13  }
  0x16   :  { %121 = vmatpush.bf16.msra.mxu0 %v378_v14 }
  0x17   :  { %422 = vmatpush.bf16.msra.mxu1 %v378_v14  ;;  %423 = vmatpush.bf16.msra.mxu2 %v378_v14 }
  0x18   :  { %424 = vmatpush.bf16.msra.mxu3 %v378_v14 }
  0x1a   :  { %122 = vmatpush.bf16.msra.mxu0 %v377_v15 }
  0x1b   :  { %425 = vmatpush.bf16.msra.mxu1 %v377_v15  ;;  %426 = vmatpush.bf16.msra.mxu2 %v377_v15 }
  0x1c   :  { %427 = vmatpush.bf16.msra.mxu3 %v377_v15 }
  0x1e   :  { %123 = vmatpush.bf16.msra.mxu0 %v376_v16 }
  0x1f   :  { %428 = vmatpush.bf16.msra.mxu1 %v376_v16  ;;  %429 = vmatpush.bf16.msra.mxu2 %v376_v16 }
  0x20   :  { %430 = vmatpush.bf16.msra.mxu3 %v376_v16 }
  0x21   :  { %124 = vmatmul.bf16.vlgmr.msra.gmra.mxu0 %v372_v17 }
  0x22   :  { %129 = vmatmul.bf16.vlgmr.msra.gmra.mxu1 %v373_v18  ;;  %134 = vmatmul.bf16.vlgmr.msra.gmra.mxu2 %v374_v19 }
  0x23   :  { %139 = vmatmul.bf16.vlgmr.msra.gmra.mxu3 %v375_v20 }
  0x5f   :  { %v176_v25 = vpop.permute.xlu2 %175 }
  0x67   :  { %v181_v43 = vpop.permute.xlu2 %180 }
  0x76   :  { %v156_v21 = vpop.permute.xlu0 %155 }
  0x77   :  { %v166_v22 = vpop.permute.xlu1 %165 }
  0x7e   :  { %v161_v26 = vpop.permute.xlu0 %160 }
  0x7f   :  { %v171_v27 = vpop.permute.xlu1 %170 }
  0x86   :  { %v186_v48 = vpop.permute.xlu0 %185 }
  0x87   :  { %v191_v55 = vpop.permute.xlu1 %190 }
  0x9e   :  { %v528_v23 = vpop.f32.mrf.mxu0 }
  0x9f   :  { %v530_v24 = vpop.f32.mrf.mxu1  ;;  %v193_v28 = vmul.f32 %v156_v21, %v528_v23 }
  0xa0   :  { %v195_v33 = vmul.f32 %v166_v22, %v530_v24 }
  0xa1   :  { %v215_v35 = vmul.f32 %v193_v28, %v528_v23 }
  0xa2   :  { %v217_v39 = vmul.f32 %v195_v33, %v530_v24 }
  0xa5   :  { %v533_v29 = vpop.f32.mrf.mxu2 }
  0xa6   :  { %v535_v30 = vpop.f32.mrf.mxu3  ;;  %v537_v31 = vpop.f32.mrf.mxu0  ;;  %v197_v40 = vmul.f32 %v176_v25, %v533_v29 }
  0xa7   :  { %v539_v32 = vpop.f32.mrf.mxu1  ;;  %v194_v34 = vmul.f32 %v161_v26, %v537_v31  ;;  %v199_v52 = vmul.f32 %v186_v48, %v535_v30 }
  0xa8   :  { %v196_v38 = vmul.f32 %v171_v27, %v539_v32  ;;  %v219_v51 = vmul.f32 %v197_v40, %v533_v29 }
  0xa9   :  { %v201_v36 = vadd.f32 %v194_v34, %v193_v28  ;;  %v216_v37 = vmul.f32 %v194_v34, %v537_v31  ;;  %v221_v60 = vmul.f32 %v199_v52, %v535_v30  ;;  %v250_v28 = vld [vmem:[%s584_s2] sm:$0x1] }
  0xaa   :  { %v218_v45 = vmul.f32 %v196_v38, %v539_v32 }
  0xab   :  { %v223_v41 = vadd.f32 %v216_v37, %v215_v35  ;;  %v202_v42 = vadd.f32 %v201_v36, %v195_v33  ;;  %v263_v36 = vld [vmem:[%s585_s3] sm:$0x1] }
  0xad   :  { %v203_v44 = vadd.f32 %v202_v42, %v196_v38  ;;  %v224_v46 = vadd.f32 %v223_v41, %v217_v39  ;;  %v549_v47 = vpop.f32.mrf.mxu2 }
  0xae   :  { %v198_v49 = vmul.f32 %v181_v43, %v549_v47  ;;  %v142_v50 = vpop.f32.mrf.mxu3 }
  0xaf   :  { %v225_v53 = vadd.f32 %v224_v46, %v218_v45  ;;  %v204_v54 = vadd.f32 %v203_v44, %v197_v40  ;;  %v200_v59 = vmul.f32 %v191_v55, %v142_v50 }
  0xb0   :  { %v220_v57 = vmul.f32 %v198_v49, %v549_v47 }
  0xb1   :  { %v205_v56 = vadd.f32 %v204_v54, %v198_v49  ;;  %v226_v58 = vadd.f32 %v225_v53, %v219_v51  ;;  %v222_v0 = vmul.f32 %v200_v59, %v142_v50 }
  0xb3   :  { %v227_v61 = vadd.f32 %v226_v58, %v220_v57  ;;  %v206_v62 = vadd.f32 %v205_v56, %v199_v52 }
  0xb5   :  { %v207_v63 = vadd.f32 %v206_v62, %v200_v59  ;;  %v228_v1 = vadd.f32 %v227_v61, %v221_v60 }
  0xb7   :  { %v208_v2 = vrot.slane %v207_v63, 4  ;;  %v229_v3 = vadd.f32 %v228_v1, %v222_v0 }
  0xb9   :  { %v209_v4 = vadd.f32 %v208_v2, %v207_v63  ;;  %v230_v5 = vrot.slane %v229_v3, 4 }
  0xbb   :  { %v210_v6 = vrot.slane %v209_v4, 2  ;;  %v231_v7 = vadd.f32 %v230_v5, %v229_v3 }
  0xbd   :  { %v211_v8 = vadd.f32 %v210_v6, %v209_v4  ;;  %v232_v9 = vrot.slane %v231_v7, 2 }
  0xbf   :  { %v212_v10 = vrot.slane %v211_v8, 1  ;;  %v233_v11 = vadd.f32 %v232_v9, %v231_v7 }
  0xc1   :  { %v213_v12 = vadd.f32 %v212_v10, %v211_v8  ;;  %v234_v13 = vrot.slane %v233_v11, 1 }
  0xc3   :  { %v235_v14 = vadd.f32 %v234_v13, %v233_v11  ;;  %v245_v15 = vmul.f32 0.055555556, %v213_v12 }
  0xc5   :  { %v246_v16 = vmul.f32 0.055555556, %v235_v14  ;;  %v247_v17 = vmul.f32 %v245_v15, %v245_v15 }
  0xc7   :  { %v248_v18 = vsub.f32 %v246_v16, %v247_v17 }
  0xc9   :  { %v249_v19 = vmax.f32 %v248_v18, 0.0 }
  0xcb   :  { %v251_v20 = vadd.f32 1e-05, %v249_v19 }
  0xcd   :  { %435 = vrsqrt.f32 %v251_v20  ;;  %vm258_vm1 = vweird.f32 %v251_v20 }
  0xd3   :  { %v436_v21 = vpop.eup %435 }
  0xd4   :  { %v253_v22 = vmul.f32 %v436_v21, %v251_v20  ;;  %vm259_vm0 = vweird.f32 %v436_v21 }
  0xd5   :  { %vm260_vm2 = vmor %vm258_vm1, %vm259_vm0 }
  0xd6   :  { %v254_v25 = vmul.f32 %v436_v21, %v253_v22 }
  0xd8   :  { %v255_v26 = vmul.f32 0.5, %v254_v25 }
  0xda   :  { %v256_v27 = vsub.f32 1.5, %v255_v26 }
  0xdc   :  { %v257_v33 = vmul.f32 %v436_v21, %v256_v27 }
  0xde   :  { %v261_v34 = vsel %vm260_vm2, %v436_v21, %v257_v33 }
  0xdf   :  { %v262_v35 = vmul.f32 %v261_v34, %v250_v28 }
  0xe1   :  { %v264_v37 = vmul.f32 %v262_v35, %v245_v15  ;;  %v275_v38 = vperm.slane %v262_v35, 0 }
  0xe3   :  { %v265_v39 = vsub.f32 %v263_v36, %v264_v37  ;;  %v277_v40 = vmul.f32 %v275_v38, %v528_v23  ;;  %v278_v41 = vmul.f32 %v275_v38, %v537_v31  ;;  %v279_v42 = vmul.f32 %v275_v38, %v530_v24 }
  0xe4   :  { %v280_v43 = vmul.f32 %v275_v38, %v539_v32  ;;  %v281_v45 = vmul.f32 %v275_v38, %v533_v29  ;;  %v282_v46 = vmul.f32 %v275_v38, %v549_v47  ;;  %v283_v48 = vmul.f32 %v275_v38, %v535_v30 }
  0xe5   :  { %v286_v44 = vperm.slane %v265_v39, 0  ;;  %v284_v49 = vmul.f32 %v275_v38, %v142_v50 }
  0xe7   :  { %v288_v51 = vadd.f32 %v286_v44, %v277_v40  ;;  %v289_v52 = vadd.f32 %v286_v44, %v278_v41  ;;  %v290_v53 = vadd.f32 %v286_v44, %v279_v42  ;;  %v291_v54 = vadd.f32 %v286_v44, %v280_v43 }
  0xe8   :  { %v292_v55 = vadd.f32 %v286_v44, %v281_v45  ;;  %v293_v23 = vadd.f32 %v286_v44, %v282_v46  ;;  %v294_v56 = vadd.f32 %v286_v44, %v283_v48  ;;  %v295_v31 = vadd.f32 %v286_v44, %v284_v49 }
  0xe9   :  { %v296_v57 = vmax.f32 %v288_v51, 0.0  ;;  %v297_v24 = vmax.f32 %v289_v52, 0.0  ;;  %v298_v58 = vmax.f32 %v290_v53, 0.0  ;;  %v299_v32 = vmax.f32 %v291_v54, 0.0 }
  0xea   :  { %v300_v59 = vmax.f32 %v292_v55, 0.0  ;;  %v301_v60 = vmax.f32 %v293_v23, 0.0  ;;  %v302_v29 = vmax.f32 %v294_v56, 0.0  ;;  %v303_v61 = vmax.f32 %v295_v31, 0.0 }
  0xeb   :  { %v387_v47 = vpack.c.bf16 %v297_v24, %v296_v57  ;;  %v392_v62 = vpack.c.bf16 %v299_v32, %v298_v58 }
  0xec   :  { %v397_v30 = vpack.c.bf16 %v301_v60, %v300_v59  ;;  %v402_v50 = vpack.c.bf16 %v303_v61, %v302_v29 }
  0xed   :  { %388 = vst [vmem:[%s586_s5] sm:$0xff] %v387_v47  }
  0xee   :  { %404 = vst [vmem:[%s586_s5 + $0x8] sm:$0xff] %v392_v62  }
  0xef   :  { %405 = vst [vmem:[%s586_s5 + $0x10] sm:$0xff] %v397_v30  }
  0xf0   :  { %406 = vst [vmem:[%s586_s5 + $0x18] sm:$0xff] %v402_v50  }

// kernel: forward.5
= control target key start
LH: loop header
LB: loop body
LE: loop exit
PB: predicated region body
PF: predicated region fallthrough
CT: control target
= control target key end

     0   :  { %s4213_s1 = inlined_call_operand.vmem [shape: bf16[8,128,128], index: 1, kind: input, shape index: {}]   ;;  %s4214_s0 = inlined_call_operand.vmem [shape: bf16[8,176,128], index: 0, kind: input, shape index: {}]   ;;  %s4215_s4 = inlined_call_operand.vmem [shape: f32[176,1], index: 4, kind: input, shape index: {}]   ;;  %s4216_s2 = inlined_call_operand.vmem [shape: f32[1,128], index: 2, kind: input, shape index: {}]   ;;  %s4217_s3 = inlined_call_operand.vmem [shape: f32[1,128], index: 3, kind: input, shape index: {}]   ;;  %s4218_s5 = inlined_call_operand.vmem [shape: bf16[176,128], index: 5, kind: output, shape index: {}]  }
   0x1   :  { %v3222_v0 = vld [vmem:[%s4213_s1 + $0x78] sm:$0xff]  ;;  %v3221_v4 = vld [vmem:[%s4213_s1 + $0x70] sm:$0xff]  ;;  %v3220_v8 = vld [vmem:[%s4213_s1 + $0x68] sm:$0xff] }
   0x2   :  { %v3203_v1 = vld [vmem:[%s4213_s1 + $0x38] sm:$0xff]  ;;  %212 = vmatpush.bf16.msra.mxu0 %v3222_v0  ;;  %v3202_v5 = vld [vmem:[%s4213_s1 + $0x30] sm:$0xff]  ;;  %v3201_v9 = vld [vmem:[%s4213_s1 + $0x28] sm:$0xff] }
   0x3   :  { %v3241_v2 = vld [vmem:[%s4213_s1 + $0xb8] sm:$0xff]  ;;  %390 = vmatpush.bf16.msra.mxu1 %v3203_v1  ;;  %v3240_v6 = vld [vmem:[%s4213_s1 + $0xb0] sm:$0xff]  ;;  %v3239_v10 = vld [vmem:[%s4213_s1 + $0xa8] sm:$0xff] }
   0x4   :  { %v3260_v3 = vld [vmem:[%s4213_s1 + $0xf8] sm:$0xff]  ;;  %608 = vmatpush.bf16.msra.mxu2 %v3241_v2  ;;  %v3259_v7 = vld [vmem:[%s4213_s1 + $0xf0] sm:$0xff]  ;;  %v3258_v11 = vld [vmem:[%s4213_s1 + $0xe8] sm:$0xff] }
   0x5   :  { %848 = vmatpush.bf16.msra.mxu3 %v3260_v3  ;;  %v3219_v12 = vld [vmem:[%s4213_s1 + $0x60] sm:$0xff]  ;;  %v3218_v16 = vld [vmem:[%s4213_s1 + $0x58] sm:$0xff]  ;;  %v3217_v20 = vld [vmem:[%s4213_s1 + $0x50] sm:$0xff] }
   0x6   :  { %213 = vmatpush.bf16.msra.mxu0 %v3221_v4  ;;  %v3200_v13 = vld [vmem:[%s4213_s1 + $0x20] sm:$0xff]  ;;  %v3199_v17 = vld [vmem:[%s4213_s1 + $0x18] sm:$0xff]  ;;  %v3198_v21 = vld [vmem:[%s4213_s1 + $0x10] sm:$0xff] }
   0x7   :  { %391 = vmatpush.bf16.msra.mxu1 %v3202_v5  ;;  %v3238_v14 = vld [vmem:[%s4213_s1 + $0xa0] sm:$0xff]  ;;  %v3237_v18 = vld [vmem:[%s4213_s1 + $0x98] sm:$0xff]  ;;  %v3236_v22 = vld [vmem:[%s4213_s1 + $0x90] sm:$0xff] }
   0x8   :  { %609 = vmatpush.bf16.msra.mxu2 %v3240_v6  ;;  %v3257_v15 = vld [vmem:[%s4213_s1 + $0xe0] sm:$0xff]  ;;  %v3256_v19 = vld [vmem:[%s4213_s1 + $0xd8] sm:$0xff]  ;;  %v3255_v23 = vld [vmem:[%s4213_s1 + $0xd0] sm:$0xff] }
   0x9   :  { %849 = vmatpush.bf16.msra.mxu3 %v3259_v7  ;;  %v3216_v24 = vld [vmem:[%s4213_s1 + $0x48] sm:$0xff]  ;;  %v3215_v28 = vld [vmem:[%s4213_s1 + $0x40] sm:$0xff]  ;;  %v3317_v32 = vld [vmem:[%s4213_s1 + $0x1b8] sm:$0xff] }
   0xa   :  { %214 = vmatpush.bf16.msra.mxu0 %v3220_v8  ;;  %v3197_v25 = vld [vmem:[%s4213_s1 + $0x8] sm:$0xff]  ;;  %v3196_v29 = vld [vmem:[%s4213_s1] sm:$0xff]  ;;  %v3279_v33 = vld [vmem:[%s4213_s1 + $0x138] sm:$0xff] }
   0xb   :  { %392 = vmatpush.bf16.msra.mxu1 %v3201_v9  ;;  %v3235_v26 = vld [vmem:[%s4213_s1 + $0x88] sm:$0xff]  ;;  %v3234_v30 = vld [vmem:[%s4213_s1 + $0x80] sm:$0xff]  ;;  %v3204_v34 = vld [vmem:[%s4214_s0 + $0x58] sm:$0xff] }
   0xc   :  { %610 = vmatpush.bf16.msra.mxu2 %v3239_v10  ;;  %v3254_v27 = vld [vmem:[%s4213_s1 + $0xc8] sm:$0xff]  ;;  %v3253_v31 = vld [vmem:[%s4213_s1 + $0xc0] sm:$0xff]  ;;  %v3223_v36 = vld [vmem:[%s4214_s0 + $0xb0] sm:$0xff] }
   0xd   :  { %850 = vmatpush.bf16.msra.mxu3 %v3258_v11  ;;  %v3185_v35 = vld [vmem:[%s4214_s0] sm:$0xff]  ;;  %v3242_v37 = vld [vmem:[%s4214_s0 + $0x108] sm:$0xff]  ;;  %v3336_v38 = vld [vmem:[%s4213_s1 + $0x1f8] sm:$0xff] }
   0xe   :  { %215 = vmatpush.bf16.msra.mxu0 %v3219_v12  ;;  %v3298_v39 = vld [vmem:[%s4213_s1 + $0x178] sm:$0xff]  ;;  %v3316_v40 = vld [vmem:[%s4213_s1 + $0x1b0] sm:$0xff]  ;;  %v3315_v44 = vld [vmem:[%s4213_s1 + $0x1a8] sm:$0xff] }
   0xf   :  { %393 = vmatpush.bf16.msra.mxu1 %v3200_v13  ;;  %v3278_v41 = vld [vmem:[%s4213_s1 + $0x130] sm:$0xff]  ;;  %v3277_v45 = vld [vmem:[%s4213_s1 + $0x128] sm:$0xff]  ;;  %v3205_v47 = vld [vmem:[%s4214_s0 + $0x60] sm:$0xff] }
  0x10   :  { %611 = vmatpush.bf16.msra.mxu2 %v3238_v14  ;;  %v3335_v42 = vld [vmem:[%s4213_s1 + $0x1f0] sm:$0xff]  ;;  %v3334_v46 = vld [vmem:[%s4213_s1 + $0x1e8] sm:$0xff]  ;;  %v3224_v49 = vld [vmem:[%s4214_s0 + $0xb8] sm:$0xff] }
  0x11   :  { %851 = vmatpush.bf16.msra.mxu3 %v3257_v15  ;;  %v3297_v43 = vld [vmem:[%s4213_s1 + $0x170] sm:$0xff]  ;;  %v3186_v48 = vld [vmem:[%s4214_s0 + $0x8] sm:$0xff]  ;;  %v3225_v54 = vld [vmem:[%s4214_s0 + $0xc0] sm:$0xff] }
  0x12   :  { %216 = vmatpush.bf16.msra.mxu0 %v3218_v16  ;;  %v3243_v50 = vld [vmem:[%s4214_s0 + $0x110] sm:$0xff]  ;;  %v3296_v51 = vld [vmem:[%s4213_s1 + $0x168] sm:$0xff]  ;;  %v3244_v55 = vld [vmem:[%s4214_s0 + $0x118] sm:$0xff] }
  0x13   :  { %394 = vmatpush.bf16.msra.mxu1 %v3199_v17  ;;  %v3206_v52 = vld [vmem:[%s4214_s0 + $0x68] sm:$0xff]  ;;  %v3187_v53 = vld [vmem:[%s4214_s0 + $0x10] sm:$0xff]  ;;  %v3314_v56 = vld [vmem:[%s4213_s1 + $0x1a0] sm:$0xff] }
  0x14   :  { %612 = vmatpush.bf16.msra.mxu2 %v3237_v18  ;;  %v3276_v57 = vld [vmem:[%s4213_s1 + $0x120] sm:$0xff]  ;;  %v3207_v60 = vld [vmem:[%s4214_s0 + $0x70] sm:$0xff]  ;;  %v3188_v61 = vld [vmem:[%s4214_s0 + $0x18] sm:$0xff] }
  0x15   :  { %852 = vmatpush.bf16.msra.mxu3 %v3256_v19  ;;  %v3333_v58 = vld [vmem:[%s4213_s1 + $0x1e0] sm:$0xff]  ;;  %v3226_v62 = vld [vmem:[%s4214_s0 + $0xc8] sm:$0xff]  ;;  %v3313_v0 = vld [vmem:[%s4213_s1 + $0x198] sm:$0xff] }
  0x16   :  { %217 = vmatpush.bf16.msra.mxu0 %v3217_v20  ;;  %v3295_v59 = vld [vmem:[%s4213_s1 + $0x160] sm:$0xff]  ;;  %v3275_v1 = vld [vmem:[%s4213_s1 + $0x118] sm:$0xff]  ;;  %v3227_v6 = vld [vmem:[%s4214_s0 + $0xd0] sm:$0xff] }
  0x17   :  { %395 = vmatpush.bf16.msra.mxu1 %v3198_v21  ;;  %v3245_v63 = vld [vmem:[%s4214_s0 + $0x120] sm:$0xff]  ;;  %v3332_v2 = vld [vmem:[%s4213_s1 + $0x1d8] sm:$0xff]  ;;  %v3246_v7 = vld [vmem:[%s4214_s0 + $0x128] sm:$0xff] }
  0x18   :  { %613 = vmatpush.bf16.msra.mxu2 %v3236_v22  ;;  %v3294_v3 = vld [vmem:[%s4213_s1 + $0x158] sm:$0xff]  ;;  %v3189_v5 = vld [vmem:[%s4214_s0 + $0x20] sm:$0xff]  ;;  %v3312_v8 = vld [vmem:[%s4213_s1 + $0x190] sm:$0xff] }
  0x19   :  { %853 = vmatpush.bf16.msra.mxu3 %v3255_v23  ;;  %v3208_v4 = vld [vmem:[%s4214_s0 + $0x78] sm:$0xff]  ;;  %v3209_v9 = vld [vmem:[%s4214_s0 + $0x80] sm:$0xff]  ;;  %v3190_v10 = vld [vmem:[%s4214_s0 + $0x28] sm:$0xff] }
  0x1a   :  { %218 = vmatpush.bf16.msra.mxu0 %v3216_v24  ;;  %v3228_v11 = vld [vmem:[%s4214_s0 + $0xd8] sm:$0xff]  ;;  %v3247_v12 = vld [vmem:[%s4214_s0 + $0x130] sm:$0xff]  ;;  %v3210_v16 = vld [vmem:[%s4214_s0 + $0x88] sm:$0xff] }
  0x1b   :  { %396 = vmatpush.bf16.msra.mxu1 %v3197_v25  ;;  %v3274_v13 = vld [vmem:[%s4213_s1 + $0x110] sm:$0xff]  ;;  %v3229_v18 = vld [vmem:[%s4214_s0 + $0xe0] sm:$0xff]  ;;  %v3248_v19 = vld [vmem:[%s4214_s0 + $0x138] sm:$0xff] }
  0x1c   :  { %614 = vmatpush.bf16.msra.mxu2 %v3235_v26  ;;  %v3331_v14 = vld [vmem:[%s4213_s1 + $0x1d0] sm:$0xff]  ;;  %v3311_v20 = vld [vmem:[%s4213_s1 + $0x188] sm:$0xff]  ;;  %v3192_v25 = vld [vmem:[%s4214_s0 + $0x38] sm:$0xff] }
  0x1d   :  { %854 = vmatpush.bf16.msra.mxu3 %v3254_v27  ;;  %v3293_v15 = vld [vmem:[%s4213_s1 + $0x150] sm:$0xff]  ;;  %v3273_v21 = vld [vmem:[%s4213_s1 + $0x108] sm:$0xff]  ;;  %v3249_v27 = vld [vmem:[%s4214_s0 + $0x140] sm:$0xff] }
  0x1e   :  { %219 = vmatpush.bf16.msra.mxu0 %v3215_v28  ;;  %v3191_v17 = vld [vmem:[%s4214_s0 + $0x30] sm:$0xff]  ;;  %v3330_v22 = vld [vmem:[%s4213_s1 + $0x1c8] sm:$0xff]  ;;  %v3310_v28 = vld [vmem:[%s4213_s1 + $0x180] sm:$0xff] }
  0x1f   :  { %397 = vmatpush.bf16.msra.mxu1 %v3196_v29  ;;  %v3292_v23 = vld [vmem:[%s4213_s1 + $0x148] sm:$0xff]  ;;  %v3211_v24 = vld [vmem:[%s4214_s0 + $0x90] sm:$0xff]  ;;  %v3212_v29 = vld [vmem:[%s4214_s0 + $0x98] sm:$0xff] }
  0x20   :  { %615 = vmatpush.bf16.msra.mxu2 %v3234_v30  ;;  %v3230_v26 = vld [vmem:[%s4214_s0 + $0xe8] sm:$0xff]  ;;  %v3193_v30 = vld [vmem:[%s4214_s0 + $0x40] sm:$0xff] }
  0x21   :  { %855 = vmatpush.bf16.msra.mxu3 %v3253_v31  ;;  %220 = vmatmul.bf16.vlgmr.msra.gmra.mxu0 %v3204_v34  ;;  %v3250_v34 = vld [vmem:[%s4214_s0 + $0x148] sm:$0xff] }
  0x22   :  { %1088 = vmatpush.bf16.msrb.mxu0 %v3279_v33  ;;  %398 = vmatmul.bf16.vlgmr.msra.gmra.mxu1 %v3185_v35  ;;  %v3231_v33 = vld [vmem:[%s4214_s0 + $0xf0] sm:$0xff] }
  0x23   :  { %616 = vmatmul.bf16.vlgmr.msra.gmra.mxu2 %v3223_v36  ;;  %1328 = vmatpush.bf16.msrb.mxu1 %v3298_v39  ;;  %v3272_v36 = vld [vmem:[%s4213_s1 + $0x100] sm:$0xff] }
  0x24   :  { %1568 = vmatpush.bf16.msrb.mxu2 %v3317_v32  ;;  %856 = vmatmul.bf16.vlgmr.msra.gmra.mxu3 %v3242_v37  ;;  %v3329_v37 = vld [vmem:[%s4213_s1 + $0x1c0] sm:$0xff] }
  0x25   :  { %1808 = vmatpush.bf16.msrb.mxu3 %v3336_v38  ;;  %v3291_v38 = vld [vmem:[%s4213_s1 + $0x140] sm:$0xff] }
  0x26   :  { %1089 = vmatpush.bf16.msrb.mxu0 %v3278_v41 }
  0x27   :  { %1329 = vmatpush.bf16.msrb.mxu1 %v3297_v43 }
  0x28   :  { %1569 = vmatpush.bf16.msrb.mxu2 %v3316_v40 }
  0x29   :  { %1809 = vmatpush.bf16.msrb.mxu3 %v3335_v42 }
  0x2a   :  { %1090 = vmatpush.bf16.msrb.mxu0 %v3277_v45 }
  0x2b   :  { %1330 = vmatpush.bf16.msrb.mxu1 %v3296_v51 }
  0x2c   :  { %1570 = vmatpush.bf16.msrb.mxu2 %v3315_v44 }
  0x2d   :  { %1810 = vmatpush.bf16.msrb.mxu3 %v3334_v46 }
  0x2e   :  { %1091 = vmatpush.bf16.msrb.mxu0 %v3276_v57 }
  0x2f   :  { %1331 = vmatpush.bf16.msrb.mxu1 %v3295_v59 }
  0x30   :  { %1571 = vmatpush.bf16.msrb.mxu2 %v3314_v56 }
  0x31   :  { %225 = vmatmul.bf16.gmra.mxu0 %v3205_v47  ;;  %1811 = vmatpush.bf16.msrb.mxu3 %v3333_v58 }
  0x32   :  { %403 = vmatmul.bf16.gmra.mxu1 %v3186_v48  ;;  %1092 = vmatpush.bf16.msrb.mxu0 %v3275_v1  ;;  %v3213_v48 = vld [vmem:[%s4214_s0 + $0xa0] sm:$0xff] }
  0x33   :  { %621 = vmatmul.bf16.gmra.mxu2 %v3224_v49  ;;  %1332 = vmatpush.bf16.msrb.mxu1 %v3294_v3  ;;  %v3194_v49 = vld [vmem:[%s4214_s0 + $0x48] sm:$0xff]  ;;  %v3195_v3 = vld [vmem:[%s4214_s0 + $0x50] sm:$0xff] }
  0x34   :  { %861 = vmatmul.bf16.gmra.mxu3 %v3243_v50  ;;  %1572 = vmatpush.bf16.msrb.mxu2 %v3313_v0 }
  0x35   :  { %1812 = vmatpush.bf16.msrb.mxu3 %v3332_v2  ;;  %v3214_v2 = vld [vmem:[%s4214_s0 + $0xa8] sm:$0xff] }
  0x36   :  { %1093 = vmatpush.bf16.msrb.mxu0 %v3274_v13 }
  0x37   :  { %1333 = vmatpush.bf16.msrb.mxu1 %v3293_v15 }
  0x38   :  { %1573 = vmatpush.bf16.msrb.mxu2 %v3312_v8  ;;  %v3252_v8 = vld [vmem:[%s4214_s0 + $0x158] sm:$0xff] }
  0x39   :  { %1813 = vmatpush.bf16.msrb.mxu3 %v3331_v14 }
  0x3a   :  { %1094 = vmatpush.bf16.msrb.mxu0 %v3273_v21 }
  0x3b   :  { %1334 = vmatpush.bf16.msrb.mxu1 %v3292_v23  ;;  %v3280_v23 = vld [vmem:[%s4214_s0 + $0x1b8] sm:$0xff] }
  0x3c   :  { %1574 = vmatpush.bf16.msrb.mxu2 %v3311_v20 }
  0x3d   :  { %1814 = vmatpush.bf16.msrb.mxu3 %v3330_v22  ;;  %v3261_v22 = vld [vmem:[%s4214_s0 + $0x160] sm:$0xff] }
  0x3e   :  { %1095 = vmatpush.bf16.msrb.mxu0 %v3272_v36 }
  0x3f   :  { %1335 = vmatpush.bf16.msrb.mxu1 %v3291_v38 }
  0x40   :  { %1575 = vmatpush.bf16.msrb.mxu2 %v3310_v28  ;;  %v3318_v28 = vld [vmem:[%s4214_s0 + $0x268] sm:$0xff] }
  0x41   :  { %230 = vmatmul.bf16.gmra.mxu0 %v3206_v52  ;;  %1815 = vmatpush.bf16.msrb.mxu3 %v3329_v37  ;;  %v1896_v37 = vld [vmem:[%s4215_s4 + $0x10] sm:$0xff] }
  0x42   :  { %408 = vmatmul.bf16.gmra.mxu1 %v3187_v53  ;;  %v3232_v53 = vld [vmem:[%s4214_s0 + $0xf8] sm:$0xff] }
  0x43   :  { %626 = vmatmul.bf16.gmra.mxu2 %v3225_v54  ;;  %v3251_v54 = vld [vmem:[%s4214_s0 + $0x150] sm:$0xff] }
  0x44   :  { %866 = vmatmul.bf16.gmra.mxu3 %v3244_v55 }
  0x51   :  { %235 = vmatmul.bf16.gmra.mxu0 %v3207_v60 }
  0x52   :  { %413 = vmatmul.bf16.gmra.mxu1 %v3188_v61 }
  0x53   :  { %631 = vmatmul.bf16.gmra.mxu2 %v3226_v62 }
  0x54   :  { %871 = vmatmul.bf16.gmra.mxu3 %v3245_v63 }
  0x61   :  { %240 = vmatmul.bf16.gmra.mxu0 %v3208_v4 }
  0x62   :  { %418 = vmatmul.bf16.gmra.mxu1 %v3189_v5 }
  0x63   :  { %636 = vmatmul.bf16.gmra.mxu2 %v3227_v6 }
  0x64   :  { %876 = vmatmul.bf16.gmra.mxu3 %v3246_v7  ;;  %v3233_v7 = vld [vmem:[%s4214_s0 + $0x100] sm:$0xff] }
  0x71   :  { %245 = vmatmul.bf16.gmra.mxu0 %v3209_v9 }
  0x72   :  { %423 = vmatmul.bf16.gmra.mxu1 %v3190_v10 }
  0x73   :  { %641 = vmatmul.bf16.gmra.mxu2 %v3228_v11 }
  0x74   :  { %881 = vmatmul.bf16.gmra.mxu3 %v3247_v12 }
  0x81   :  { %250 = vmatmul.bf16.gmra.mxu0 %v3210_v16  ;;  %v3408_v16 = vmov 0  }
  0x82   :  { %428 = vmatmul.bf16.gmra.mxu1 %v3191_v17  ;;  %3403 = vset.pattern.permute.xlu0 %v3408_v16  ;;  %v1894_v17 = vld [vmem:[%s4215_s4] sm:$0xff] }
  0x83   :  { %646 = vmatmul.bf16.gmra.mxu2 %v3229_v18  ;;  %3404 = vset.pattern.permute.xlu1 %v3408_v16 }
  0x84   :  { %886 = vmatmul.bf16.gmra.mxu3 %v3248_v19  ;;  %1918 = vperm.xlu0 %3403, %v1894_v17  }
  0x85   :  { %3405 = vset.pattern.permute.xlu2 %v3408_v16  ;;  %1928 = vperm.xlu1 %3404, %v1896_v37  }
  0x91   :  { %255 = vmatmul.bf16.gmra.mxu0 %v3211_v24 }
  0x92   :  { %433 = vmatmul.bf16.gmra.mxu1 %v3192_v25 }
  0x93   :  { %651 = vmatmul.bf16.gmra.mxu2 %v3230_v26 }
  0x94   :  { %891 = vmatmul.bf16.gmra.mxu3 %v3249_v27  ;;  %v3299_v27 = vld [vmem:[%s4214_s0 + $0x210] sm:$0xff] }
  0x9e   :  { %v221_v31 = vpop.f32.mrf.mxu0 }
  0x9f   :  { %v399_v32 = vpop.f32.mrf.mxu1 }
  0xa0   :  { %v400_v35 = vadd.f32 %v399_v32, %v221_v31 }
  0xa1   :  { %260 = vmatmul.bf16.gmra.mxu0 %v3212_v29  ;;  %v1895_v29 = vld [vmem:[%s4215_s4 + $0x8] sm:$0xff] }
  0xa2   :  { %438 = vmatmul.bf16.gmra.mxu1 %v3193_v30  ;;  %1923 = vperm.xlu0 %3403, %v1895_v29   ;;  %v1901_v29 = vld [vmem:[%s4215_s4 + $0x38] sm:$0xff] }
  0xa3   :  { %656 = vmatmul.bf16.gmra.mxu2 %v3231_v33 }
  0xa4   :  { %896 = vmatmul.bf16.gmra.mxu3 %v3250_v34 }
  0xa6   :  { %v617_v39 = vpop.f32.mrf.mxu2  ;;  %v223_v42 = vpop.f32.mrf.mxu0 }
  0xa7   :  { %v857_v40 = vpop.f32.mrf.mxu3  ;;  %v672_v41 = vadd.f32 %v617_v39, %v400_v35  ;;  %v401_v43 = vpop.f32.mrf.mxu1 }
  0xa8   :  { %v402_v44 = vadd.f32 %v401_v43, %v223_v42  ;;  %v3262_v42 = vld [vmem:[%s4214_s0 + $0x168] sm:$0xff]  ;;  %v3281_v43 = vld [vmem:[%s4214_s0 + $0x1c0] sm:$0xff] }
  0xa9   :  { %v3739_v45 = vadd.f32 %v857_v40, %v672_v41 }
  0xae   :  { %v619_v46 = vpop.f32.mrf.mxu2  ;;  %v226_v51 = vpop.f32.mrf.mxu0 }
  0xaf   :  { %v859_v47 = vpop.f32.mrf.mxu3  ;;  %v673_v50 = vadd.f32 %v619_v46, %v402_v44  ;;  %v404_v52 = vpop.f32.mrf.mxu1 }
  0xb0   :  { %v405_v55 = vadd.f32 %v404_v52, %v226_v51 }
  0xb1   :  { %v3753_v56 = vadd.f32 %v859_v47, %v673_v50  ;;  %265 = vmatmul.bf16.gmra.mxu0 %v3213_v48  ;;  %v3300_v48 = vld [vmem:[%s4214_s0 + $0x218] sm:$0xff] }
  0xb2   :  { %443 = vmatmul.bf16.gmra.mxu1 %v3194_v49  ;;  %v3319_v49 = vld [vmem:[%s4214_s0 + $0x270] sm:$0xff]  ;;  %v1897_v50 = vld [vmem:[%s4215_s4 + $0x18] sm:$0xff] }
  0xb3   :  { %661 = vmatmul.bf16.gmra.mxu2 %v3232_v53  ;;  %1933 = vperm.xlu1 %3404, %v1897_v50   ;;  %v3303_v50 = vld [vmem:[%s4214_s0 + $0x230] sm:$0xff] }
  0xb4   :  { %901 = vmatmul.bf16.gmra.mxu3 %v3251_v54 }
  0xb6   :  { %v622_v57 = vpop.f32.mrf.mxu2  ;;  %v228_v60 = vpop.f32.mrf.mxu0 }
  0xb7   :  { %v862_v58 = vpop.f32.mrf.mxu3  ;;  %v674_v59 = vadd.f32 %v622_v57, %v405_v55  ;;  %v406_v61 = vpop.f32.mrf.mxu1 }
  0xb8   :  { %v407_v62 = vadd.f32 %v406_v61, %v228_v60 }
  0xb9   :  { %v3755_v63 = vadd.f32 %v862_v58, %v674_v59 }
  0xbb   :  { %1953 = vperm.xlu1 %3404, %v1901_v29  }
  0xbe   :  { %v624_v0 = vpop.f32.mrf.mxu2  ;;  %v231_v5 = vpop.f32.mrf.mxu0 }
  0xbf   :  { %v864_v1 = vpop.f32.mrf.mxu3  ;;  %v675_v4 = vadd.f32 %v624_v0, %v407_v62  ;;  %v409_v6 = vpop.f32.mrf.mxu1  ;;  %v3263_v0 = vld [vmem:[%s4214_s0 + $0x170] sm:$0xff] }
  0xc0   :  { %v410_v9 = vadd.f32 %v409_v6, %v231_v5  ;;  %v3301_v5 = vld [vmem:[%s4214_s0 + $0x220] sm:$0xff]  ;;  %v3320_v6 = vld [vmem:[%s4214_s0 + $0x278] sm:$0xff] }
  0xc1   :  { %v3769_v10 = vadd.f32 %v864_v1, %v675_v4  ;;  %270 = vmatmul.bf16.gmra.mxu0 %v3214_v2  ;;  %v3282_v1 = vld [vmem:[%s4214_s0 + $0x1c8] sm:$0xff] }
  0xc2   :  { %448 = vmatmul.bf16.gmra.mxu1 %v3195_v3 }
  0xc3   :  { %666 = vmatmul.bf16.gmra.mxu2 %v3233_v7 }
  0xc4   :  { %906 = vmatmul.bf16.gmra.mxu3 %v3252_v8 }
  0xc6   :  { %v627_v11 = vpop.f32.mrf.mxu2  ;;  %v233_v14 = vpop.f32.mrf.mxu0 }
  0xc7   :  { %v867_v12 = vpop.f32.mrf.mxu3  ;;  %v676_v13 = vadd.f32 %v627_v11, %v410_v9  ;;  %v411_v15 = vpop.f32.mrf.mxu1 }
  0xc8   :  { %v412_v18 = vadd.f32 %v411_v15, %v233_v14  ;;  %v1900_v15 = vld [vmem:[%s4215_s4 + $0x30] sm:$0xff] }
  0xc9   :  { %v3774_v19 = vadd.f32 %v867_v12, %v676_v13  ;;  %1948 = vperm.xlu0 %3403, %v1900_v15   ;;  %v1906_v15 = vld [vmem:[%s4215_s4 + $0x60] sm:$0xff] }
  0xce   :  { %v629_v20 = vpop.f32.mrf.mxu2  ;;  %v236_v25 = vpop.f32.mrf.mxu0 }
  0xcf   :  { %v869_v21 = vpop.f32.mrf.mxu3  ;;  %v677_v24 = vadd.f32 %v629_v20, %v412_v18  ;;  %v414_v26 = vpop.f32.mrf.mxu1 }
  0xd0   :  { %v415_v30 = vadd.f32 %v414_v26, %v236_v25 }
  0xd1   :  { %v3791_v31 = vadd.f32 %v869_v21, %v677_v24  ;;  %1096 = vmatmul.bf16.vlgmr.msrb.gmra.mxu0 %v3261_v22  ;;  %v3264_v21 = vld [vmem:[%s4214_s0 + $0x178] sm:$0xff]  ;;  %v3283_v22 = vld [vmem:[%s4214_s0 + $0x1d0] sm:$0xff] }
  0xd2   :  { %1336 = vmatmul.bf16.vlgmr.msrb.gmra.mxu1 %v3280_v23  ;;  %v3302_v23 = vld [vmem:[%s4214_s0 + $0x228] sm:$0xff] }
  0xd3   :  { %1576 = vmatmul.bf16.vlgmr.msrb.gmra.mxu2 %v3299_v27  ;;  %v3321_v27 = vld [vmem:[%s4214_s0 + $0x280] sm:$0xff] }
  0xd4   :  { %1816 = vmatmul.bf16.vlgmr.msrb.gmra.mxu3 %v3318_v28  ;;  %v1898_v28 = vld [vmem:[%s4215_s4 + $0x20] sm:$0xff] }
  0xd5   :  { %1938 = vperm.xlu2 %3405, %v1898_v28   ;;  %v1907_v28 = vld [vmem:[%s4215_s4 + $0x68] sm:$0xff] }
  0xd6   :  { %v632_v32 = vpop.f32.mrf.mxu2  ;;  %v238_v35 = vpop.f32.mrf.mxu0 }
  0xd7   :  { %v872_v33 = vpop.f32.mrf.mxu3  ;;  %v678_v34 = vadd.f32 %v632_v32, %v415_v30  ;;  %v416_v36 = vpop.f32.mrf.mxu1 }
  0xd8   :  { %v417_v38 = vadd.f32 %v416_v36, %v238_v35 }
  0xd9   :  { %v3796_v39 = vadd.f32 %v872_v33, %v678_v34 }
  0xde   :  { %v634_v40 = vpop.f32.mrf.mxu2  ;;  %v241_v46 = vpop.f32.mrf.mxu0 }
  0xdf   :  { %v874_v41 = vpop.f32.mrf.mxu3  ;;  %v679_v44 = vadd.f32 %v634_v40, %v417_v38  ;;  %v419_v47 = vpop.f32.mrf.mxu1  ;;  %v1899_v38 = vld [vmem:[%s4215_s4 + $0x28] sm:$0xff] }
  0xe0   :  { %v420_v51 = vadd.f32 %v419_v47, %v241_v46  ;;  %1943 = vperm.xlu2 %3405, %v1899_v38   ;;  %v3284_v46 = vld [vmem:[%s4214_s0 + $0x1d8] sm:$0xff]  ;;  %v3305_v38 = vld [vmem:[%s4214_s0 + $0x240] sm:$0xff] }
  0xe1   :  { %v3813_v52 = vadd.f32 %v874_v41, %v679_v44  ;;  %1101 = vmatmul.bf16.gmra.mxu0 %v3262_v42  ;;  %v3265_v44 = vld [vmem:[%s4214_s0 + $0x180] sm:$0xff] }
  0xe2   :  { %1341 = vmatmul.bf16.gmra.mxu1 %v3281_v43 }
  0xe3   :  { %1581 = vmatmul.bf16.gmra.mxu2 %v3300_v48 }
  0xe4   :  { %1821 = vmatmul.bf16.gmra.mxu3 %v3319_v49 }
  0xe6   :  { %v637_v53 = vpop.f32.mrf.mxu2  ;;  %v243_v57 = vpop.f32.mrf.mxu0 }
  0xe7   :  { %v877_v54 = vpop.f32.mrf.mxu3  ;;  %v680_v55 = vadd.f32 %v637_v53, %v420_v51  ;;  %v421_v58 = vpop.f32.mrf.mxu1  ;;  %v3322_v51 = vld [vmem:[%s4214_s0 + $0x288] sm:$0xff] }
  0xe8   :  { %v422_v59 = vadd.f32 %v421_v58, %v243_v57  ;;  %v1903_v53 = vld [vmem:[%s4215_s4 + $0x48] sm:$0xff] }
  0xe9   :  { %v3815_v60 = vadd.f32 %v877_v54, %v680_v55  ;;  %1963 = vperm.xlu0 %3403, %v1903_v53   ;;  %v1905_v53 = vld [vmem:[%s4215_s4 + $0x58] sm:$0xff] }
  0xee   :  { %v639_v61 = vpop.f32.mrf.mxu2  ;;  %v246_v3 = vpop.f32.mrf.mxu0 }
  0xef   :  { %v879_v62 = vpop.f32.mrf.mxu3  ;;  %v681_v2 = vadd.f32 %v639_v61, %v422_v59  ;;  %v424_v4 = vpop.f32.mrf.mxu1 }
  0xf0   :  { %v425_v7 = vadd.f32 %v424_v4, %v246_v3 }
  0xf1   :  { %v3829_v8 = vadd.f32 %v879_v62, %v681_v2  ;;  %1106 = vmatmul.bf16.gmra.mxu0 %v3263_v0  ;;  %v1904_v0 = vld [vmem:[%s4215_s4 + $0x50] sm:$0xff]  ;;  %1978 = vperm.xlu0 %3403, %v1906_v15  }
  0xf2   :  { %1346 = vmatmul.bf16.gmra.mxu1 %v3282_v1  ;;  %1968 = vperm.xlu1 %3404, %v1904_v0   ;;  %v3268_v0 = vld [vmem:[%s4214_s0 + $0x198] sm:$0xff] }
  0xf3   :  { %1586 = vmatmul.bf16.gmra.mxu2 %v3301_v5  ;;  %v3266_v5 = vld [vmem:[%s4214_s0 + $0x188] sm:$0xff] }
  0xf4   :  { %1826 = vmatmul.bf16.gmra.mxu3 %v3320_v6  ;;  %v3285_v6 = vld [vmem:[%s4214_s0 + $0x1e0] sm:$0xff] }
  0xf6   :  { %v642_v9 = vpop.f32.mrf.mxu2  ;;  %v248_v13 = vpop.f32.mrf.mxu0 }
  0xf7   :  { %v882_v11 = vpop.f32.mrf.mxu3  ;;  %v682_v12 = vadd.f32 %v642_v9, %v425_v7  ;;  %v426_v14 = vpop.f32.mrf.mxu1  ;;  %v3304_v7 = vld [vmem:[%s4214_s0 + $0x238] sm:$0xff] }
  0xf8   :  { %v427_v16 = vadd.f32 %v426_v14, %v248_v13  ;;  %v3323_v13 = vld [vmem:[%s4214_s0 + $0x290] sm:$0xff]  ;;  %v1902_v14 = vld [vmem:[%s4215_s4 + $0x40] sm:$0xff] }
  0xf9   :  { %v3834_v17 = vadd.f32 %v882_v11, %v682_v12  ;;  %1958 = vperm.xlu2 %3405, %v1902_v14  }
  0xfa   :  { %1983 = vperm.xlu1 %3404, %v1907_v28   ;;  %v3288_v28 = vld [vmem:[%s4214_s0 + $0x1f8] sm:$0xff] }
  0xfe   :  { %v644_v18 = vpop.f32.mrf.mxu2  ;;  %v251_v25 = vpop.f32.mrf.mxu0 }
  0xff   :  { %v884_v20 = vpop.f32.mrf.mxu3  ;;  %v683_v24 = vadd.f32 %v644_v18, %v427_v16  ;;  %v429_v26 = vpop.f32.mrf.mxu1 }
 0x100   :  { %v430_v30 = vadd.f32 %v429_v26, %v251_v25  ;;  %v1909_v25 = vld [vmem:[%s4215_s4 + $0x78] sm:$0xff] }
 0x101   :  { %v3854_v32 = vadd.f32 %v884_v20, %v683_v24  ;;  %1111 = vmatmul.bf16.gmra.mxu0 %v3264_v21  ;;  %1993 = vperm.xlu0 %3403, %v1909_v25  }
 0x102   :  { %1351 = vmatmul.bf16.gmra.mxu1 %v3283_v22  ;;  %1973 = vperm.xlu2 %3405, %v1905_v53  }
 0x103   :  { %1591 = vmatmul.bf16.gmra.mxu2 %v3302_v23 }
 0x104   :  { %1831 = vmatmul.bf16.gmra.mxu3 %v3321_v27 }
 0x106   :  { %v647_v33 = vpop.f32.mrf.mxu2  ;;  %v253_v36 = vpop.f32.mrf.mxu0 }
 0x107   :  { %v887_v34 = vpop.f32.mrf.mxu3  ;;  %v684_v35 = vadd.f32 %v647_v33, %v430_v30  ;;  %v431_v37 = vpop.f32.mrf.mxu1  ;;  %v3267_v33 = vld [vmem:[%s4214_s0 + $0x190] sm:$0xff] }
 0x108   :  { %v432_v40 = vadd.f32 %v431_v37, %v253_v36 }
 0x109   :  { %v3859_v41 = vadd.f32 %v887_v34, %v684_v35  ;;  %v3286_v34 = vld [vmem:[%s4214_s0 + $0x1e8] sm:$0xff] }
 0x10e   :  { %v649_v42 = vpop.f32.mrf.mxu2  ;;  %v256_v48 = vpop.f32.mrf.mxu0 }
 0x10f   :  { %v889_v43 = vpop.f32.mrf.mxu3  ;;  %v685_v47 = vadd.f32 %v649_v42, %v432_v40  ;;  %v434_v49 = vpop.f32.mrf.mxu1  ;;  %v3324_v40 = vld [vmem:[%s4214_s0 + $0x298] sm:$0xff]  ;;  %v1912_v42 = vld [vmem:[%s4215_s4 + $0x90] sm:$0xff] }
 0x110   :  { %v435_v54 = vadd.f32 %v434_v49, %v256_v48  ;;  %2008 = vperm.xlu0 %3403, %v1912_v42  }
 0x111   :  { %v3876_v55 = vadd.f32 %v889_v43, %v685_v47  ;;  %1116 = vmatmul.bf16.gmra.mxu0 %v3265_v44 }
 0x112   :  { %1356 = vmatmul.bf16.gmra.mxu1 %v3284_v46  ;;  %v1910_v46 = vld [vmem:[%s4215_s4 + $0x80] sm:$0xff] }
 0x113   :  { %1596 = vmatmul.bf16.gmra.mxu2 %v3303_v50  ;;  %1998 = vperm.xlu1 %3404, %v1910_v46  }
 0x114   :  { %1836 = vmatmul.bf16.gmra.mxu3 %v3322_v51 }
 0x116   :  { %v652_v57 = vpop.f32.mrf.mxu2  ;;  %v258_v61 = vpop.f32.mrf.mxu0 }
 0x117   :  { %v892_v58 = vpop.f32.mrf.mxu3  ;;  %v686_v59 = vadd.f32 %v652_v57, %v435_v54  ;;  %v436_v62 = vpop.f32.mrf.mxu1  ;;  %v1915_v54 = vld [vmem:[%s4215_s4 + $0xa8] sm:$0xff] }
 0x118   :  { %v437_v1 = vadd.f32 %v436_v62, %v258_v61  ;;  %2023 = vperm.xlu0 %3403, %v1915_v54   ;;  %v3270_v54 = vld [vmem:[%s4214_s0 + $0x1a8] sm:$0xff] }
 0x119   :  { %v3881_v2 = vadd.f32 %v892_v58, %v686_v59  ;;  %v1913_v59 = vld [vmem:[%s4215_s4 + $0x98] sm:$0xff] }
 0x11b   :  { %2013 = vperm.xlu1 %3404, %v1913_v59  }
 0x11e   :  { %v654_v3 = vpop.f32.mrf.mxu2  ;;  %v261_v11 = vpop.f32.mrf.mxu0 }
 0x11f   :  { %v894_v4 = vpop.f32.mrf.mxu3  ;;  %v687_v9 = vadd.f32 %v654_v3, %v437_v1  ;;  %v439_v12 = vpop.f32.mrf.mxu1  ;;  %v3287_v1 = vld [vmem:[%s4214_s0 + $0x1f0] sm:$0xff] }
 0x120   :  { %v440_v16 = vadd.f32 %v439_v12, %v261_v11  ;;  %v1908_v12 = vld [vmem:[%s4215_s4 + $0x70] sm:$0xff] }
 0x121   :  { %v3901_v18 = vadd.f32 %v894_v4, %v687_v9  ;;  %1121 = vmatmul.bf16.gmra.mxu0 %v3266_v5  ;;  %1988 = vperm.xlu2 %3405, %v1908_v12  }
 0x122   :  { %1361 = vmatmul.bf16.gmra.mxu1 %v3285_v6  ;;  %v3306_v6 = vld [vmem:[%s4214_s0 + $0x248] sm:$0xff] }
 0x123   :  { %1601 = vmatmul.bf16.gmra.mxu2 %v3304_v7  ;;  %v3325_v7 = vld [vmem:[%s4214_s0 + $0x2a0] sm:$0xff] }
 0x124   :  { %1841 = vmatmul.bf16.gmra.mxu3 %v3323_v13 }
 0x126   :  { %v657_v20 = vpop.f32.mrf.mxu2  ;;  %v263_v23 = vpop.f32.mrf.mxu0 }
 0x127   :  { %v897_v21 = vpop.f32.mrf.mxu3  ;;  %v688_v22 = vadd.f32 %v657_v20, %v440_v16  ;;  %v441_v24 = vpop.f32.mrf.mxu1 }
 0x128   :  { %v442_v26 = vadd.f32 %v441_v24, %v263_v23  ;;  %v1911_v23 = vld [vmem:[%s4215_s4 + $0x88] sm:$0xff] }
 0x129   :  { %v3906_v27 = vadd.f32 %v897_v21, %v688_v22  ;;  %2003 = vperm.xlu2 %3405, %v1911_v23  }
 0x12e   :  { %v659_v29 = vpop.f32.mrf.mxu2  ;;  %v266_v36 = vpop.f32.mrf.mxu0 }
 0x12f   :  { %v899_v30 = vpop.f32.mrf.mxu3  ;;  %v689_v35 = vadd.f32 %v659_v29, %v442_v26  ;;  %v444_v37 = vpop.f32.mrf.mxu1  ;;  %v3269_v26 = vld [vmem:[%s4214_s0 + $0x1a0] sm:$0xff] }
 0x130   :  { %v445_v43 = vadd.f32 %v444_v37, %v266_v36 }
 0x131   :  { %v3926_v44 = vadd.f32 %v899_v30, %v689_v35  ;;  %1126 = vmatmul.bf16.gmra.mxu0 %v3267_v33  ;;  %v3326_v35 = vld [vmem:[%s4214_s0 + $0x2a8] sm:$0xff] }
 0x132   :  { %1366 = vmatmul.bf16.gmra.mxu1 %v3286_v34  ;;  %v3307_v34 = vld [vmem:[%s4214_s0 + $0x250] sm:$0xff] }
 0x133   :  { %1606 = vmatmul.bf16.gmra.mxu2 %v3305_v38 }
 0x134   :  { %1846 = vmatmul.bf16.gmra.mxu3 %v3324_v40  ;;  %v1914_v40 = vld [vmem:[%s4215_s4 + $0xa0] sm:$0xff] }
 0x135   :  { %2018 = vperm.xlu2 %3405, %v1914_v40  }
 0x136   :  { %v662_v47 = vpop.f32.mrf.mxu2  ;;  %v268_v50 = vpop.f32.mrf.mxu0 }
 0x137   :  { %v902_v48 = vpop.f32.mrf.mxu3  ;;  %v690_v49 = vadd.f32 %v662_v47, %v445_v43  ;;  %v446_v51 = vpop.f32.mrf.mxu1 }
 0x138   :  { %v447_v57 = vadd.f32 %v446_v51, %v268_v50 }
 0x139   :  { %v3937_v58 = vadd.f32 %v902_v48, %v690_v49 }
 0x13e   :  { %v664_v61 = vpop.f32.mrf.mxu2  ;;  %v271_v4 = vpop.f32.mrf.mxu0 }
 0x13f   :  { %v904_v62 = vpop.f32.mrf.mxu3  ;;  %v691_v3 = vadd.f32 %v664_v61, %v447_v57  ;;  %v449_v5 = vpop.f32.mrf.mxu1  ;;  %v3289_v57 = vld [vmem:[%s4214_s0 + $0x200] sm:$0xff] }
 0x140   :  { %v450_v9 = vadd.f32 %v449_v5, %v271_v4 }
 0x141   :  { %v3954_v11 = vadd.f32 %v904_v62, %v691_v3  ;;  %1131 = vmatmul.bf16.gmra.mxu0 %v3268_v0  ;;  %v3327_v0 = vld [vmem:[%s4214_s0 + $0x2b0] sm:$0xff] }
 0x142   :  { %1371 = vmatmul.bf16.gmra.mxu1 %v3287_v1 }
 0x143   :  { %4223 = vst [vmem:[#allocation3_spill] sm:$0xff] %v3954_v11  ;;  %1611 = vmatmul.bf16.gmra.mxu2 %v3306_v6 }
 0x144   :  { %1851 = vmatmul.bf16.gmra.mxu3 %v3325_v7 }
 0x146   :  { %v667_v13 = vpop.f32.mrf.mxu2  ;;  %v273_v16 = vpop.f32.mrf.mxu0 }
 0x147   :  { %v907_v14 = vpop.f32.mrf.mxu3  ;;  %v692_v15 = vadd.f32 %v667_v13, %v450_v9  ;;  %v451_v20 = vpop.f32.mrf.mxu1 }
 0x148   :  { %v452_v21 = vadd.f32 %v451_v20, %v273_v16 }
 0x149   :  { %v3959_v22 = vadd.f32 %v907_v14, %v692_v15 }
 0x14b   :  { %4224 = vst [vmem:[#allocation4_spill] sm:$0xff] %v3959_v22 }
 0x14e   :  { %v669_v24 = vpop.f32.mrf.mxu2  ;;  %v1097_v30 = vpop.f32.mrf.mxu0 }
 0x14f   :  { %v909_v25 = vpop.f32.mrf.mxu3  ;;  %v693_v29 = vadd.f32 %v669_v24, %v452_v21  ;;  %v1337_v33 = vpop.f32.mrf.mxu1  ;;  %v1152_v36 = vadd.f32 %v1097_v30, %v3739_v45  ;;  %v3290_v21 = vld [vmem:[%s4214_s0 + $0x208] sm:$0xff] }
 0x151   :  { %v3977_v37 = vadd.f32 %v909_v25, %v693_v29  ;;  %v1392_v38 = vadd.f32 %v1337_v33, %v1152_v36  ;;  %1136 = vmatmul.bf16.gmra.mxu0 %v3269_v26  ;;  %v3328_v26 = vld [vmem:[%s4214_s0 + $0x2b8] sm:$0xff] }
 0x152   :  { %1376 = vmatmul.bf16.gmra.mxu1 %v3288_v28 }
 0x153   :  { %4225 = vst [vmem:[#allocation5_spill] sm:$0xff] %v3977_v37  ;;  %1616 = vmatmul.bf16.gmra.mxu2 %v3307_v34 }
 0x154   :  { %1856 = vmatmul.bf16.gmra.mxu3 %v3326_v35 }
 0x156   :  { %v1577_v42 = vpop.f32.mrf.mxu2  ;;  %v1099_v47 = vpop.f32.mrf.mxu0 }
 0x157   :  { %v1817_v43 = vpop.f32.mrf.mxu3  ;;  %v1632_v46 = vadd.f32 %v1577_v42, %v1392_v38  ;;  %v1339_v48 = vpop.f32.mrf.mxu1  ;;  %v1153_v49 = vadd.f32 %v1099_v47, %v3753_v56  ;;  %v3308_v56 = vld [vmem:[%s4214_s0 + $0x258] sm:$0xff] }
 0x159   :  { %v3983_v45 = vadd.f32 %v1817_v43, %v1632_v46  ;;  %v1393_v50 = vadd.f32 %v1339_v48, %v1153_v49 }
 0x15b   :  { %4226 = vst [vmem:[#allocation6_spill] sm:$0xff] %v3983_v45 }
 0x15e   :  { %v1579_v51 = vpop.f32.mrf.mxu2  ;;  %v1102_v61 = vpop.f32.mrf.mxu0 }
 0x15f   :  { %v1819_v53 = vpop.f32.mrf.mxu3  ;;  %v1633_v59 = vadd.f32 %v1579_v51, %v1393_v50  ;;  %v1342_v62 = vpop.f32.mrf.mxu1  ;;  %v1154_v1 = vadd.f32 %v1102_v61, %v3755_v63  ;;  %v3271_v63 = vld [vmem:[%s4214_s0 + $0x1b0] sm:$0xff] }
 0x161   :  { %v3998_v3 = vadd.f32 %v1819_v53, %v1633_v59  ;;  %v1394_v4 = vadd.f32 %v1342_v62, %v1154_v1  ;;  %1141 = vmatmul.bf16.gmra.mxu0 %v3270_v54 }
 0x162   :  { %1381 = vmatmul.bf16.gmra.mxu1 %v3289_v57 }
 0x163   :  { %4227 = vst [vmem:[#allocation7_spill] sm:$0xff] %v3998_v3  ;;  %1621 = vmatmul.bf16.gmra.mxu2 %v3308_v56 }
 0x164   :  { %1861 = vmatmul.bf16.gmra.mxu3 %v3327_v0 }
 0x166   :  { %v1582_v5 = vpop.f32.mrf.mxu2  ;;  %v1104_v9 = vpop.f32.mrf.mxu0 }
 0x167   :  { %v1822_v6 = vpop.f32.mrf.mxu3  ;;  %v1634_v7 = vadd.f32 %v1582_v5, %v1394_v4  ;;  %v1344_v12 = vpop.f32.mrf.mxu1  ;;  %v1155_v13 = vadd.f32 %v1104_v9, %v3769_v10  ;;  %v3309_v10 = vld [vmem:[%s4214_s0 + $0x260] sm:$0xff] }
 0x169   :  { %v4001_v14 = vadd.f32 %v1822_v6, %v1634_v7  ;;  %v1395_v15 = vadd.f32 %v1344_v12, %v1155_v13 }
 0x16b   :  { %4228 = vst [vmem:[#allocation8_spill] sm:$0xff] %v4001_v14 }
 0x16e   :  { %v1584_v16 = vpop.f32.mrf.mxu2  ;;  %v1107_v24 = vpop.f32.mrf.mxu0 }
 0x16f   :  { %v1824_v20 = vpop.f32.mrf.mxu3  ;;  %v1635_v23 = vadd.f32 %v1584_v16, %v1395_v15  ;;  %v1347_v25 = vpop.f32.mrf.mxu1  ;;  %v1156_v28 = vadd.f32 %v1107_v24, %v3774_v19 }
 0x171   :  { %v4016_v29 = vadd.f32 %v1824_v20, %v1635_v23  ;;  %v1396_v30 = vadd.f32 %v1347_v25, %v1156_v28  ;;  %1146 = vmatmul.bf16.gmra.mxu0 %v3271_v63 }
 0x172   :  { %1386 = vmatmul.bf16.gmra.mxu1 %v3290_v21 }
 0x173   :  { %4229 = vst [vmem:[#allocation9_spill] sm:$0xff] %v4016_v29  ;;  %1626 = vmatmul.bf16.gmra.mxu2 %v3309_v10 }
 0x174   :  { %1866 = vmatmul.bf16.gmra.mxu3 %v3328_v26 }
 0x176   :  { %v1587_v33 = vpop.f32.mrf.mxu2  ;;  %v1109_v36 = vpop.f32.mrf.mxu0 }
 0x177   :  { %v1827_v34 = vpop.f32.mrf.mxu3  ;;  %v1636_v35 = vadd.f32 %v1587_v33, %v1396_v30  ;;  %v1349_v38 = vpop.f32.mrf.mxu1  ;;  %v1157_v40 = vadd.f32 %v1109_v36, %v3791_v31 }
 0x179   :  { %v4019_v42 = vadd.f32 %v1827_v34, %v1636_v35  ;;  %v1397_v43 = vadd.f32 %v1349_v38, %v1157_v40 }
 0x17e   :  { %v1589_v46 = vpop.f32.mrf.mxu2  ;;  %v1112_v48 = vpop.f32.mrf.mxu0 }
 0x17f   :  { %v1829_v47 = vpop.f32.mrf.mxu3  ;;  %v1637_v19 = vadd.f32 %v1589_v46, %v1397_v43  ;;  %v1352_v49 = vpop.f32.mrf.mxu1  ;;  %v1158_v50 = vadd.f32 %v1112_v48, %v3796_v39 }
 0x181   :  { %v4022_v51 = vadd.f32 %v1829_v47, %v1637_v19  ;;  %v1398_v53 = vadd.f32 %v1352_v49, %v1158_v50 }
 0x186   :  { %v1592_v54 = vpop.f32.mrf.mxu2  ;;  %v1114_v61 = vpop.f32.mrf.mxu0 }
 0x187   :  { %v1832_v57 = vpop.f32.mrf.mxu3  ;;  %v1638_v59 = vadd.f32 %v1592_v54, %v1398_v53  ;;  %v1354_v62 = vpop.f32.mrf.mxu1  ;;  %v1159_v31 = vadd.f32 %v1114_v61, %v3813_v52 }
 0x188   :  { %v1919_v53 = vpop.permute.xlu0 %1918  ;;  %v1929_v54 = vpop.permute.xlu1 %1928 }
 0x189   :  { %v4025_v56 = vadd.f32 %v1832_v57, %v1638_v59  ;;  %v1399_v0 = vadd.f32 %v1354_v62, %v1159_v31  ;;  %v1939_v31 = vpop.permute.xlu2 %1938 }
 0x18e   :  { %v1594_v1 = vpop.f32.mrf.mxu2  ;;  %v1117_v6 = vpop.f32.mrf.mxu0 }
 0x18f   :  { %v1834_v4 = vpop.f32.mrf.mxu3  ;;  %v1639_v5 = vadd.f32 %v1594_v1, %v1399_v0  ;;  %v1357_v7 = vpop.f32.mrf.mxu1  ;;  %v1160_v39 = vadd.f32 %v1117_v6, %v3815_v60 }
 0x190   :  { %v1924_v0 = vpop.permute.xlu0 %1923 }
 0x191   :  { %v4028_v9 = vadd.f32 %v1834_v4, %v1639_v5  ;;  %v1400_v12 = vadd.f32 %v1357_v7, %v1160_v39  ;;  %v1934_v7 = vpop.permute.xlu1 %1933  ;;  %v1944_v39 = vpop.permute.xlu2 %1943 }
 0x196   :  { %v1597_v13 = vpop.f32.mrf.mxu2  ;;  %v1119_v20 = vpop.f32.mrf.mxu0 }
 0x197   :  { %v1837_v15 = vpop.f32.mrf.mxu3  ;;  %v1640_v16 = vadd.f32 %v1597_v13, %v1400_v12  ;;  %v1359_v63 = vpop.f32.mrf.mxu1  ;;  %v1161_v52 = vadd.f32 %v1119_v20, %v3829_v8 }
 0x198   :  { %v1949_v12 = vpop.permute.xlu0 %1948 }
 0x199   :  { %v4031_v21 = vadd.f32 %v1837_v15, %v1640_v16  ;;  %v1401_v23 = vadd.f32 %v1359_v63, %v1161_v52  ;;  %v2027_v16 = vmul.f32 %v1924_v0, %v3998_v3  ;;  %v1954_v52 = vpop.permute.xlu1 %1953 }
 0x19e   :  { %v1599_v24 = vpop.f32.mrf.mxu2  ;;  %v1122_v26 = vpop.f32.mrf.mxu0 }
 0x19f   :  { %v1839_v25 = vpop.f32.mrf.mxu3  ;;  %v1641_v10 = vadd.f32 %v1599_v24, %v1401_v23  ;;  %v1362_v28 = vpop.f32.mrf.mxu1  ;;  %v1162_v60 = vadd.f32 %v1122_v26, %v3834_v17  ;;  %v2026_v23 = vmul.f32 %v1919_v53, %v3983_v45  ;;  %v2028_v24 = vmul.f32 %v1929_v54, %v4001_v14 }
 0x1a1   :  { %v4034_v30 = vadd.f32 %v1839_v25, %v1641_v10  ;;  %v1402_v33 = vadd.f32 %v1362_v28, %v1162_v60  ;;  %v2077_v25 = vmul.f32 %v2027_v16, %v3998_v3  ;;  %v2029_v10 = vmul.f32 %v1934_v7, %v4016_v29  ;;  %v1969_v22 = vpop.permute.xlu1 %1968 }
 0x1a2   :  { %v2076_v26 = vmul.f32 %v2026_v23, %v3983_v45  ;;  %v2078_v28 = vmul.f32 %v2028_v24, %v4001_v14  ;;  %v2030_v60 = vmul.f32 %v1939_v31, %v4019_v42  ;;  %v2048_v53 = vadd.f32 %v2027_v16, %v2026_v23 }
 0x1a3   :  { %v2079_v3 = vmul.f32 %v2029_v10, %v4016_v29  ;;  %v2031_v7 = vmul.f32 %v1944_v39, %v4022_v51  ;;  %v2033_v39 = vmul.f32 %v1954_v52, %v4028_v9 }
 0x1a4   :  { %v2098_v54 = vadd.f32 %v2077_v25, %v2076_v26  ;;  %v2049_v31 = vadd.f32 %v2048_v53, %v2028_v24 }
 0x1a5   :  { %v2081_v25 = vmul.f32 %v2031_v7, %v4022_v51 }
 0x1a6   :  { %v1602_v34 = vpop.f32.mrf.mxu2  ;;  %v1124_v38 = vpop.f32.mrf.mxu0  ;;  %v2099_v11 = vadd.f32 %v2098_v54, %v2078_v28  ;;  %v2050_v16 = vadd.f32 %v2049_v31, %v2029_v10 }
 0x1a7   :  { %v1842_v35 = vpop.f32.mrf.mxu3  ;;  %v1642_v36 = vadd.f32 %v1602_v34, %v1402_v33  ;;  %v1364_v40 = vpop.f32.mrf.mxu1 }
 0x1a8   :  { %v1959_v33 = vpop.permute.xlu2 %1958  ;;  %v1964_v34 = vpop.permute.xlu0 %1963  ;;  %v2100_v23 = vadd.f32 %v2099_v11, %v2079_v3 }
 0x1a9   :  { %v4036_v43 = vadd.f32 %v1842_v35, %v1642_v36  ;;  %v1163_v35 = vadd.f32 %v1124_v38, %v3854_v32  ;;  %v2032_v32 = vmul.f32 %v1949_v12, %v4025_v56  ;;  %v2034_v28 = vmul.f32 %v1959_v33, %v4031_v21 }
 0x1ab   :  { %v1403_v38 = vadd.f32 %v1364_v40, %v1163_v35  ;;  %v2082_v24 = vmul.f32 %v2032_v32, %v4025_v56  ;;  %v2036_v35 = vmul.f32 %v1969_v22, %v4036_v43 }
 0x1ae   :  { %v1604_v8 = vpop.f32.mrf.mxu2  ;;  %v1127_v47 = vpop.f32.mrf.mxu0 }
 0x1af   :  { %v4038_v46 = vpop.f32.mrf.mxu3  ;;  %v1367_v19 = vpop.f32.mrf.mxu1  ;;  %v1164_v14 = vadd.f32 %v1127_v47, %v3859_v41  ;;  %v1643_v26 = vadd.f32 %v1604_v8, %v1403_v38  ;;  %v2051_v41 = vadd.f32 %v2050_v16, %v2030_v60 }
 0x1b0   :  { %v1974_v12 = vpop.permute.xlu2 %1973  ;;  %v1979_v40 = vpop.permute.xlu0 %1978 }
 0x1b1   :  { %v1404_v29 = vadd.f32 %v1367_v19, %v1164_v14  ;;  %v2052_v52 = vadd.f32 %v2051_v41, %v2031_v7  ;;  %v2083_v14 = vmul.f32 %v2033_v39, %v4028_v9 }
 0x1b6   :  { %v4040_v48 = vpop.f32.mrf.mxu2  ;;  %v1129_v17 = vpop.f32.mrf.mxu0 }
 0x1b7   :  { %v4042_v49 = vpop.f32.mrf.mxu3  ;;  %v1369_v50 = vpop.f32.mrf.mxu1 }
 0x1be   :  { %v4044_v57 = vpop.f32.mrf.mxu2  ;;  %v1132_v61 = vpop.f32.mrf.mxu0 }
 0x1bf   :  { %v4046_v59 = vpop.f32.mrf.mxu3  ;;  %v4048_v62 = vpop.f32.mrf.mxu1 }
 0x1c6   :  { %v4050_v1 = vpop.f32.mrf.mxu2  ;;  %v1134_v5 = vpop.f32.mrf.mxu0 }
 0x1c7   :  { %v4052_v4 = vpop.f32.mrf.mxu3  ;;  %v4054_v6 = vpop.f32.mrf.mxu1  ;;  %v1167_v11 = vadd.f32 %v1134_v5, %v3901_v18  ;;  %v2084_v5 = vmul.f32 %v2034_v28, %v4031_v21 }
 0x1ce   :  { %v4056_v13 = vpop.f32.mrf.mxu2  ;;  %v1137_v20 = vpop.f32.mrf.mxu0 }
 0x1cf   :  { %v4058_v15 = vpop.f32.mrf.mxu3  ;;  %v4061_v63 = vpop.f32.mrf.mxu1  ;;  %v1168_v18 = vadd.f32 %v1137_v20, %v3906_v27 }
 0x1d0   :  { %4230 = vst [vmem:[#allocation10_spill] sm:$0xff] %v4058_v15  ;;  %v2080_v15 = vmul.f32 %v2030_v60, %v4019_v42  ;;  %v1984_v60 = vpop.permute.xlu1 %1983 }
 0x1d2   :  { %v2101_v47 = vadd.f32 %v2100_v23, %v2080_v15  ;;  %v4091_v15 = vadd.f32 %v4038_v46, %v1643_v26  ;;  %v1407_v46 = vadd.f32 %v4054_v6, %v1167_v11  ;;  %v1989_v6 = vpop.permute.xlu2 %1988  ;;  %v1994_v26 = vpop.permute.xlu0 %1993 }
 0x1d4   :  { %v2102_v8 = vadd.f32 %v2101_v47, %v2081_v25  ;;  %v2037_v27 = vmul.f32 %v1974_v12, %v4091_v15  ;;  %v1647_v22 = vadd.f32 %v4056_v13, %v1407_v46 }
 0x1d6   :  { %v4071_v36 = vpop.f32.mrf.mxu2  ;;  %v1139_v37 = vpop.f32.mrf.mxu0 }
 0x1d7   :  { %4231 = vst [vmem:[#allocation11_spill] sm:$0xff] %v4071_v36  ;;  %v4073_v0 = vpop.f32.mrf.mxu3  ;;  %v1379_v45 = vpop.f32.mrf.mxu1  ;;  %v1166_v36 = vadd.f32 %v1132_v61, %v3881_v2  ;;  %v2035_v2 = vmul.f32 %v1964_v34, %v4034_v30  ;;  %v1169_v53 = vadd.f32 %v1139_v37, %v3926_v44  ;;  %v4234_v47 = vld [vmem:[#allocation10_spill] sm:$0xff] }
 0x1d8   :  { %4232 = vst [vmem:[#allocation12_spill] sm:$0xff] %v4073_v0  ;;  %v1165_v0 = vadd.f32 %v1129_v17, %v3876_v55  ;;  %v1644_v55 = vadd.f32 %v4040_v48, %v1404_v29  ;;  %v2053_v48 = vadd.f32 %v2052_v52, %v2032_v32  ;;  %v1999_v11 = vpop.permute.xlu1 %1998 }
 0x1d9   :  { %v1406_v29 = vadd.f32 %v4048_v62, %v1166_v36  ;;  %v2085_v62 = vmul.f32 %v2035_v2, %v4034_v30 }
 0x1da   :  { %v1405_v17 = vadd.f32 %v1369_v50, %v1165_v0  ;;  %v2103_v50 = vadd.f32 %v2102_v8, %v2082_v24  ;;  %v4099_v34 = vadd.f32 %v4042_v49, %v1644_v55  ;;  %v1408_v49 = vadd.f32 %v4061_v63, %v1168_v18 }
 0x1db   :  { %v1646_v0 = vadd.f32 %v4050_v1, %v1406_v29  ;;  %v2086_v1 = vmul.f32 %v2036_v35, %v4036_v43 }
 0x1dc   :  { %v1645_v33 = vadd.f32 %v4044_v57, %v1405_v17  ;;  %v2054_v57 = vadd.f32 %v2053_v48, %v2033_v39  ;;  %v2104_v54 = vadd.f32 %v2103_v50, %v2083_v14  ;;  %v2038_v37 = vmul.f32 %v1979_v40, %v4099_v34  ;;  %v4235_v40 = vld [vmem:[#allocation3_spill] sm:$0xff] }
 0x1dd   :  { %v4115_v31 = vadd.f32 %v4052_v4, %v1646_v0  ;;  %v2087_v39 = vmul.f32 %v2037_v27, %v4091_v15 }
 0x1de   :  { %v1619_v3 = vpop.f32.mrf.mxu2  ;;  %v1142_v19 = vpop.f32.mrf.mxu0  ;;  %v4107_v20 = vadd.f32 %v4046_v59, %v1645_v33  ;;  %v2055_v36 = vadd.f32 %v2054_v57, %v2034_v28  ;;  %v2105_v7 = vadd.f32 %v2104_v54, %v2084_v5  ;;  %v4233_v32 = vld [vmem:[#allocation11_spill] sm:$0xff]  ;;  %v1409_v59 = vadd.f32 %v1379_v45, %v1169_v53 }
 0x1df   :  { %v1859_v10 = vpop.f32.mrf.mxu3  ;;  %v1382_v61 = vpop.f32.mrf.mxu1  ;;  %v1170_v44 = vadd.f32 %v1142_v19, %v3937_v58  ;;  %v1648_v38 = vadd.f32 %v4233_v32, %v1408_v49  ;;  %v4121_v58 = vadd.f32 %v4234_v47, %v1647_v22  ;;  %v2088_v17 = vmul.f32 %v2038_v37, %v4099_v34  ;;  %v4236_v8 = vld [vmem:[#allocation12_spill] sm:$0xff] }
 0x1e0   :  { %v2056_v13 = vadd.f32 %v2055_v36, %v2035_v2  ;;  %v2106_v25 = vadd.f32 %v2105_v7, %v2085_v62  ;;  %v2039_v41 = vmul.f32 %v1984_v60, %v4107_v20  ;;  %v1649_v24 = vadd.f32 %v1619_v3, %v1409_v59  ;;  %v2004_v53 = vpop.permute.xlu2 %2003  ;;  %v4237_v7 = vld [vmem:[#allocation4_spill] sm:$0xff] }
 0x1e1   :  { %v1410_v12 = vadd.f32 %v1382_v61, %v1170_v44  ;;  %v2040_v52 = vmul.f32 %v1989_v6, %v4115_v31  ;;  %v4127_v14 = vadd.f32 %v4236_v8, %v1648_v38  ;;  %v2041_v3 = vmul.f32 %v1994_v26, %v4121_v58  ;;  %v2009_v6 = vpop.permute.xlu0 %2008 }
 0x1e2   :  { %v2057_v4 = vadd.f32 %v2056_v13, %v2036_v35  ;;  %v2107_v45 = vadd.f32 %v2106_v25, %v2086_v1  ;;  %v2089_v33 = vmul.f32 %v2039_v41, %v4107_v20  ;;  %v4131_v29 = vadd.f32 %v1859_v10, %v1649_v24 }
 0x1e3   :  { %v2090_v50 = vmul.f32 %v2040_v52, %v4115_v31  ;;  %v2042_v5 = vmul.f32 %v1999_v11, %v4127_v14  ;;  %v2091_v22 = vmul.f32 %v2041_v3, %v4121_v58  ;;  %v4238_v11 = vld [vmem:[#allocation5_spill] sm:$0xff] }
 0x1e4   :  { %v2058_v2 = vadd.f32 %v2057_v4, %v2037_v27  ;;  %v2108_v60 = vadd.f32 %v2107_v45, %v2087_v39  ;;  %v2043_v10 = vmul.f32 %v2004_v53, %v4131_v29 }
 0x1e6   :  { %v1622_v16 = vpop.f32.mrf.mxu2  ;;  %v1144_v63 = vpop.f32.mrf.mxu0  ;;  %v2059_v61 = vadd.f32 %v2058_v2, %v2038_v37  ;;  %v2109_v48 = vadd.f32 %v2108_v60, %v2088_v17  ;;  %v2092_v37 = vmul.f32 %v2042_v5, %v4127_v14  ;;  %v2093_v13 = vmul.f32 %v2043_v10, %v4131_v29 }
 0x1e7   :  { %v1862_v23 = vpop.f32.mrf.mxu3  ;;  %v1384_v28 = vpop.f32.mrf.mxu1  ;;  %v1171_v55 = vadd.f32 %v1144_v63, %v4235_v40  ;;  %v1650_v19 = vadd.f32 %v1622_v16, %v1410_v12 }
 0x1e8   :  { %v2060_v46 = vadd.f32 %v2059_v61, %v2039_v41  ;;  %v2110_v27 = vadd.f32 %v2109_v48, %v2089_v33  ;;  %v2014_v16 = vpop.permute.xlu1 %2013  ;;  %v2019_v8 = vpop.permute.xlu2 %2018 }
 0x1e9   :  { %v1411_v18 = vadd.f32 %v1384_v28, %v1171_v55  ;;  %v4135_v57 = vadd.f32 %v1862_v23, %v1650_v19  ;;  %v2024_v53 = vpop.permute.xlu0 %2023 }
 0x1ea   :  { %v2061_v49 = vadd.f32 %v2060_v46, %v2040_v52  ;;  %v2111_v44 = vadd.f32 %v2110_v27, %v2090_v50 }
 0x1eb   :  { %v2044_v59 = vmul.f32 %v2009_v6, %v4135_v57 }
 0x1ec   :  { %v2062_v38 = vadd.f32 %v2061_v49, %v2041_v3  ;;  %v2112_v23 = vadd.f32 %v2111_v44, %v2091_v22 }
 0x1ed   :  { %v2094_v28 = vmul.f32 %v2044_v59, %v4135_v57 }
 0x1ee   :  { %v1624_v35 = vpop.f32.mrf.mxu2  ;;  %v1147_v62 = vpop.f32.mrf.mxu0  ;;  %v2063_v25 = vadd.f32 %v2062_v38, %v2042_v5  ;;  %v2113_v26 = vadd.f32 %v2112_v23, %v2092_v37 }
 0x1ef   :  { %v1864_v0 = vpop.f32.mrf.mxu3  ;;  %v1651_v54 = vadd.f32 %v1624_v35, %v1411_v18  ;;  %v1172_v1 = vadd.f32 %v1147_v62, %v4237_v7  ;;  %v1387_v32 = vpop.f32.mrf.mxu1 }
 0x1f0   :  { %v2064_v24 = vadd.f32 %v2063_v25, %v2043_v10  ;;  %v2114_v40 = vadd.f32 %v2113_v26, %v2093_v13 }
 0x1f1   :  { %v4139_v36 = vadd.f32 %v1864_v0, %v1651_v54  ;;  %v1412_v39 = vadd.f32 %v1387_v32, %v1172_v1 }
 0x1f2   :  { %v2065_v55 = vadd.f32 %v2064_v24, %v2044_v59  ;;  %v2115_v2 = vadd.f32 %v2114_v40, %v2094_v28  ;;  %v2153_v40 = vld [vmem:[%s4216_s2] sm:$0x1] }
 0x1f3   :  { %v2045_v63 = vmul.f32 %v2014_v16, %v4139_v36 }
 0x1f5   :  { %v2095_v45 = vmul.f32 %v2045_v63, %v4139_v36  ;;  %v2066_v19 = vadd.f32 %v2065_v55, %v2045_v63 }
 0x1f6   :  { %v1627_v41 = vpop.f32.mrf.mxu2  ;;  %v1149_v12 = vpop.f32.mrf.mxu0 }
 0x1f7   :  { %v1867_v47 = vpop.f32.mrf.mxu3  ;;  %v1652_v4 = vadd.f32 %v1627_v41, %v1412_v39  ;;  %v1173_v52 = vadd.f32 %v1149_v12, %v4238_v11  ;;  %v1389_v33 = vpop.f32.mrf.mxu1  ;;  %v2116_v3 = vadd.f32 %v2115_v2, %v2095_v45 }
 0x1f9   :  { %v4148_v17 = vadd.f32 %v1867_v47, %v1652_v4  ;;  %v1413_v48 = vadd.f32 %v1389_v33, %v1173_v52  ;;  %v2166_v52 = vld [vmem:[%s4217_s3] sm:$0x1] }
 0x1fb   :  { %v2046_v60 = vmul.f32 %v2019_v8, %v4148_v17 }
 0x1fd   :  { %v2067_v61 = vadd.f32 %v2066_v19, %v2046_v60  ;;  %v2096_v18 = vmul.f32 %v2046_v60, %v4148_v17  ;;  %v4239_v60 = vld [vmem:[#allocation6_spill] sm:$0xff] }
 0x1fe   :  { %v1629_v50 = vpop.f32.mrf.mxu2 }
 0x1ff   :  { %v2117_v5 = vadd.f32 %v2116_v3, %v2096_v18  ;;  %v1653_v35 = vadd.f32 %v1629_v50, %v1413_v48  ;;  %v1869_v0 = vpop.f32.mrf.mxu3  ;;  %v4240_v3 = vld [vmem:[#allocation7_spill] sm:$0xff]  ;;  %v4241_v18 = vld [vmem:[#allocation8_spill] sm:$0xff]  ;;  %v4242_v50 = vld [vmem:[#allocation9_spill] sm:$0xff] }
 0x201   :  { %v1893_v46 = vadd.f32 %v1869_v0, %v1653_v35 }
 0x203   :  { %v2047_v54 = vmul.f32 %v2024_v53, %v1893_v46 }
 0x205   :  { %v2068_v62 = vadd.f32 %v2067_v61, %v2047_v54  ;;  %v2097_v27 = vmul.f32 %v2047_v54, %v1893_v46 }
 0x207   :  { %v2069_v22 = vrot.slane %v2068_v62, 4  ;;  %v2118_v10 = vadd.f32 %v2117_v5, %v2097_v27 }
 0x209   :  { %v2070_v49 = vadd.f32 %v2069_v22, %v2068_v62  ;;  %v2119_v7 = vrot.slane %v2118_v10, 4 }
 0x20b   :  { %v2071_v1 = vrot.slane %v2070_v49, 2  ;;  %v2120_v6 = vadd.f32 %v2119_v7, %v2118_v10 }
 0x20d   :  { %v2072_v44 = vadd.f32 %v2071_v1, %v2070_v49  ;;  %v2121_v37 = vrot.slane %v2120_v6, 2 }
 0x20f   :  { %v2073_v32 = vrot.slane %v2072_v44, 1  ;;  %v2122_v38 = vadd.f32 %v2121_v37, %v2120_v6 }
 0x211   :  { %v2074_v59 = vadd.f32 %v2073_v32, %v2072_v44  ;;  %v2123_v16 = vrot.slane %v2122_v38, 1 }
 0x213   :  { %v2124_v23 = vadd.f32 %v2123_v16, %v2122_v38  ;;  %v2148_v13 = vmul.f32 0.013888889, %v2074_v59 }
 0x215   :  { %v2149_v25 = vmul.f32 0.013888889, %v2124_v23  ;;  %v2150_v63 = vmul.f32 %v2148_v13, %v2148_v13 }
 0x217   :  { %v2151_v39 = vsub.f32 %v2149_v25, %v2150_v63 }
 0x219   :  { %v2152_v26 = vmax.f32 %v2151_v39, 0.0 }
 0x21b   :  { %v2154_v41 = vadd.f32 1e-05, %v2152_v26 }
 0x21d   :  { %3406 = vrsqrt.f32 %v2154_v41  ;;  %vm2161_vm1 = vweird.f32 %v2154_v41 }
 0x223   :  { %v3407_v47 = vpop.eup %3406 }
 0x224   :  { %v2156_v24 = vmul.f32 %v3407_v47, %v2154_v41  ;;  %vm2162_vm0 = vweird.f32 %v3407_v47 }
 0x225   :  { %vm2163_vm2 = vmor %vm2161_vm1, %vm2162_vm0 }
 0x226   :  { %v2157_v28 = vmul.f32 %v3407_v47, %v2156_v24 }
 0x228   :  { %v2158_v4 = vmul.f32 0.5, %v2157_v28 }
 0x22a   :  { %v2159_v12 = vsub.f32 1.5, %v2158_v4 }
 0x22c   :  { %v2160_v55 = vmul.f32 %v3407_v47, %v2159_v12 }
 0x22e   :  { %v2164_v45 = vsel %vm2163_vm2, %v3407_v47, %v2160_v55 }
 0x22f   :  { %v2165_v11 = vmul.f32 %v2164_v45, %v2153_v40 }
 0x231   :  { %v2167_v8 = vmul.f32 %v2165_v11, %v2148_v13  ;;  %v2192_v2 = vperm.slane %v2165_v11, 0 }
 0x233   :  { %v2168_v19 = vsub.f32 %v2166_v52, %v2167_v8  ;;  %v2194_v33 = vmul.f32 %v2192_v2, %v4239_v60  ;;  %v2195_v61 = vmul.f32 %v2192_v2, %v4240_v3  ;;  %v2196_v48 = vmul.f32 %v2192_v2, %v4241_v18 }
 0x234   :  { %v2197_v5 = vmul.f32 %v2192_v2, %v4242_v50  ;;  %v2198_v35 = vmul.f32 %v2192_v2, %v4019_v42  ;;  %v2199_v0 = vmul.f32 %v2192_v2, %v4022_v51  ;;  %v2200_v53 = vmul.f32 %v2192_v2, %v4025_v56 }
 0x235   :  { %v2201_v54 = vmul.f32 %v2192_v2, %v4028_v9  ;;  %v2202_v62 = vmul.f32 %v2192_v2, %v4031_v21  ;;  %v2203_v27 = vmul.f32 %v2192_v2, %v4034_v30  ;;  %v2204_v22 = vmul.f32 %v2192_v2, %v4036_v43 }
 0x236   :  { %v2205_v10 = vmul.f32 %v2192_v2, %v4091_v15  ;;  %v2206_v49 = vmul.f32 %v2192_v2, %v4099_v34  ;;  %v2207_v7 = vmul.f32 %v2192_v2, %v4107_v20  ;;  %v2208_v42 = vmul.f32 %v2192_v2, %v4115_v31 }
 0x237   :  { %v2213_v51 = vmul.f32 %v2192_v2, %v4139_v36  ;;  %v2214_v56 = vmul.f32 %v2192_v2, %v4148_v17  ;;  %v2215_v1 = vmul.f32 %v2192_v2, %v1893_v46  ;;  %v2217_v9 = vperm.slane %v2168_v19, 0 }
 0x238   :  { %v2209_v21 = vmul.f32 %v2192_v2, %v4121_v58  ;;  %v2210_v30 = vmul.f32 %v2192_v2, %v4127_v14  ;;  %v2211_v43 = vmul.f32 %v2192_v2, %v4131_v29  ;;  %v2212_v15 = vmul.f32 %v2192_v2, %v4135_v57 }
 0x239   :  { %v2219_v6 = vadd.f32 %v2217_v9, %v2194_v33  ;;  %v2220_v34 = vadd.f32 %v2217_v9, %v2195_v61  ;;  %v2221_v44 = vadd.f32 %v2217_v9, %v2196_v48  ;;  %v2222_v20 = vadd.f32 %v2217_v9, %v2197_v5 }
 0x23a   :  { %v2223_v37 = vadd.f32 %v2217_v9, %v2198_v35  ;;  %v2224_v31 = vadd.f32 %v2217_v9, %v2199_v0  ;;  %v2225_v32 = vadd.f32 %v2217_v9, %v2200_v53  ;;  %v2226_v36 = vadd.f32 %v2217_v9, %v2201_v54 }
 0x23b   :  { %v2227_v38 = vadd.f32 %v2217_v9, %v2202_v62  ;;  %v2228_v17 = vadd.f32 %v2217_v9, %v2203_v27  ;;  %v2229_v46 = vadd.f32 %v2217_v9, %v2204_v22  ;;  %v2230_v59 = vadd.f32 %v2217_v9, %v2205_v10 }
 0x23c   :  { %v2231_v16 = vadd.f32 %v2217_v9, %v2206_v49  ;;  %v2232_v58 = vadd.f32 %v2217_v9, %v2207_v7  ;;  %v2233_v23 = vadd.f32 %v2217_v9, %v2208_v42  ;;  %v2234_v14 = vadd.f32 %v2217_v9, %v2209_v21 }
 0x23d   :  { %v2235_v13 = vadd.f32 %v2217_v9, %v2210_v30  ;;  %v2236_v29 = vadd.f32 %v2217_v9, %v2211_v43  ;;  %v2237_v25 = vadd.f32 %v2217_v9, %v2212_v15  ;;  %v2238_v57 = vadd.f32 %v2217_v9, %v2213_v51 }
 0x23e   :  { %v2239_v63 = vadd.f32 %v2217_v9, %v2214_v56  ;;  %v2240_v39 = vadd.f32 %v2217_v9, %v2215_v1  ;;  %v2241_v26 = vmax.f32 %v2219_v6, 0.0  ;;  %v2242_v41 = vmax.f32 %v2220_v34, 0.0 }
 0x23f   :  { %v2243_v47 = vmax.f32 %v2221_v44, 0.0  ;;  %v2244_v24 = vmax.f32 %v2222_v20, 0.0  ;;  %v2245_v28 = vmax.f32 %v2223_v37, 0.0  ;;  %v2246_v4 = vmax.f32 %v2224_v31, 0.0 }
 0x240   :  { %v2247_v12 = vmax.f32 %v2225_v32, 0.0  ;;  %v2248_v40 = vmax.f32 %v2226_v36, 0.0  ;;  %v2249_v55 = vmax.f32 %v2227_v38, 0.0  ;;  %v2250_v45 = vmax.f32 %v2228_v17, 0.0 }
 0x241   :  { %v2251_v11 = vmax.f32 %v2229_v46, 0.0  ;;  %v2252_v52 = vmax.f32 %v2230_v59, 0.0  ;;  %v2253_v8 = vmax.f32 %v2231_v16, 0.0  ;;  %v2254_v2 = vmax.f32 %v2232_v58, 0.0 }
 0x242   :  { %v2255_v19 = vmax.f32 %v2233_v23, 0.0  ;;  %v2256_v60 = vmax.f32 %v2234_v14, 0.0  ;;  %v2257_v33 = vmax.f32 %v2235_v13, 0.0  ;;  %v2258_v3 = vmax.f32 %v2236_v29, 0.0 }
 0x243   :  { %v2259_v61 = vmax.f32 %v2237_v25, 0.0  ;;  %v2260_v18 = vmax.f32 %v2238_v57, 0.0  ;;  %v2261_v48 = vmax.f32 %v2239_v63, 0.0  ;;  %v2262_v50 = vmax.f32 %v2240_v39, 0.0 }
 0x244   :  { %v3340_v5 = vpack.c.bf16 %v2242_v41, %v2241_v26  ;;  %v3345_v35 = vpack.c.bf16 %v2244_v24, %v2243_v47  ;;  %v3350_v0 = vpack.c.bf16 %v2246_v4, %v2245_v28  ;;  %v3355_v53 = vpack.c.bf16 %v2248_v40, %v2247_v12 }
 0x245   :  { %v3360_v54 = vpack.c.bf16 %v2250_v45, %v2249_v55  ;;  %v3365_v62 = vpack.c.bf16 %v2252_v52, %v2251_v11  ;;  %v3370_v27 = vpack.c.bf16 %v2254_v2, %v2253_v8  ;;  %v3375_v22 = vpack.c.bf16 %v2256_v60, %v2255_v19 }
 0x246   :  { %3341 = vst [vmem:[%s4218_s5] sm:$0xff] %v3340_v5   ;;  %v3380_v10 = vpack.c.bf16 %v2258_v3, %v2257_v33  ;;  %v3385_v49 = vpack.c.bf16 %v2260_v18, %v2259_v61  ;;  %v3390_v7 = vpack.c.bf16 %v2262_v50, %v2261_v48 }
 0x247   :  { %3392 = vst [vmem:[%s4218_s5 + $0x8] sm:$0xff] %v3345_v35  }
 0x248   :  { %3393 = vst [vmem:[%s4218_s5 + $0x10] sm:$0xff] %v3350_v0  }
 0x249   :  { %3394 = vst [vmem:[%s4218_s5 + $0x18] sm:$0xff] %v3355_v53  }
 0x24a   :  { %3395 = vst [vmem:[%s4218_s5 + $0x20] sm:$0xff] %v3360_v54  }
 0x24b   :  { %3396 = vst [vmem:[%s4218_s5 + $0x28] sm:$0xff] %v3365_v62  }
 0x24c   :  { %3397 = vst [vmem:[%s4218_s5 + $0x30] sm:$0xff] %v3370_v27  }
 0x24d   :  { %3398 = vst [vmem:[%s4218_s5 + $0x38] sm:$0xff] %v3375_v22  }
 0x24e   :  { %3399 = vst [vmem:[%s4218_s5 + $0x40] sm:$0xff] %v3380_v10  }
 0x24f   :  { %3400 = vst [vmem:[%s4218_s5 + $0x48] sm:$0xff] %v3385_v49  }
 0x250   :  { %3401 = vst [vmem:[%s4218_s5 + $0x50] sm:$0xff] %v3390_v7  }

// kernel: forward.6
= control target key start
LH: loop header
LB: loop body
LE: loop exit
PB: predicated region body
PF: predicated region fallthrough
CT: control target
= control target key end

     0   :  { %v3742_v50 = vmov 0   ;;  %s5531_s1 = inlined_call_operand.vmem [shape: bf16[3,128,128], index: 1, kind: input, shape index: {}]   ;;  %s5532_s0 = inlined_call_operand.vmem [shape: bf16[3,464,128], index: 0, kind: input, shape index: {}]   ;;  %s5533_s4 = inlined_call_operand.vmem [shape: f32[464,1], index: 4, kind: input, shape index: {}]   ;;  %s5534_s2 = inlined_call_operand.vmem [shape: f32[1,128], index: 2, kind: input, shape index: {}]   ;;  %s5535_s3 = inlined_call_operand.vmem [shape: f32[1,128], index: 3, kind: input, shape index: {}]   ;;  %s5536_s5 = inlined_call_operand.vmem [shape: bf16[464,128], index: 5, kind: output, shape index: {}]  }
   0x1   :  { %v3459_v0 = vld [vmem:[%s5531_s1 + $0x78] sm:$0xff]  ;;  %v3458_v3 = vld [vmem:[%s5531_s1 + $0x70] sm:$0xff]  ;;  %v3457_v6 = vld [vmem:[%s5531_s1 + $0x68] sm:$0xff]  ;;  %3737 = vset.pattern.permute.xlu0 %v3742_v50  ;;  %3738 = vset.pattern.permute.xlu1 %v3742_v50 }
   0x2   :  { %v3483_v1 = vld [vmem:[%s5531_s1 + $0xb8] sm:$0xff]  ;;  %3720 = vmatpush.bf16.msra.mxu1 %v3459_v0  ;;  %v3482_v4 = vld [vmem:[%s5531_s1 + $0xb0] sm:$0xff]  ;;  %262 = vmatpush.bf16.msra.mxu0 %v3459_v0  ;;  %v3481_v7 = vld [vmem:[%s5531_s1 + $0xa8] sm:$0xff] }
   0x3   :  { %v3525_v2 = vld [vmem:[%s5531_s1 + $0x78] sm:$0xff]  ;;  %778 = vmatpush.bf16.msra.mxu2 %v3483_v1  ;;  %v3791_v5 = vld [vmem:[%s5531_s1 + $0x70] sm:$0xff]  ;;  %v3803_v8 = vld [vmem:[%s5531_s1 + $0x68] sm:$0xff]  ;;  %3739 = vset.pattern.permute.xlu2 %v3742_v50 }
   0x4   :  { %3728 = vmatpush.bf16.msra.mxu3 %v3525_v2  ;;  %v3456_v9 = vld [vmem:[%s5531_s1 + $0x60] sm:$0xff]  ;;  %v3455_v12 = vld [vmem:[%s5531_s1 + $0x58] sm:$0xff]  ;;  %v3454_v15 = vld [vmem:[%s5531_s1 + $0x50] sm:$0xff] }
   0x5   :  { %v3480_v10 = vld [vmem:[%s5531_s1 + $0xa0] sm:$0xff]  ;;  %v3479_v13 = vld [vmem:[%s5531_s1 + $0x98] sm:$0xff]  ;;  %v3478_v16 = vld [vmem:[%s5531_s1 + $0x90] sm:$0xff] }
   0x6   :  { %3721 = vmatpush.bf16.msra.mxu1 %v3458_v3  ;;  %263 = vmatpush.bf16.msra.mxu0 %v3458_v3  ;;  %v3815_v11 = vld [vmem:[%s5531_s1 + $0x60] sm:$0xff]  ;;  %v3521_v14 = vld [vmem:[%s5531_s1 + $0x58] sm:$0xff]  ;;  %v3520_v17 = vld [vmem:[%s5531_s1 + $0x50] sm:$0xff] }
   0x7   :  { %779 = vmatpush.bf16.msra.mxu2 %v3482_v4  ;;  %v3453_v18 = vld [vmem:[%s5531_s1 + $0x48] sm:$0xff]  ;;  %v3452_v21 = vld [vmem:[%s5531_s1 + $0x40] sm:$0xff]  ;;  %v3435_v24 = vld [vmem:[%s5531_s1 + $0x38] sm:$0xff] }
   0x8   :  { %3729 = vmatpush.bf16.msra.mxu3 %v3791_v5  ;;  %v3477_v19 = vld [vmem:[%s5531_s1 + $0x88] sm:$0xff]  ;;  %v3476_v22 = vld [vmem:[%s5531_s1 + $0x80] sm:$0xff]  ;;  %v3445_v25 = vld [vmem:[%s5532_s0 + $0x130] sm:$0xff] }
   0x9   :  { %v3519_v20 = vld [vmem:[%s5531_s1 + $0x48] sm:$0xff]  ;;  %v3518_v23 = vld [vmem:[%s5531_s1 + $0x40] sm:$0xff]  ;;  %v3460_v26 = vld [vmem:[%s5532_s0 + $0x1d0] sm:$0xff] }
   0xa   :  { %3722 = vmatpush.bf16.msra.mxu1 %v3457_v6  ;;  %264 = vmatpush.bf16.msra.mxu0 %v3457_v6  ;;  %v3509_v27 = vld [vmem:[%s5532_s0 + $0x188] sm:$0xff]  ;;  %v3546_v28 = vld [vmem:[%s5531_s1 + $0xb8] sm:$0xff]  ;;  %v3434_v31 = vld [vmem:[%s5531_s1 + $0x30] sm:$0xff] }
   0xb   :  { %780 = vmatpush.bf16.msra.mxu2 %v3481_v7  ;;  %v3436_v29 = vld [vmem:[%s5532_s0 + $0xe8] sm:$0xff]  ;;  %v3504_v30 = vld [vmem:[%s5531_s1 + $0x38] sm:$0xff]  ;;  %v3545_v32 = vld [vmem:[%s5531_s1 + $0xb0] sm:$0xff] }
   0xc   :  { %3730 = vmatpush.bf16.msra.mxu3 %v3803_v8  ;;  %v3503_v33 = vld [vmem:[%s5531_s1 + $0x30] sm:$0xff]  ;;  %v3433_v34 = vld [vmem:[%s5531_s1 + $0x28] sm:$0xff]  ;;  %v3432_v36 = vld [vmem:[%s5531_s1 + $0x20] sm:$0xff] }
   0xd   :  { %v3502_v35 = vld [vmem:[%s5531_s1 + $0x28] sm:$0xff]  ;;  %v3446_v37 = vld [vmem:[%s5532_s0 + $0x138] sm:$0xff]  ;;  %v3510_v39 = vld [vmem:[%s5532_s0 + $0x190] sm:$0xff] }
   0xe   :  { %3723 = vmatpush.bf16.msra.mxu1 %v3456_v9  ;;  %265 = vmatpush.bf16.msra.mxu0 %v3456_v9  ;;  %v3461_v38 = vld [vmem:[%s5532_s0 + $0x1d8] sm:$0xff]  ;;  %v3437_v40 = vld [vmem:[%s5532_s0 + $0xf0] sm:$0xff]  ;;  %v3544_v41 = vld [vmem:[%s5531_s1 + $0xa8] sm:$0xff] }
   0xf   :  { %781 = vmatpush.bf16.msra.mxu2 %v3480_v10  ;;  %v3431_v42 = vld [vmem:[%s5531_s1 + $0x18] sm:$0xff]  ;;  %v3447_v43 = vld [vmem:[%s5532_s0 + $0x140] sm:$0xff]  ;;  %v3430_v48 = vld [vmem:[%s5531_s1 + $0x10] sm:$0xff] }
  0x10   :  { %3731 = vmatpush.bf16.msra.mxu3 %v3815_v11  ;;  %v3462_v44 = vld [vmem:[%s5532_s0 + $0x1e0] sm:$0xff]  ;;  %v3511_v45 = vld [vmem:[%s5532_s0 + $0x198] sm:$0xff]  ;;  %v900_v52 = vld [vmem:[%s5533_s4 + $0x8] sm:$0xff] }
  0x11   :  { %v3438_v46 = vld [vmem:[%s5532_s0 + $0xf8] sm:$0xff]  ;;  %v3501_v47 = vld [vmem:[%s5531_s1 + $0x20] sm:$0xff]  ;;  %v3448_v53 = vld [vmem:[%s5532_s0 + $0x148] sm:$0xff] }
  0x12   :  { %3724 = vmatpush.bf16.msra.mxu1 %v3455_v12  ;;  %266 = vmatpush.bf16.msra.mxu0 %v3455_v12  ;;  %v899_v49 = vld [vmem:[%s5533_s4] sm:$0xff]  ;;  %v3463_v54 = vld [vmem:[%s5532_s0 + $0x1e8] sm:$0xff]  ;;  %v3500_v57 = vld [vmem:[%s5531_s1 + $0x18] sm:$0xff] }
  0x13   :  { %782 = vmatpush.bf16.msra.mxu2 %v3479_v13  ;;  %v3543_v51 = vld [vmem:[%s5531_s1 + $0xa0] sm:$0xff]  ;;  %933 = vperm.xlu0 %3737, %v899_v49   ;;  %v901_v58 = vld [vmem:[%s5533_s4 + $0x10] sm:$0xff]  ;;  %v3429_v59 = vld [vmem:[%s5531_s1 + $0x8] sm:$0xff] }
  0x14   :  { %3732 = vmatpush.bf16.msra.mxu3 %v3521_v14  ;;  %v3512_v55 = vld [vmem:[%s5532_s0 + $0x1a0] sm:$0xff]  ;;  %943 = vperm.xlu1 %3738, %v901_v58   ;;  %v905_v60 = vld [vmem:[%s5533_s4 + $0x30] sm:$0xff]  ;;  %v3542_v61 = vld [vmem:[%s5531_s1 + $0x98] sm:$0xff] }
  0x15   :  { %v3439_v56 = vld [vmem:[%s5532_s0 + $0x100] sm:$0xff]  ;;  %v902_v62 = vld [vmem:[%s5533_s4 + $0x18] sm:$0xff]  ;;  %v908_v63 = vld [vmem:[%s5533_s4 + $0x48] sm:$0xff] }
  0x16   :  { %3725 = vmatpush.bf16.msra.mxu1 %v3454_v15  ;;  %267 = vmatpush.bf16.msra.mxu0 %v3454_v15  ;;  %v3449_v0 = vld [vmem:[%s5532_s0 + $0x150] sm:$0xff]  ;;  %v3440_v3 = vld [vmem:[%s5532_s0 + $0x108] sm:$0xff]  ;;  %v3428_v4 = vld [vmem:[%s5531_s1] sm:$0xff] }
  0x17   :  { %783 = vmatpush.bf16.msra.mxu2 %v3478_v16  ;;  %v3464_v1 = vld [vmem:[%s5532_s0 + $0x1f0] sm:$0xff]  ;;  %v911_v7 = vld [vmem:[%s5533_s4 + $0x60] sm:$0xff]  ;;  %v3450_v12 = vld [vmem:[%s5532_s0 + $0x158] sm:$0xff] }
  0x18   :  { %3733 = vmatpush.bf16.msra.mxu3 %v3520_v17  ;;  %v3499_v6 = vld [vmem:[%s5531_s1 + $0x10] sm:$0xff]  ;;  %v903_v9 = vld [vmem:[%s5533_s4 + $0x20] sm:$0xff]  ;;  %v3465_v13 = vld [vmem:[%s5532_s0 + $0x1f8] sm:$0xff] }
  0x19   :  { %953 = vperm.xlu2 %3739, %v903_v9   ;;  %v909_v10 = vld [vmem:[%s5533_s4 + $0x50] sm:$0xff]  ;;  %v912_v16 = vld [vmem:[%s5533_s4 + $0x68] sm:$0xff] }
  0x1a   :  { %3726 = vmatpush.bf16.msra.mxu1 %v3453_v18  ;;  %268 = vmatpush.bf16.msra.mxu0 %v3453_v18  ;;  %v3441_v15 = vld [vmem:[%s5532_s0 + $0x110] sm:$0xff]  ;;  %v3498_v18 = vld [vmem:[%s5531_s1 + $0x8] sm:$0xff] }
  0x1b   :  { %784 = vmatpush.bf16.msra.mxu2 %v3477_v19  ;;  %938 = vperm.xlu0 %3737, %v900_v52   ;;  %v917_v19 = vld [vmem:[%s5533_s4 + $0x90] sm:$0xff]  ;;  %v2016_v49 = vld [vmem:[%s5533_s4 + $0x108] sm:$0xff]  ;;  %v930_v52 = vld [vmem:[%s5533_s4 + $0xf8] sm:$0xff] }
  0x1c   :  { %3734 = vmatpush.bf16.msra.mxu3 %v3519_v20  ;;  %948 = vperm.xlu1 %3738, %v902_v62   ;;  %v3444_v50 = vld [vmem:[%s5532_s0 + $0x128] sm:$0xff]  ;;  %v3414_v62 = vld [vmem:[%s5532_s0 + $0x10] sm:$0xff] }
  0x1d   :  { %v928_v9 = vld [vmem:[%s5533_s4 + $0xe8] sm:$0xff] }
  0x1e   :  { %3727 = vmatpush.bf16.msra.mxu1 %v3452_v21  ;;  %269 = vmatpush.bf16.msra.mxu0 %v3452_v21  ;;  %v907_v21 = vld [vmem:[%s5533_s4 + $0x40] sm:$0xff] }
  0x1f   :  { %785 = vmatpush.bf16.msra.mxu2 %v3476_v22  ;;  %v3451_v22 = vld [vmem:[%s5532_s0 + $0x160] sm:$0xff] }
  0x20   :  { %3735 = vmatpush.bf16.msra.mxu3 %v3518_v23 }
  0x21   :  { %315 = vmatmul.bf16.vlgmr.msra.gmra.mxu1 %v3445_v25  ;;  %270 = vmatmul.bf16.vlgmr.msra.gmra.mxu0 %v3436_v29  ;;  %v3540_v25 = vld [vmem:[%s5531_s1 + $0x88] sm:$0xff]  ;;  %v910_v29 = vld [vmem:[%s5533_s4 + $0x58] sm:$0xff] }
  0x22   :  { %495 = vmatpush.bf16.msrb.mxu1 %v3435_v24  ;;  %786 = vmatmul.bf16.vlgmr.msra.gmra.mxu2 %v3460_v26  ;;  %v3515_v24 = vld [vmem:[%s5532_s0 + $0x1b8] sm:$0xff]  ;;  %v920_v26 = vld [vmem:[%s5533_s4 + $0xa8] sm:$0xff] }
  0x23   :  { %1473 = vmatpush.bf16.msrb.mxu2 %v3525_v2  ;;  %1501 = vmatmul.bf16.vlgmr.msra.gmra.mxu3 %v3509_v27  ;;  %v3513_v2 = vld [vmem:[%s5532_s0 + $0x1a8] sm:$0xff]  ;;  %v3442_v27 = vld [vmem:[%s5532_s0 + $0x118] sm:$0xff] }
  0x24   :  { %1915 = vmatpush.bf16.msrb.mxu0 %v3546_v28  ;;  %1673 = vmatpush.bf16.msrb.mxu3 %v3504_v30  ;;  %v918_v28 = vld [vmem:[%s5533_s4 + $0x98] sm:$0xff]  ;;  %v923_v30 = vld [vmem:[%s5533_s4 + $0xc0] sm:$0xff] }
  0x25   :  { %963 = vperm.xlu0 %3737, %v905_v60  }
  0x26   :  { %496 = vmatpush.bf16.msrb.mxu1 %v3434_v31  ;;  %v3497_v31 = vld [vmem:[%s5531_s1] sm:$0xff] }
  0x27   :  { %1474 = vmatpush.bf16.msrb.mxu2 %v3791_v5  ;;  %v906_v5 = vld [vmem:[%s5533_s4 + $0x38] sm:$0xff] }
  0x28   :  { %1916 = vmatpush.bf16.msrb.mxu0 %v3545_v32  ;;  %1674 = vmatpush.bf16.msrb.mxu3 %v3503_v33  ;;  %v921_v32 = vld [vmem:[%s5533_s4 + $0xb0] sm:$0xff]  ;;  %v3412_v33 = vld [vmem:[%s5532_s0] sm:$0xff] }
  0x29   :  { %968 = vperm.xlu1 %3738, %v906_v5  }
  0x2a   :  { %497 = vmatpush.bf16.msrb.mxu1 %v3433_v34  ;;  %v3467_v34 = vld [vmem:[%s5532_s0 + $0x208] sm:$0xff] }
  0x2b   :  { %1475 = vmatpush.bf16.msrb.mxu2 %v3803_v8  ;;  %v3541_v8 = vld [vmem:[%s5531_s1 + $0x90] sm:$0xff] }
  0x2c   :  { %1675 = vmatpush.bf16.msrb.mxu3 %v3502_v35  ;;  %1917 = vmatpush.bf16.msrb.mxu0 %v3544_v41  ;;  %v913_v35 = vld [vmem:[%s5533_s4 + $0x70] sm:$0xff]  ;;  %v916_v41 = vld [vmem:[%s5533_s4 + $0x88] sm:$0xff] }
  0x2d   :  { %978 = vperm.xlu0 %3737, %v908_v63   ;;  %v3469_v63 = vld [vmem:[%s5532_s0 + $0x218] sm:$0xff] }
  0x2e   :  { %498 = vmatpush.bf16.msrb.mxu1 %v3432_v36  ;;  %v3516_v36 = vld [vmem:[%s5532_s0 + $0x1c0] sm:$0xff] }
  0x2f   :  { %1476 = vmatpush.bf16.msrb.mxu2 %v3815_v11  ;;  %v914_v11 = vld [vmem:[%s5533_s4 + $0x78] sm:$0xff] }
  0x30   :  { %1676 = vmatpush.bf16.msrb.mxu3 %v3501_v47  ;;  %1918 = vmatpush.bf16.msrb.mxu0 %v3543_v51 }
  0x31   :  { %320 = vmatmul.bf16.gmra.mxu1 %v3446_v37  ;;  %275 = vmatmul.bf16.gmra.mxu0 %v3437_v40  ;;  %v926_v37 = vld [vmem:[%s5533_s4 + $0xd8] sm:$0xff]  ;;  %v924_v40 = vld [vmem:[%s5533_s4 + $0xc8] sm:$0xff] }
  0x32   :  { %791 = vmatmul.bf16.gmra.mxu2 %v3461_v38  ;;  %499 = vmatpush.bf16.msrb.mxu1 %v3431_v42  ;;  %v3443_v38 = vld [vmem:[%s5532_s0 + $0x120] sm:$0xff]  ;;  %v929_v42 = vld [vmem:[%s5533_s4 + $0xf0] sm:$0xff] }
  0x33   :  { %1477 = vmatpush.bf16.msrb.mxu2 %v3521_v14  ;;  %1506 = vmatmul.bf16.gmra.mxu3 %v3510_v39  ;;  %v3514_v14 = vld [vmem:[%s5532_s0 + $0x1b0] sm:$0xff]  ;;  %v3539_v39 = vld [vmem:[%s5531_s1 + $0x80] sm:$0xff] }
  0x34   :  { %1677 = vmatpush.bf16.msrb.mxu3 %v3500_v57  ;;  %1919 = vmatpush.bf16.msrb.mxu0 %v3542_v61  ;;  %v2019_v57 = vld [vmem:[%s5533_s4 + $0x120] sm:$0xff] }
  0x35   :  { %993 = vperm.xlu0 %3737, %v911_v7   ;;  %983 = vperm.xlu1 %3738, %v909_v10  }
  0x36   :  { %500 = vmatpush.bf16.msrb.mxu1 %v3430_v48  ;;  %v3517_v48 = vld [vmem:[%s5532_s0 + $0x1c8] sm:$0xff] }
  0x37   :  { %1478 = vmatpush.bf16.msrb.mxu2 %v3520_v17  ;;  %v904_v17 = vld [vmem:[%s5533_s4 + $0x28] sm:$0xff] }
  0x38   :  { %1678 = vmatpush.bf16.msrb.mxu3 %v3499_v6  ;;  %1920 = vmatpush.bf16.msrb.mxu0 %v3541_v8  ;;  %v2020_v6 = vld [vmem:[%s5533_s4 + $0x128] sm:$0xff] }
  0x39   :  { %958 = vperm.xlu2 %3739, %v904_v17   ;;  %v3470_v17 = vld [vmem:[%s5532_s0 + $0x220] sm:$0xff] }
  0x3a   :  { %501 = vmatpush.bf16.msrb.mxu1 %v3429_v59  ;;  %v2017_v59 = vld [vmem:[%s5533_s4 + $0x110] sm:$0xff] }
  0x3b   :  { %1479 = vmatpush.bf16.msrb.mxu2 %v3519_v20  ;;  %v915_v20 = vld [vmem:[%s5533_s4 + $0x80] sm:$0xff] }
  0x3c   :  { %1679 = vmatpush.bf16.msrb.mxu3 %v3498_v18  ;;  %1921 = vmatpush.bf16.msrb.mxu0 %v3540_v25  ;;  %v2015_v18 = vld [vmem:[%s5533_s4 + $0x100] sm:$0xff] }
  0x3d   :  { %1008 = vperm.xlu0 %3737, %v914_v11   ;;  %998 = vperm.xlu1 %3738, %v912_v16   ;;  %v2025_v11 = vld [vmem:[%s5533_s4 + $0x150] sm:$0xff]  ;;  %v3415_v16 = vld [vmem:[%s5532_s0 + $0x18] sm:$0xff] }
  0x3e   :  { %502 = vmatpush.bf16.msrb.mxu1 %v3428_v4  ;;  %v3526_v4 = vld [vmem:[%s5532_s0 + $0x250] sm:$0xff] }
  0x3f   :  { %1480 = vmatpush.bf16.msrb.mxu2 %v3518_v23  ;;  %v3466_v23 = vld [vmem:[%s5532_s0 + $0x200] sm:$0xff] }
  0x40   :  { %1680 = vmatpush.bf16.msrb.mxu3 %v3497_v31  ;;  %1922 = vmatpush.bf16.msrb.mxu0 %v3539_v39  ;;  %v2029_v31 = vld [vmem:[%s5533_s4 + $0x170] sm:$0xff]  ;;  %v2034_v39 = vld [vmem:[%s5533_s4 + $0x198] sm:$0xff] }
  0x41   :  { %325 = vmatmul.bf16.gmra.mxu1 %v3447_v43  ;;  %280 = vmatmul.bf16.gmra.mxu0 %v3438_v46  ;;  %v927_v43 = vld [vmem:[%s5533_s4 + $0xe0] sm:$0xff] }
  0x42   :  { %796 = vmatmul.bf16.gmra.mxu2 %v3462_v44  ;;  %973 = vperm.xlu2 %3739, %v907_v21   ;;  %v3413_v44 = vld [vmem:[%s5532_s0 + $0x8] sm:$0xff]  ;;  %v919_v46 = vld [vmem:[%s5533_s4 + $0xa0] sm:$0xff] }
  0x43   :  { %1511 = vmatmul.bf16.gmra.mxu3 %v3511_v45  ;;  %v3468_v45 = vld [vmem:[%s5532_s0 + $0x210] sm:$0xff]  ;;  %v2028_v21 = vld [vmem:[%s5533_s4 + $0x168] sm:$0xff] }
  0x45   :  { %1023 = vperm.xlu0 %3737, %v917_v19   ;;  %1013 = vperm.xlu1 %3738, %v915_v20   ;;  %v3485_v20 = vld [vmem:[%s5532_s0 + $0x88] sm:$0xff] }
  0x4a   :  { %988 = vperm.xlu2 %3739, %v910_v29   ;;  %v2031_v29 = vld [vmem:[%s5533_s4 + $0x180] sm:$0xff] }
  0x4d   :  { %1038 = vperm.xlu0 %3737, %v920_v26   ;;  %1028 = vperm.xlu1 %3738, %v918_v28  }
  0x51   :  { %330 = vmatmul.bf16.gmra.mxu1 %v3448_v53  ;;  %285 = vmatmul.bf16.gmra.mxu0 %v3439_v56 }
  0x52   :  { %801 = vmatmul.bf16.gmra.mxu2 %v3463_v54  ;;  %1003 = vperm.xlu2 %3739, %v913_v35   ;;  %v3471_v35 = vld [vmem:[%s5532_s0 + $0x228] sm:$0xff] }
  0x53   :  { %1516 = vmatmul.bf16.gmra.mxu3 %v3512_v55  ;;  %v922_v55 = vld [vmem:[%s5533_s4 + $0xb8] sm:$0xff] }
  0x55   :  { %1053 = vperm.xlu0 %3737, %v923_v30   ;;  %1043 = vperm.xlu1 %3738, %v921_v32  }
  0x5a   :  { %1018 = vperm.xlu2 %3739, %v916_v41  }
  0x5d   :  { %1068 = vperm.xlu0 %3737, %v926_v37   ;;  %1058 = vperm.xlu1 %3738, %v924_v40   ;;  %v3528_v40 = vld [vmem:[%s5532_s0 + $0x260] sm:$0xff] }
  0x61   :  { %335 = vmatmul.bf16.gmra.mxu1 %v3449_v0  ;;  %290 = vmatmul.bf16.gmra.mxu0 %v3440_v3  ;;  %v925_v0 = vld [vmem:[%s5533_s4 + $0xd0] sm:$0xff]  ;;  %v2022_v3 = vld [vmem:[%s5533_s4 + $0x138] sm:$0xff] }
  0x62   :  { %806 = vmatmul.bf16.gmra.mxu2 %v3464_v1  ;;  %1033 = vperm.xlu2 %3739, %v919_v46  }
  0x63   :  { %1521 = vmatmul.bf16.gmra.mxu3 %v3513_v2  ;;  %v3484_v2 = vld [vmem:[%s5532_s0 + $0x80] sm:$0xff] }
  0x65   :  { %1083 = vperm.xlu0 %3737, %v929_v42   ;;  %1073 = vperm.xlu1 %3738, %v927_v43   ;;  %v2032_v42 = vld [vmem:[%s5533_s4 + $0x188] sm:$0xff] }
  0x6a   :  { %1048 = vperm.xlu2 %3739, %v922_v55  }
  0x6d   :  { %2048 = vperm.xlu0 %3737, %v2016_v49   ;;  %1088 = vperm.xlu1 %3738, %v930_v52  }
  0x71   :  { %340 = vmatmul.bf16.gmra.mxu1 %v3450_v12  ;;  %295 = vmatmul.bf16.gmra.mxu0 %v3441_v15 }
  0x72   :  { %811 = vmatmul.bf16.gmra.mxu2 %v3465_v13  ;;  %1063 = vperm.xlu2 %3739, %v925_v0   ;;  %v2023_v13 = vld [vmem:[%s5533_s4 + $0x140] sm:$0xff]  ;;  %v3487_v0 = vld [vmem:[%s5532_s0 + $0x98] sm:$0xff] }
  0x73   :  { %1526 = vmatmul.bf16.gmra.mxu3 %v3514_v14 }
  0x75   :  { %2063 = vperm.xlu0 %3737, %v2019_v57   ;;  %2053 = vperm.xlu1 %3738, %v2017_v59   ;;  %v3417_v57 = vld [vmem:[%s5532_s0 + $0x28] sm:$0xff]  ;;  %v3472_v59 = vld [vmem:[%s5532_s0 + $0x230] sm:$0xff] }
  0x7a   :  { %1078 = vperm.xlu2 %3739, %v928_v9  }
  0x7d   :  { %2078 = vperm.xlu0 %3737, %v2022_v3   ;;  %2068 = vperm.xlu1 %3738, %v2020_v6   ;;  %v3529_v3 = vld [vmem:[%s5532_s0 + $0x268] sm:$0xff]  ;;  %v2038_v6 = vld [vmem:[%s5533_s4 + $0x1b8] sm:$0xff] }
  0x81   :  { %345 = vmatmul.bf16.gmra.mxu1 %v3451_v22  ;;  %300 = vmatmul.bf16.gmra.mxu0 %v3442_v27  ;;  %v3527_v22 = vld [vmem:[%s5532_s0 + $0x258] sm:$0xff] }
  0x82   :  { %816 = vmatmul.bf16.gmra.mxu2 %v3466_v23  ;;  %2043 = vperm.xlu2 %3739, %v2015_v18   ;;  %v2018_v27 = vld [vmem:[%s5533_s4 + $0x118] sm:$0xff] }
  0x83   :  { %1531 = vmatmul.bf16.gmra.mxu3 %v3515_v24  ;;  %v2026_v24 = vld [vmem:[%s5533_s4 + $0x158] sm:$0xff] }
  0x85   :  { %2093 = vperm.xlu0 %3737, %v2025_v11   ;;  %2083 = vperm.xlu1 %3738, %v2023_v13   ;;  %v2030_v13 = vld [vmem:[%s5533_s4 + $0x178] sm:$0xff] }
  0x8a   :  { %2058 = vperm.xlu2 %3739, %v2018_v27  }
  0x8d   :  { %2108 = vperm.xlu0 %3737, %v2028_v21   ;;  %2098 = vperm.xlu1 %3738, %v2026_v24   ;;  %v3418_v21 = vld [vmem:[%s5532_s0 + $0x30] sm:$0xff] }
  0x8e   :  { %v2033_v24 = vld [vmem:[%s5533_s4 + $0x190] sm:$0xff] }
  0x91   :  { %503 = vmatmul.bf16.vlgmr.msrb.gmra.mxu1 %v3412_v33  ;;  %305 = vmatmul.bf16.gmra.mxu0 %v3443_v38  ;;  %v3486_v38 = vld [vmem:[%s5532_s0 + $0x90] sm:$0xff] }
  0x92   :  { %821 = vmatmul.bf16.gmra.mxu2 %v3467_v34  ;;  %v3416_v34 = vld [vmem:[%s5532_s0 + $0x20] sm:$0xff] }
  0x93   :  { %1536 = vmatmul.bf16.gmra.mxu3 %v3516_v36  ;;  %v2021_v36 = vld [vmem:[%s5533_s4 + $0x130] sm:$0xff] }
  0x94   :  { %2073 = vperm.xlu2 %3739, %v2021_v36  }
  0x95   :  { %2123 = vperm.xlu0 %3737, %v2031_v29   ;;  %2113 = vperm.xlu1 %3738, %v2029_v31   ;;  %v3488_v29 = vld [vmem:[%s5532_s0 + $0xa0] sm:$0xff]  ;;  %v3530_v31 = vld [vmem:[%s5532_s0 + $0x270] sm:$0xff] }
  0x9d   :  { %2138 = vperm.xlu0 %3737, %v2034_v39   ;;  %2128 = vperm.xlu1 %3738, %v2032_v42  }
  0x9e   :  { %v4115_v47 = vpop.f32.mrf.mxu1  ;;  %v4126_v51 = vpop.f32.mrf.mxu0 }
  0x9f   :  { %5574 = vst [vmem:[#allocation3_spill] sm:$0xff] %v4115_v47 }
  0xa1   :  { %508 = vmatmul.bf16.gmra.mxu1 %v3413_v44  ;;  %310 = vmatmul.bf16.gmra.mxu0 %v3444_v50  ;;  %v2035_v50 = vld [vmem:[%s5533_s4 + $0x1a0] sm:$0xff] }
  0xa2   :  { %826 = vmatmul.bf16.gmra.mxu2 %v3468_v45  ;;  %v2024_v45 = vld [vmem:[%s5533_s4 + $0x148] sm:$0xff] }
  0xa3   :  { %1541 = vmatmul.bf16.gmra.mxu3 %v3517_v48  ;;  %2088 = vperm.xlu2 %3739, %v2024_v45   ;;  %v2037_v48 = vld [vmem:[%s5533_s4 + $0x1b0] sm:$0xff] }
  0xa5   :  { %v4131_v53 = vpop.f32.mrf.mxu2  ;;  %2153 = vperm.xlu0 %3737, %v2037_v48   ;;  %2143 = vperm.xlu1 %3738, %v2035_v50   ;;  %v3419_v48 = vld [vmem:[%s5532_s0 + $0x38] sm:$0xff]  ;;  %v3474_v50 = vld [vmem:[%s5532_s0 + $0x240] sm:$0xff] }
  0xa6   :  { %v4133_v54 = vpop.f32.mrf.mxu3  ;;  %v4138_v56 = vpop.f32.mrf.mxu1 }
  0xa7   :  { %5575 = vst [vmem:[#allocation4_spill] sm:$0xff] %v4138_v56  ;;  %v4143_v58 = vpop.f32.mrf.mxu0  ;;  %v4499_v56 = vpop.permute.xlu2 %953 }
  0xad   :  { %v4148_v60 = vpop.f32.mrf.mxu2  ;;  %2158 = vperm.xlu1 %3738, %v2038_v6  }
  0xae   :  { %v4150_v61 = vpop.f32.mrf.mxu3  ;;  %v4161_v1 = vpop.f32.mrf.mxu1 }
  0xaf   :  { %5576 = vst [vmem:[#allocation5_spill] sm:$0xff] %v4161_v1  ;;  %v4172_v5 = vpop.f32.mrf.mxu0  ;;  %v4497_v1 = vpop.permute.xlu1 %943 }
  0xb1   :  { %513 = vmatmul.bf16.gmra.mxu1 %v3414_v62  ;;  %1923 = vmatmul.bf16.vlgmr.msrb.gmra.mxu0 %v3526_v4  ;;  %v2027_v62 = vld [vmem:[%s5533_s4 + $0x160] sm:$0xff] }
  0xb2   :  { %831 = vmatmul.bf16.gmra.mxu2 %v3469_v63  ;;  %2103 = vperm.xlu2 %3739, %v2027_v62   ;;  %v2039_v62 = vld [vmem:[%s5533_s4 + $0x1c0] sm:$0xff] }
  0xb3   :  { %1681 = vmatmul.bf16.vlgmr.msrb.gmra.mxu3 %v3484_v2  ;;  %v2040_v2 = vld [vmem:[%s5533_s4 + $0x1c8] sm:$0xff] }
  0xb4   :  { %2168 = vperm.xlu0 %3737, %v2040_v2  }
  0xb5   :  { %v4177_v7 = vpop.f32.mrf.mxu2 }
  0xb6   :  { %v4179_v8 = vpop.f32.mrf.mxu3  ;;  %v4184_v10 = vpop.f32.mrf.mxu1 }
  0xb7   :  { %5577 = vst [vmem:[#allocation6_spill] sm:$0xff] %v4184_v10  ;;  %v4189_v12 = vpop.f32.mrf.mxu0 }
  0xba   :  { %2118 = vperm.xlu2 %3739, %v2030_v13  }
  0xbd   :  { %v4194_v14 = vpop.f32.mrf.mxu2 }
  0xbe   :  { %v4196_v15 = vpop.f32.mrf.mxu3  ;;  %v4207_v19 = vpop.f32.mrf.mxu1 }
  0xbf   :  { %5578 = vst [vmem:[#allocation7_spill] sm:$0xff] %v4207_v19  ;;  %v4218_v23 = vpop.f32.mrf.mxu0 }
  0xc1   :  { %518 = vmatmul.bf16.gmra.mxu1 %v3415_v16  ;;  %1928 = vmatmul.bf16.gmra.mxu0 %v3527_v22  ;;  %v3473_v22 = vld [vmem:[%s5532_s0 + $0x238] sm:$0xff] }
  0xc2   :  { %836 = vmatmul.bf16.gmra.mxu2 %v3470_v17  ;;  %2133 = vperm.xlu2 %3739, %v2033_v24  }
  0xc3   :  { %1686 = vmatmul.bf16.gmra.mxu3 %v3485_v20 }
  0xc5   :  { %v4223_v25 = vpop.f32.mrf.mxu2 }
  0xc6   :  { %v4225_v26 = vpop.f32.mrf.mxu3  ;;  %v4230_v28 = vpop.f32.mrf.mxu1 }
  0xc7   :  { %5579 = vst [vmem:[#allocation8_spill] sm:$0xff] %v4230_v28  ;;  %v4235_v30 = vpop.f32.mrf.mxu0 }
  0xcd   :  { %v4240_v32 = vpop.f32.mrf.mxu2 }
  0xce   :  { %v4242_v33 = vpop.f32.mrf.mxu3  ;;  %v4253_v37 = vpop.f32.mrf.mxu1 }
  0xcf   :  { %5580 = vst [vmem:[#allocation9_spill] sm:$0xff] %v4253_v37  ;;  %v4264_v41 = vpop.f32.mrf.mxu0  ;;  %v3422_v37 = vld [vmem:[%s5532_s0 + $0x50] sm:$0xff] }
  0xd1   :  { %523 = vmatmul.bf16.gmra.mxu1 %v3416_v34  ;;  %1933 = vmatmul.bf16.gmra.mxu0 %v3528_v40 }
  0xd2   :  { %841 = vmatmul.bf16.gmra.mxu2 %v3471_v35 }
  0xd3   :  { %1691 = vmatmul.bf16.gmra.mxu3 %v3486_v38  ;;  %v2036_v38 = vld [vmem:[%s5533_s4 + $0x1a8] sm:$0xff] }
  0xd4   :  { %2148 = vperm.xlu2 %3739, %v2036_v38  }
  0xd5   :  { %v4269_v43 = vpop.f32.mrf.mxu2 }
  0xd6   :  { %v4271_v44 = vpop.f32.mrf.mxu3  ;;  %v4276_v46 = vpop.f32.mrf.mxu1 }
  0xd7   :  { %5581 = vst [vmem:[#allocation10_spill] sm:$0xff] %v4276_v46  ;;  %v4281_v49 = vpop.f32.mrf.mxu0 }
  0xdc   :  { %2163 = vperm.xlu2 %3739, %v2039_v62  }
  0xdd   :  { %v4286_v52 = vpop.f32.mrf.mxu2 }
  0xde   :  { %v4288_v55 = vpop.f32.mrf.mxu3  ;;  %v4299_v63 = vpop.f32.mrf.mxu1 }
  0xdf   :  { %5582 = vst [vmem:[#allocation11_spill] sm:$0xff] %v4288_v55  ;;  %v4310_v4 = vpop.f32.mrf.mxu0  ;;  %v3535_v55 = vld [vmem:[%s5532_s0 + $0x298] sm:$0xff] }
  0xe0   :  { %5583 = vst [vmem:[#allocation12_spill] sm:$0xff] %v4299_v63 }
  0xe1   :  { %528 = vmatmul.bf16.gmra.mxu1 %v3417_v57  ;;  %1938 = vmatmul.bf16.gmra.mxu0 %v3529_v3 }
  0xe2   :  { %846 = vmatmul.bf16.gmra.mxu2 %v3472_v59  ;;  %v3489_v59 = vld [vmem:[%s5532_s0 + $0xa8] sm:$0xff] }
  0xe3   :  { %1696 = vmatmul.bf16.gmra.mxu3 %v3487_v0  ;;  %v3531_v0 = vld [vmem:[%s5532_s0 + $0x278] sm:$0xff] }
  0xe5   :  { %v4315_v9 = vpop.f32.mrf.mxu2 }
  0xe6   :  { %v4317_v11 = vpop.f32.mrf.mxu3  ;;  %v4322_v16 = vpop.f32.mrf.mxu1 }
  0xe7   :  { %5584 = vst [vmem:[#allocation13_spill] sm:$0xff] %v4317_v11  ;;  %v4324_v17 = vpop.f32.mrf.mxu0  ;;  %v4477_v11 = vpop.permute.xlu0 %933 }
  0xe8   :  { %5585 = vst [vmem:[#allocation14_spill] sm:$0xff] %v4322_v16 }
  0xed   :  { %v4326_v18 = vpop.f32.mrf.mxu2 }
  0xee   :  { %v4328_v20 = vpop.f32.mrf.mxu3  ;;  %v4339_v27 = vpop.f32.mrf.mxu1 }
  0xef   :  { %5586 = vst [vmem:[#allocation15_spill] sm:$0xff] %v4328_v20  ;;  %v4347_v34 = vpop.f32.mrf.mxu0 }
  0xf0   :  { %5587 = vst [vmem:[#allocation16_spill] sm:$0xff] %v4339_v27  ;;  %v3421_v27 = vld [vmem:[%s5532_s0 + $0x48] sm:$0xff] }
  0xf1   :  { %533 = vmatmul.bf16.gmra.mxu1 %v3418_v21  ;;  %1943 = vmatmul.bf16.gmra.mxu0 %v3530_v31  ;;  %v3475_v31 = vld [vmem:[%s5532_s0 + $0x248] sm:$0xff] }
  0xf2   :  { %851 = vmatmul.bf16.gmra.mxu2 %v3473_v22 }
  0xf3   :  { %1701 = vmatmul.bf16.gmra.mxu3 %v3488_v29  ;;  %v3420_v29 = vld [vmem:[%s5532_s0 + $0x40] sm:$0xff] }
  0xf5   :  { %v4349_v35 = vpop.f32.mrf.mxu2 }
  0xf6   :  { %5588 = vst [vmem:[#allocation17_spill] sm:$0xff] %v4349_v35  ;;  %v4351_v36 = vpop.f32.mrf.mxu3  ;;  %v4356_v39 = vpop.f32.mrf.mxu1 }
  0xf7   :  { %5589 = vst [vmem:[#allocation18_spill] sm:$0xff] %v4351_v36  ;;  %v4358_v40 = vpop.f32.mrf.mxu0 }
  0xf8   :  { %5590 = vst [vmem:[#allocation19_spill] sm:$0xff] %v4356_v39 }
  0xfd   :  { %v4360_v42 = vpop.f32.mrf.mxu2 }
  0xfe   :  { %5591 = vst [vmem:[#allocation20_spill] sm:$0xff] %v4360_v42  ;;  %v4362_v45 = vpop.f32.mrf.mxu3  ;;  %v4370_v57 = vpop.f32.mrf.mxu1 }
  0xff   :  { %5592 = vst [vmem:[#allocation21_spill] sm:$0xff] %v4362_v45  ;;  %v4381_v2 = vpop.f32.mrf.mxu0 }
 0x100   :  { %5593 = vst [vmem:[#allocation22_spill] sm:$0xff] %v4370_v57 }
 0x101   :  { %5594 = vst [vmem:[#allocation23_spill] sm:$0xff] %v4381_v2  ;;  %538 = vmatmul.bf16.gmra.mxu1 %v3419_v48  ;;  %1948 = vmatmul.bf16.gmra.mxu0 %v3531_v0  ;;  %v3490_v48 = vld [vmem:[%s5532_s0 + $0xb0] sm:$0xff] }
 0x102   :  { %856 = vmatmul.bf16.gmra.mxu2 %v3474_v50  ;;  %v3532_v50 = vld [vmem:[%s5532_s0 + $0x280] sm:$0xff] }
 0x103   :  { %1706 = vmatmul.bf16.gmra.mxu3 %v3489_v59 }
 0x105   :  { %v4383_v3 = vpop.f32.mrf.mxu2 }
 0x106   :  { %5595 = vst [vmem:[#allocation24_spill] sm:$0xff] %v4383_v3  ;;  %v4385_v6 = vpop.f32.mrf.mxu3  ;;  %v4387_v13 = vpop.f32.mrf.mxu1 }
 0x107   :  { %5596 = vst [vmem:[#allocation25_spill] sm:$0xff] %v4385_v6  ;;  %v4389_v21 = vpop.f32.mrf.mxu0 }
 0x108   :  { %5597 = vst [vmem:[#allocation26_spill] sm:$0xff] %v4387_v13 }
 0x109   :  { %5598 = vst [vmem:[#allocation27_spill] sm:$0xff] %v4389_v21 }
 0x10d   :  { %v4391_v22 = vpop.f32.mrf.mxu2 }
 0x10e   :  { %5599 = vst [vmem:[#allocation28_spill] sm:$0xff] %v4391_v22  ;;  %v4393_v24 = vpop.f32.mrf.mxu3  ;;  %v4401_v38 = vpop.f32.mrf.mxu1 }
 0x10f   :  { %5600 = vst [vmem:[#allocation29_spill] sm:$0xff] %v4393_v24  ;;  %v4409_v59 = vpop.f32.mrf.mxu0 }
 0x110   :  { %5601 = vst [vmem:[#allocation30_spill] sm:$0xff] %v4409_v59 }
 0x111   :  { %543 = vmatmul.bf16.gmra.mxu1 %v3420_v29  ;;  %1953 = vmatmul.bf16.gmra.mxu0 %v3532_v50  ;;  %v3505_v29 = vld [vmem:[%s5532_s0 + $0x168] sm:$0xff] }
 0x112   :  { %861 = vmatmul.bf16.gmra.mxu2 %v3475_v31  ;;  %v3533_v50 = vld [vmem:[%s5532_s0 + $0x288] sm:$0xff] }
 0x113   :  { %1711 = vmatmul.bf16.gmra.mxu3 %v3490_v48  ;;  %v3491_v48 = vld [vmem:[%s5532_s0 + $0xb8] sm:$0xff] }
 0x115   :  { %v4411_v62 = vpop.f32.mrf.mxu2 }
 0x116   :  { %5602 = vst [vmem:[#allocation31_spill] sm:$0xff] %v4411_v62  ;;  %v4413_v0 = vpop.f32.mrf.mxu3  ;;  %v4415_v13 = vpop.f32.mrf.mxu1 }
 0x117   :  { %5603 = vst [vmem:[#allocation32_spill] sm:$0xff] %v4413_v0  ;;  %v4417_v57 = vpop.f32.mrf.mxu0 }
 0x118   :  { %5604 = vst [vmem:[#allocation33_spill] sm:$0xff] %v4417_v57 }
 0x11d   :  { %v4419_v39 = vpop.f32.mrf.mxu2 }
 0x11e   :  { %5605 = vst [vmem:[#allocation34_spill] sm:$0xff] %v4419_v39  ;;  %v4421_v24 = vpop.f32.mrf.mxu3  ;;  %v4429_v31 = vpop.f32.mrf.mxu1 }
 0x11f   :  { %5606 = vst [vmem:[#allocation35_spill] sm:$0xff] %v4421_v24  ;;  %v4437_v0 = vpop.f32.mrf.mxu0 }
 0x120   :  { %5607 = vst [vmem:[#allocation36_spill] sm:$0xff] %v4437_v0 }
 0x121   :  { %548 = vmatmul.bf16.gmra.mxu1 %v3421_v27  ;;  %1958 = vmatmul.bf16.gmra.mxu0 %v3533_v50  ;;  %v3506_v27 = vld [vmem:[%s5532_s0 + $0x170] sm:$0xff] }
 0x122   :  { %1481 = vmatmul.bf16.vlgmr.msrb.gmra.mxu2 %v3505_v29  ;;  %v3534_v50 = vld [vmem:[%s5532_s0 + $0x290] sm:$0xff] }
 0x123   :  { %1716 = vmatmul.bf16.gmra.mxu3 %v3491_v48  ;;  %v3492_v48 = vld [vmem:[%s5532_s0 + $0xc0] sm:$0xff] }
 0x125   :  { %v4439_v24 = vpop.f32.mrf.mxu2 }
 0x126   :  { %5608 = vst [vmem:[#allocation37_spill] sm:$0xff] %v4439_v24  ;;  %v4441_v6 = vpop.f32.mrf.mxu3  ;;  %v4443_v45 = vpop.f32.mrf.mxu1 }
 0x127   :  { %5609 = vst [vmem:[#allocation38_spill] sm:$0xff] %v4441_v6  ;;  %v4445_v16 = vpop.f32.mrf.mxu0 }
 0x128   :  { %5610 = vst [vmem:[#allocation39_spill] sm:$0xff] %v4445_v16 }
 0x12d   :  { %v4447_v63 = vpop.f32.mrf.mxu2 }
 0x12e   :  { %5611 = vst [vmem:[#allocation40_spill] sm:$0xff] %v4447_v63  ;;  %v4449_v46 = vpop.f32.mrf.mxu3  ;;  %v4457_v29 = vpop.f32.mrf.mxu1 }
 0x12f   :  { %5612 = vst [vmem:[#allocation41_spill] sm:$0xff] %v4449_v46  ;;  %v4465_v6 = vpop.f32.mrf.mxu0 }
 0x130   :  { %5613 = vst [vmem:[#allocation42_spill] sm:$0xff] %v4465_v6 }
 0x131   :  { %553 = vmatmul.bf16.gmra.mxu1 %v3422_v37  ;;  %1963 = vmatmul.bf16.gmra.mxu0 %v3534_v50  ;;  %v3423_v37 = vld [vmem:[%s5532_s0 + $0x58] sm:$0xff]  ;;  %v3493_v50 = vld [vmem:[%s5532_s0 + $0xc8] sm:$0xff] }
 0x132   :  { %1486 = vmatmul.bf16.gmra.mxu2 %v3506_v27  ;;  %v3507_v27 = vld [vmem:[%s5532_s0 + $0x178] sm:$0xff] }
 0x133   :  { %1721 = vmatmul.bf16.gmra.mxu3 %v3492_v48 }
 0x135   :  { %v4467_v46 = vpop.f32.mrf.mxu2 }
 0x136   :  { %5614 = vst [vmem:[#allocation43_spill] sm:$0xff] %v4467_v46  ;;  %v4469_v36 = vpop.f32.mrf.mxu3  ;;  %v4471_v28 = vpop.f32.mrf.mxu1 }
 0x137   :  { %5615 = vst [vmem:[#allocation44_spill] sm:$0xff] %v4469_v36  ;;  %v4473_v20 = vpop.f32.mrf.mxu0  ;;  %v4511_v36 = vpop.permute.xlu1 %948 }
 0x138   :  { %5616 = vst [vmem:[#allocation45_spill] sm:$0xff] %v4473_v20  ;;  %v4507_v20 = vpop.permute.xlu0 %938 }
 0x13d   :  { %v4475_v19 = vpop.f32.mrf.mxu2 }
 0x13e   :  { %5617 = vst [vmem:[#allocation46_spill] sm:$0xff] %v4475_v19  ;;  %v4479_v10 = vpop.f32.mrf.mxu3  ;;  %v4487_v48 = vpop.f32.mrf.mxu1 }
 0x13f   :  { %5618 = vst [vmem:[#allocation47_spill] sm:$0xff] %v4479_v10  ;;  %v4495_v19 = vpop.f32.mrf.mxu0  ;;  %v4539_v16 = vpop.permute.xlu1 %968 }
 0x140   :  { %5619 = vst [vmem:[#allocation48_spill] sm:$0xff] %v4495_v19 }
 0x141   :  { %558 = vmatmul.bf16.gmra.mxu1 %v3423_v37  ;;  %1968 = vmatmul.bf16.gmra.mxu0 %v3535_v55  ;;  %v4515_v37 = vpop.permute.xlu2 %958  ;;  %v3424_v55 = vld [vmem:[%s5532_s0 + $0x60] sm:$0xff] }
 0x142   :  { %1491 = vmatmul.bf16.gmra.mxu2 %v3507_v27 }
 0x143   :  { %1726 = vmatmul.bf16.gmra.mxu3 %v3493_v50  ;;  %v3508_v50 = vld [vmem:[%s5532_s0 + $0x180] sm:$0xff] }
 0x145   :  { %v4501_v46 = vpop.f32.mrf.mxu2 }
 0x146   :  { %5620 = vst [vmem:[#allocation49_spill] sm:$0xff] %v4501_v46  ;;  %v4503_v6 = vpop.f32.mrf.mxu3  ;;  %v4505_v47 = vpop.f32.mrf.mxu1 }
 0x147   :  { %5621 = vst [vmem:[#allocation50_spill] sm:$0xff] %v4503_v6  ;;  %v4509_v63 = vpop.f32.mrf.mxu0 }
 0x148   :  { %5622 = vst [vmem:[#allocation51_spill] sm:$0xff] %v4509_v63  ;;  %v3494_v63 = vld [vmem:[%s5532_s0 + $0xd0] sm:$0xff] }
 0x149   :  { %v4545_v0 = vpop.permute.xlu2 %973 }
 0x14d   :  { %v4513_v19 = vpop.f32.mrf.mxu2 }
 0x14e   :  { %5623 = vst [vmem:[#allocation52_spill] sm:$0xff] %v4513_v19  ;;  %v4517_v27 = vpop.f32.mrf.mxu3  ;;  %v4525_v46 = vpop.f32.mrf.mxu1  ;;  %v3536_v19 = vld [vmem:[%s5532_s0 + $0x2a0] sm:$0xff] }
 0x14f   :  { %5624 = vst [vmem:[#allocation53_spill] sm:$0xff] %v4517_v27  ;;  %v4533_v6 = vpop.f32.mrf.mxu0  ;;  %v4535_v27 = vpop.permute.xlu0 %963 }
 0x150   :  { %5625 = vst [vmem:[#allocation54_spill] sm:$0xff] %v4533_v6 }
 0x151   :  { %563 = vmatmul.bf16.gmra.mxu1 %v3424_v55  ;;  %1973 = vmatmul.bf16.gmra.mxu0 %v3536_v19  ;;  %v3425_v19 = vld [vmem:[%s5532_s0 + $0x68] sm:$0xff] }
 0x152   :  { %1496 = vmatmul.bf16.gmra.mxu2 %v3508_v50  ;;  %v3495_v50 = vld [vmem:[%s5532_s0 + $0xd8] sm:$0xff] }
 0x153   :  { %1731 = vmatmul.bf16.gmra.mxu3 %v3494_v63 }
 0x155   :  { %v4537_v10 = vpop.f32.mrf.mxu2 }
 0x156   :  { %5626 = vst [vmem:[#allocation55_spill] sm:$0xff] %v4537_v10  ;;  %v4541_v24 = vpop.f32.mrf.mxu3  ;;  %v4543_v39 = vpop.f32.mrf.mxu1 }
 0x157   :  { %5627 = vst [vmem:[#allocation56_spill] sm:$0xff] %v4541_v24  ;;  %v4547_v62 = vpop.f32.mrf.mxu0  ;;  %v4549_v57 = vpop.permute.xlu0 %978 }
 0x158   :  { %5628 = vst [vmem:[#allocation57_spill] sm:$0xff] %v4547_v62  ;;  %v4563_v10 = vpop.permute.xlu1 %983  ;;  %v3537_v62 = vld [vmem:[%s5532_s0 + $0x2a8] sm:$0xff] }
 0x159   :  { %5629 = vst [vmem:[#allocation58_spill] sm:$0xff] %v4549_v57 }
 0x15a   :  { %5632 = vst [vmem:[#allocation61_spill] sm:$0xff] %v4563_v10 }
 0x15d   :  { %v4551_v6 = vpop.f32.mrf.mxu2 }
 0x15e   :  { %5630 = vst [vmem:[#allocation59_spill] sm:$0xff] %v4551_v6  ;;  %v4553_v55 = vpop.f32.mrf.mxu3  ;;  %v4558_v63 = vpop.f32.mrf.mxu1 }
 0x15f   :  { %5631 = vst [vmem:[#allocation60_spill] sm:$0xff] %v4553_v55  ;;  %v4568_v24 = vpop.f32.mrf.mxu0  ;;  %v4570_v6 = vpop.permute.xlu2 %988 }
 0x160   :  { %5633 = vst [vmem:[#allocation62_spill] sm:$0xff] %v4568_v24  ;;  %v4574_v22 = vpop.permute.xlu0 %993  ;;  %v4582_v21 = vpop.permute.xlu1 %998 }
 0x161   :  { %5634 = vst [vmem:[#allocation63_spill] sm:$0xff] %v4570_v6  ;;  %568 = vmatmul.bf16.gmra.mxu1 %v3425_v19  ;;  %1978 = vmatmul.bf16.gmra.mxu0 %v3537_v62  ;;  %v3426_v62 = vld [vmem:[%s5532_s0 + $0x70] sm:$0xff] }
 0x162   :  { %5636 = vst [vmem:[#allocation65_spill] sm:$0xff] %v4574_v22 }
 0x163   :  { %1736 = vmatmul.bf16.gmra.mxu3 %v3495_v50  ;;  %5639 = vst [vmem:[#allocation68_spill] sm:$0xff] %v4582_v21  ;;  %v3496_v50 = vld [vmem:[%s5532_s0 + $0xe0] sm:$0xff] }
 0x165   :  { %v4572_v55 = vpop.f32.mrf.mxu2 }
 0x166   :  { %5635 = vst [vmem:[#allocation64_spill] sm:$0xff] %v4572_v55  ;;  %v4576_v59 = vpop.f32.mrf.mxu3  ;;  %v4578_v3 = vpop.f32.mrf.mxu1 }
 0x167   :  { %5637 = vst [vmem:[#allocation66_spill] sm:$0xff] %v4576_v59  ;;  %v4580_v10 = vpop.f32.mrf.mxu0  ;;  %v4584_v42 = vpop.permute.xlu2 %1003 }
 0x168   :  { %5638 = vst [vmem:[#allocation67_spill] sm:$0xff] %v4580_v10  ;;  %v4598_v55 = vpop.permute.xlu0 %1008  ;;  %v3538_v10 = vld [vmem:[%s5532_s0 + $0x2b0] sm:$0xff] }
 0x169   :  { %5640 = vst [vmem:[#allocation69_spill] sm:$0xff] %v4584_v42 }
 0x16a   :  { %5644 = vst [vmem:[#allocation73_spill] sm:$0xff] %v4598_v55 }
 0x16d   :  { %v4586_v24 = vpop.f32.mrf.mxu2 }
 0x16e   :  { %5641 = vst [vmem:[#allocation70_spill] sm:$0xff] %v4586_v24  ;;  %v4588_v6 = vpop.f32.mrf.mxu3  ;;  %v4593_v19 = vpop.f32.mrf.mxu1 }
 0x16f   :  { %5642 = vst [vmem:[#allocation71_spill] sm:$0xff] %v4588_v6  ;;  %v1944_v59 = vpop.f32.mrf.mxu0  ;;  %v4603_v24 = vpop.permute.xlu1 %1013 }
 0x170   :  { %5643 = vst [vmem:[#allocation72_spill] sm:$0xff] %v4593_v19  ;;  %v4607_v42 = vpop.permute.xlu2 %1018  ;;  %v4614_v2 = vpop.permute.xlu0 %1023 }
 0x171   :  { %573 = vmatmul.bf16.gmra.mxu1 %v3426_v62  ;;  %5645 = vst [vmem:[#allocation74_spill] sm:$0xff] %v4603_v24  ;;  %1983 = vmatmul.bf16.gmra.mxu0 %v3538_v10  ;;  %v3427_v10 = vld [vmem:[%s5532_s0 + $0x78] sm:$0xff] }
 0x172   :  { %5647 = vst [vmem:[#allocation76_spill] sm:$0xff] %v4607_v42 }
 0x173   :  { %1741 = vmatmul.bf16.gmra.mxu3 %v3496_v50  ;;  %5649 = vst [vmem:[#allocation78_spill] sm:$0xff] %v4614_v2 }
 0x175   :  { %v4605_v6 = vpop.f32.mrf.mxu2 }
 0x176   :  { %5646 = vst [vmem:[#allocation75_spill] sm:$0xff] %v4605_v6  ;;  %v1702_v21 = vpop.f32.mrf.mxu3  ;;  %v4610_v57 = vpop.f32.mrf.mxu1 }
 0x177   :  { %v1703_v22 = vadd.f32 %v1702_v21, %v4133_v54  ;;  %v1946_v19 = vpop.f32.mrf.mxu0  ;;  %v4618_v62 = vpop.permute.xlu1 %1028 }
 0x178   :  { %5651 = vst [vmem:[#allocation80_spill] sm:$0xff] %v4618_v62  ;;  %v4626_v54 = vpop.permute.xlu2 %1033 }
 0x179   :  { %v4612_v55 = vadd.f32 %v1944_v59, %v1703_v22  ;;  %5653 = vst [vmem:[#allocation82_spill] sm:$0xff] %v4626_v54  ;;  %v4630_v59 = vpop.permute.xlu0 %1038 }
 0x17a   :  { %5655 = vst [vmem:[#allocation84_spill] sm:$0xff] %v4630_v59 }
 0x17b   :  { %5648 = vst [vmem:[#allocation77_spill] sm:$0xff] %v4612_v55 }
 0x17d   :  { %v4616_v35 = vpop.f32.mrf.mxu2 }
 0x17e   :  { %5650 = vst [vmem:[#allocation79_spill] sm:$0xff] %v4616_v35  ;;  %v1704_v50 = vpop.f32.mrf.mxu3  ;;  %v4624_v42 = vpop.f32.mrf.mxu1 }
 0x17f   :  { %v1705_v6 = vadd.f32 %v1704_v50, %v4150_v61  ;;  %5652 = vst [vmem:[#allocation81_spill] sm:$0xff] %v4624_v42  ;;  %v1949_v22 = vpop.f32.mrf.mxu0  ;;  %v4637_v55 = vpop.permute.xlu1 %1043 }
 0x180   :  { %5657 = vst [vmem:[#allocation86_spill] sm:$0xff] %v4637_v55  ;;  %v4641_v42 = vpop.permute.xlu2 %1048 }
 0x181   :  { %v4628_v21 = vadd.f32 %v1946_v19, %v1705_v6  ;;  %578 = vmatmul.bf16.gmra.mxu1 %v3427_v10  ;;  %5659 = vst [vmem:[#allocation88_spill] sm:$0xff] %v4641_v42  ;;  %v4645_v19 = vpop.permute.xlu0 %1053 }
 0x182   :  { %5661 = vst [vmem:[#allocation90_spill] sm:$0xff] %v4645_v19 }
 0x183   :  { %5654 = vst [vmem:[#allocation83_spill] sm:$0xff] %v4628_v21 }
 0x185   :  { %v4632_v35 = vpop.f32.mrf.mxu2 }
 0x186   :  { %5656 = vst [vmem:[#allocation85_spill] sm:$0xff] %v4632_v35  ;;  %v1707_v62 = vpop.f32.mrf.mxu3  ;;  %v4635_v24 = vpop.f32.mrf.mxu1 }
 0x187   :  { %v1708_v2 = vadd.f32 %v1707_v62, %v4179_v8  ;;  %v1951_v50 = vpop.f32.mrf.mxu0  ;;  %v4652_v62 = vpop.permute.xlu1 %1058 }
 0x188   :  { %5663 = vst [vmem:[#allocation92_spill] sm:$0xff] %v4652_v62  ;;  %v4654_v55 = vpop.permute.xlu2 %1063 }
 0x189   :  { %v4639_v61 = vadd.f32 %v1949_v22, %v1708_v2  ;;  %5664 = vst [vmem:[#allocation93_spill] sm:$0xff] %v4654_v55  ;;  %v4661_v19 = vpop.permute.xlu0 %1068 }
 0x18a   :  { %5666 = vst [vmem:[#allocation95_spill] sm:$0xff] %v4661_v19 }
 0x18b   :  { %5658 = vst [vmem:[#allocation87_spill] sm:$0xff] %v4639_v61 }
 0x18d   :  { %v4643_v6 = vpop.f32.mrf.mxu2 }
 0x18e   :  { %5660 = vst [vmem:[#allocation89_spill] sm:$0xff] %v4643_v6  ;;  %v1709_v10 = vpop.f32.mrf.mxu3  ;;  %v4648_v35 = vpop.f32.mrf.mxu1 }
 0x18f   :  { %v1710_v59 = vadd.f32 %v1709_v10, %v4196_v15  ;;  %v1954_v8 = vpop.f32.mrf.mxu0  ;;  %v4665_v10 = vpop.permute.xlu1 %1073 }
 0x190   :  { %5668 = vst [vmem:[#allocation97_spill] sm:$0xff] %v4665_v10 }
 0x191   :  { %v4650_v54 = vadd.f32 %v1951_v50, %v1710_v59  ;;  %v4669_v50 = vpop.permute.xlu2 %1078 }
 0x192   :  { %5670 = vst [vmem:[#allocation99_spill] sm:$0xff] %v4669_v50  ;;  %v510_v50 = vadd.f32 %v4429_v31, %v4172_v5  ;;  %v517_v31 = vadd.f32 %v4471_v28, %v4235_v30 }
 0x193   :  { %5662 = vst [vmem:[#allocation91_spill] sm:$0xff] %v4650_v54 }
 0x195   :  { %v4656_v2 = vpop.f32.mrf.mxu2 }
 0x196   :  { %5665 = vst [vmem:[#allocation94_spill] sm:$0xff] %v4656_v2  ;;  %v1712_v22 = vpop.f32.mrf.mxu3  ;;  %v4659_v6 = vpop.f32.mrf.mxu1 }
 0x197   :  { %v1713_v42 = vadd.f32 %v1712_v22, %v4225_v26  ;;  %v1956_v15 = vpop.f32.mrf.mxu0  ;;  %v4676_v22 = vpop.permute.xlu0 %1083 }
 0x198   :  { %5672 = vst [vmem:[#allocation101_spill] sm:$0xff] %v4676_v22  ;;  %v4686_v10 = vpop.permute.xlu1 %1088 }
 0x199   :  { %v4663_v61 = vadd.f32 %v1954_v8, %v1713_v42  ;;  %v507_v42 = vadd.f32 %v4415_v13, %v4143_v58  ;;  %5673 = vst [vmem:[#allocation102_spill] sm:$0xff] %v4686_v10  ;;  %v512_v58 = vadd.f32 %v4443_v45, %v4189_v12  ;;  %v4696_v13 = vpop.permute.xlu2 %2043 }
 0x19b   :  { %5667 = vst [vmem:[#allocation96_spill] sm:$0xff] %v4663_v61  ;;  %v4713_v12 = vadd.f32 %v4194_v14, %v512_v58  ;;  %v520_v14 = vadd.f32 %v4487_v48, %v4264_v41 }
 0x19d   :  { %v4667_v59 = vpop.f32.mrf.mxu2  ;;  %5678 = vst [vmem:[#allocation107_spill] sm:$0xff] %v4713_v12  ;;  %v1094_v30 = vmul.f32 %v4511_v36, %v4713_v12  ;;  %v4753_v36 = vadd.f32 %v4269_v43, %v520_v14 }
 0x19e   :  { %5669 = vst [vmem:[#allocation98_spill] sm:$0xff] %v4667_v59  ;;  %v1714_v62 = vpop.f32.mrf.mxu3  ;;  %v4672_v2 = vpop.f32.mrf.mxu1  ;;  %v505_v59 = vadd.f32 %v4401_v38, %v4126_v51  ;;  %v4706_v38 = vadd.f32 %v4177_v7, %v510_v50 }
 0x19f   :  { %v1715_v55 = vadd.f32 %v1714_v62, %v4242_v33  ;;  %v1959_v26 = vpop.f32.mrf.mxu0  ;;  %v4715_v45 = vpop.permute.xlu0 %2048  ;;  %5681 = vst [vmem:[#allocation110_spill] sm:$0xff] %v4753_v36 }
 0x1a0   :  { %v4703_v5 = vadd.f32 %v4131_v53, %v505_v59  ;;  %5677 = vst [vmem:[#allocation106_spill] sm:$0xff] %v4706_v38  ;;  %v1093_v7 = vmul.f32 %v4497_v1, %v4706_v38  ;;  %v4740_v59 = vpop.permute.xlu1 %2053  ;;  %v522_v1 = vadd.f32 %v4505_v47, %v4281_v49  ;;  %v1164_v47 = vmul.f32 %v1094_v30, %v4713_v12 }
 0x1a1   :  { %v4674_v54 = vadd.f32 %v1956_v15, %v1715_v55  ;;  %v4692_v15 = vadd.f32 %v4148_v60, %v507_v42  ;;  %v4750_v42 = vpop.permute.xlu2 %2058 }
 0x1a2   :  { %5676 = vst [vmem:[#allocation105_spill] sm:$0xff] %v4703_v5  ;;  %v1091_v53 = vmul.f32 %v4477_v11, %v4703_v5  ;;  %v4738_v11 = vadd.f32 %v4240_v32, %v517_v31  ;;  %v1163_v41 = vmul.f32 %v1093_v7, %v4706_v38  ;;  %v525_v32 = vadd.f32 %v4525_v46, %v4310_v4  ;;  %v5717_v38 = vld [vmem:[#allocation74_spill] sm:$0xff] }
 0x1a3   :  { %5671 = vst [vmem:[#allocation100_spill] sm:$0xff] %v4674_v54  ;;  %v1092_v60 = vmul.f32 %v4507_v20, %v4692_v15  ;;  %v4761_v58 = vadd.f32 %v4286_v52, %v522_v1  ;;  %v530_v52 = vadd.f32 %v4558_v63, %v4347_v34 }
 0x1a4   :  { %5674 = vst [vmem:[#allocation103_spill] sm:$0xff] %v4692_v15  ;;  %v1161_v50 = vmul.f32 %v1091_v53, %v4703_v5  ;;  %v1096_v49 = vmul.f32 %v4515_v37, %v4738_v11  ;;  %v4775_v37 = vadd.f32 %v4315_v9, %v525_v32  ;;  %v5685_v32 = vld [vmem:[#allocation17_spill] sm:$0xff] }
 0x1a5   :  { %v4680_v8 = vpop.f32.mrf.mxu2  ;;  %v1162_v28 = vmul.f32 %v1092_v60, %v4692_v15  ;;  %5680 = vst [vmem:[#allocation109_spill] sm:$0xff] %v4738_v11 }
 0x1a6   :  { %v1717_v33 = vpop.f32.mrf.mxu3  ;;  %v4689_v62 = vpop.f32.mrf.mxu1  ;;  %5682 = vst [vmem:[#allocation111_spill] sm:$0xff] %v4761_v58 }
 0x1a7   :  { %v1718_v55 = vadd.f32 %v1717_v33, %v4271_v44  ;;  %v4700_v51 = vpop.f32.mrf.mxu0  ;;  %v515_v44 = vadd.f32 %v4457_v29, %v4218_v23  ;;  %v1123_v33 = vadd.f32 %v1092_v60, %v1091_v53  ;;  %v4768_v46 = vpop.permute.xlu0 %2063  ;;  %v1097_v60 = vmul.f32 %v4535_v27, %v4753_v36  ;;  %5683 = vst [vmem:[#allocation112_spill] sm:$0xff] %v4775_v37 }
 0x1a8   :  { %v532_v27 = vadd.f32 %v4578_v3, %v4358_v40  ;;  %v4791_v34 = vpop.permute.xlu1 %2068 }
 0x1a9   :  { %v4698_v22 = vadd.f32 %v1959_v26, %v1718_v55  ;;  %v4726_v23 = vadd.f32 %v4223_v25, %v515_v44  ;;  %v1193_v55 = vadd.f32 %v1162_v28, %v1161_v50  ;;  %v1124_v43 = vadd.f32 %v1123_v33, %v1093_v7  ;;  %v4801_v40 = vpop.permute.xlu2 %2073 }
 0x1aa   :  { %v1166_v7 = vmul.f32 %v1096_v49, %v4738_v11  ;;  %v1098_v28 = vmul.f32 %v4539_v16, %v4761_v58  ;;  %v1167_v63 = vmul.f32 %v1097_v60, %v4753_v36  ;;  %v4797_v33 = vadd.f32 %v5685_v32, %v530_v52  ;;  %v5687_v16 = vld [vmem:[#allocation23_spill] sm:$0xff] }
 0x1ab   :  { %5675 = vst [vmem:[#allocation104_spill] sm:$0xff] %v4698_v22  ;;  %v1095_v48 = vmul.f32 %v4499_v56, %v4726_v23  ;;  %v527_v56 = vadd.f32 %v4543_v39, %v4324_v17  ;;  %v1194_v31 = vadd.f32 %v1193_v55, %v1163_v41  ;;  %v1125_v39 = vadd.f32 %v1124_v43, %v1094_v30 }
 0x1ac   :  { %5679 = vst [vmem:[#allocation108_spill] sm:$0xff] %v4726_v23  ;;  %v1099_v30 = vmul.f32 %v4545_v0, %v4775_v37  ;;  %v1168_v3 = vmul.f32 %v1098_v28, %v4761_v58 }
 0x1ad   :  { %v4719_v26 = vpop.f32.mrf.mxu2  ;;  %v1165_v14 = vmul.f32 %v1095_v48, %v4726_v23  ;;  %v1195_v53 = vadd.f32 %v1194_v31, %v1164_v47  ;;  %v4785_v1 = vadd.f32 %v4326_v18, %v527_v56  ;;  %v1126_v50 = vadd.f32 %v1125_v39, %v1095_v48  ;;  %5686 = vst [vmem:[#allocation17_spill] sm:$0xff] %v4797_v33  ;;  %v5688_v18 = vld [vmem:[#allocation72_spill] sm:$0xff]  ;;  %v5689_v48 = vld [vmem:[#allocation58_spill] sm:$0xff]  ;;  %v5692_v39 = vld [vmem:[#allocation27_spill] sm:$0xff] }
 0x1ae   :  { %v4728_v20 = vpop.f32.mrf.mxu3  ;;  %v4732_v29 = vpop.f32.mrf.mxu1  ;;  %v535_v55 = vadd.f32 %v5688_v18, %v5687_v16  ;;  %v5690_v31 = vld [vmem:[#allocation20_spill] sm:$0xff]  ;;  %v537_v0 = vadd.f32 %v4610_v57, %v5692_v39  ;;  %v5696_v57 = vld [vmem:[#allocation30_spill] sm:$0xff]  ;;  %v5697_v39 = vld [vmem:[#allocation81_spill] sm:$0xff] }
 0x1af   :  { %v4744_v25 = vpop.f32.mrf.mxu0  ;;  %5684 = vst [vmem:[#allocation113_spill] sm:$0xff] %v4785_v1  ;;  %v1196_v41 = vadd.f32 %v1195_v53, %v1165_v14  ;;  %v1127_v47 = vadd.f32 %v1126_v50, %v1096_v49  ;;  %v1100_v43 = vmul.f32 %v5689_v48, %v4785_v1  ;;  %v4807_v14 = vadd.f32 %v5690_v31, %v532_v27  ;;  %v5693_v50 = vld [vmem:[#allocation61_spill] sm:$0xff]  ;;  %v5694_v16 = vld [vmem:[#allocation24_spill] sm:$0xff]  ;;  %v4823_v27 = vpop.permute.xlu0 %2078 }
 0x1b0   :  { %v4819_v18 = vadd.f32 %v5694_v16, %v535_v55  ;;  %v540_v58 = vadd.f32 %v5697_v39, %v5696_v57  ;;  %v5701_v16 = vld [vmem:[#allocation33_spill] sm:$0xff]  ;;  %v5703_v39 = vld [vmem:[#allocation31_spill] sm:$0xff] }
 0x1b1   :  { %v1197_v56 = vadd.f32 %v1196_v41, %v1166_v7  ;;  %5691 = vst [vmem:[#allocation23_spill] sm:$0xff] %v4807_v14  ;;  %v1128_v53 = vadd.f32 %v1127_v47, %v1097_v60  ;;  %v1169_v7 = vmul.f32 %v1099_v30, %v4775_v37  ;;  %v1101_v41 = vmul.f32 %v5693_v50, %v4797_v33  ;;  %v5699_v37 = vld [vmem:[#allocation28_spill] sm:$0xff] }
 0x1b2   :  { %5695 = vst [vmem:[#allocation72_spill] sm:$0xff] %v4819_v18  ;;  %v1170_v47 = vmul.f32 %v1100_v43, %v4785_v1  ;;  %v4831_v36 = vadd.f32 %v5699_v37, %v537_v0  ;;  %v542_v11 = vadd.f32 %v4635_v24, %v5701_v16  ;;  %v4841_v1 = vadd.f32 %v5703_v39, %v540_v58  ;;  %v5710_v39 = vld [vmem:[#allocation37_spill] sm:$0xff] }
 0x1b3   :  { %v1198_v49 = vadd.f32 %v1197_v56, %v1167_v63  ;;  %v1129_v31 = vadd.f32 %v1128_v53, %v1098_v28  ;;  %v5698_v63 = vld [vmem:[#allocation63_spill] sm:$0xff]  ;;  %v1171_v28 = vmul.f32 %v1101_v41, %v4797_v33  ;;  %v5702_v53 = vld [vmem:[#allocation65_spill] sm:$0xff]  ;;  %v5707_v33 = vld [vmem:[#allocation34_spill] sm:$0xff] }
 0x1b4   :  { %v1102_v56 = vmul.f32 %v5698_v63, %v4807_v14  ;;  %5700 = vst [vmem:[#allocation58_spill] sm:$0xff] %v4831_v36  ;;  %v5705_v63 = vld [vmem:[#allocation36_spill] sm:$0xff]  ;;  %v4849_v12 = vadd.f32 %v5707_v33, %v542_v11  ;;  %v5713_v33 = vld [vmem:[#allocation39_spill] sm:$0xff] }
 0x1b5   :  { %v4765_v44 = vpop.f32.mrf.mxu2  ;;  %v1199_v60 = vadd.f32 %v1198_v49, %v1168_v3  ;;  %v1130_v55 = vadd.f32 %v1129_v31, %v1099_v30  ;;  %v1103_v3 = vmul.f32 %v5702_v53, %v4819_v18  ;;  %v2084_v49 = vpop.permute.xlu1 %2083  ;;  %5704 = vst [vmem:[#allocation20_spill] sm:$0xff] %v4841_v1  ;;  %v545_v37 = vadd.f32 %v4648_v35, %v5705_v63  ;;  %v5706_v31 = vld [vmem:[#allocation68_spill] sm:$0xff] }
 0x1b6   :  { %v4770_v4 = vpop.f32.mrf.mxu3  ;;  %v4779_v17 = vpop.f32.mrf.mxu1  ;;  %v1172_v30 = vmul.f32 %v1102_v56, %v4807_v14  ;;  %v1104_v24 = vmul.f32 %v5706_v31, %v4831_v36  ;;  %5708 = vst [vmem:[#allocation27_spill] sm:$0xff] %v4849_v12 }
 0x1b7   :  { %v4789_v9 = vpop.f32.mrf.mxu0  ;;  %v1200_v23 = vadd.f32 %v1199_v60, %v1169_v7  ;;  %v1131_v57 = vadd.f32 %v1130_v55, %v1100_v43  ;;  %v2089_v60 = vpop.permute.xlu2 %2088  ;;  %v1173_v58 = vmul.f32 %v1103_v3, %v4819_v18  ;;  %v4859_v63 = vadd.f32 %v5710_v39, %v545_v37 }
 0x1b8   :  { %v2094_v18 = vpop.permute.xlu0 %2093 }
 0x1b9   :  { %v1201_v0 = vadd.f32 %v1200_v23, %v1170_v47  ;;  %v1132_v16 = vadd.f32 %v1131_v57, %v1101_v41  ;;  %v5709_v23 = vld [vmem:[#allocation69_spill] sm:$0xff]  ;;  %5711 = vst [vmem:[#allocation61_spill] sm:$0xff] %v4859_v63  ;;  %v1174_v41 = vmul.f32 %v1104_v24, %v4831_v36 }
 0x1ba   :  { %v1105_v47 = vmul.f32 %v5709_v23, %v4841_v1  ;;  %v5712_v57 = vld [vmem:[#allocation77_spill] sm:$0xff]  ;;  %v5715_v23 = vld [vmem:[#allocation47_spill] sm:$0xff] }
 0x1bb   :  { %v1202_v43 = vadd.f32 %v1201_v0, %v1171_v28  ;;  %v1133_v35 = vadd.f32 %v1132_v16, %v1102_v56  ;;  %v4863_v11 = vmul.f32 %v2084_v49, %v5712_v57  ;;  %v547_v28 = vadd.f32 %v4659_v6, %v5713_v33  ;;  %v5714_v56 = vld [vmem:[#allocation73_spill] sm:$0xff]  ;;  %v5718_v33 = vld [vmem:[#allocation50_spill] sm:$0xff] }
 0x1bc   :  { %v1106_v16 = vmul.f32 %v5714_v56, %v4849_v12  ;;  %v1685_v37 = vadd.f32 %v5715_v23, %v4719_v26  ;;  %v1175_v49 = vmul.f32 %v1105_v47, %v4841_v1  ;;  %v1107_v6 = vmul.f32 %v5717_v38, %v4859_v63  ;;  %v5721_v38 = vld [vmem:[#allocation45_spill] sm:$0xff] }
 0x1bd   :  { %v4811_v52 = vpop.f32.mrf.mxu2  ;;  %v1203_v31 = vadd.f32 %v1202_v43, %v1172_v30  ;;  %v1134_v14 = vadd.f32 %v1133_v35, %v1103_v3  ;;  %v5716_v30 = vld [vmem:[#allocation44_spill] sm:$0xff]  ;;  %v1688_v15 = vadd.f32 %v5718_v33, %v4765_v44  ;;  %v4882_v35 = vmul.f32 %v4863_v11, %v5712_v57  ;;  %v5723_v44 = vld [vmem:[#allocation53_spill] sm:$0xff] }
 0x1be   :  { %v4813_v32 = vpop.f32.mrf.mxu3  ;;  %v4821_v48 = vpop.f32.mrf.mxu1  ;;  %v1683_v43 = vadd.f32 %v5716_v30, %v4680_v8  ;;  %v4885_v26 = vmul.f32 %v2089_v60, %v4628_v21  ;;  %v1176_v56 = vmul.f32 %v1106_v16, %v4849_v12  ;;  %v4892_v23 = vadd.f32 %v5721_v38, %v1685_v37  ;;  %v5724_v30 = vld [vmem:[#allocation87_spill] sm:$0xff] }
 0x1bf   :  { %v4833_v50 = vpop.f32.mrf.mxu0  ;;  %v1204_v39 = vadd.f32 %v1203_v31, %v1173_v58  ;;  %v1135_v36 = vadd.f32 %v1134_v14, %v1104_v24  ;;  %v5719_v58 = vld [vmem:[#allocation40_spill] sm:$0xff]  ;;  %v2099_v14 = vpop.permute.xlu1 %2098  ;;  %v4899_v33 = vmul.f32 %v2094_v18, %v5724_v30  ;;  %v5725_v60 = vld [vmem:[#allocation91_spill] sm:$0xff] }
 0x1c0   :  { %v4888_v31 = vadd.f32 %v5719_v58, %v547_v28  ;;  %5722 = vst [vmem:[#allocation30_spill] sm:$0xff] %v4892_v23  ;;  %v4902_v57 = vmul.f32 %v2099_v14, %v5725_v60  ;;  %v5726_v28 = vld [vmem:[#allocation3_spill] sm:$0xff]  ;;  %v2104_v37 = vpop.permute.xlu2 %2103  ;;  %v5731_v18 = vld [vmem:[#allocation56_spill] sm:$0xff]  ;;  %v4918_v14 = vmul.f32 %v4885_v26, %v4628_v21 }
 0x1c1   :  { %v1205_v3 = vadd.f32 %v1204_v39, %v1174_v41  ;;  %v1136_v24 = vadd.f32 %v1135_v36, %v1105_v47  ;;  %v1690_v41 = vadd.f32 %v5723_v44, %v4811_v52  ;;  %v550_v58 = vadd.f32 %v4672_v2, %v5726_v28  ;;  %v5727_v36 = vld [vmem:[#allocation42_spill] sm:$0xff]  ;;  %v5729_v44 = vld [vmem:[#allocation48_spill] sm:$0xff] }
 0x1c2   :  { %5720 = vst [vmem:[#allocation24_spill] sm:$0xff] %v4888_v31  ;;  %v4907_v47 = vadd.f32 %v5727_v36, %v1683_v43  ;;  %v1177_v52 = vmul.f32 %v1107_v6, %v4859_v63  ;;  %v4913_v1 = vadd.f32 %v5729_v44, %v1688_v15  ;;  %v5732_v2 = vld [vmem:[#allocation76_spill] sm:$0xff]  ;;  %v4923_v28 = vmul.f32 %v2104_v37, %v4663_v61  ;;  %v5736_v37 = vld [vmem:[#allocation43_spill] sm:$0xff] }
 0x1c3   :  { %v1206_v38 = vadd.f32 %v1205_v3, %v1175_v49  ;;  %v1137_v10 = vadd.f32 %v1136_v24, %v1106_v16  ;;  %v1108_v43 = vmul.f32 %v5732_v2, %v4888_v31  ;;  %v2172_v15 = vmul.f32 %v4715_v45, %v4892_v23  ;;  %v5733_v3 = vld [vmem:[#allocation51_spill] sm:$0xff]  ;;  %v2109_v45 = vpop.permute.xlu0 %2108 }
 0x1c4   :  { %5728 = vst [vmem:[#allocation81_spill] sm:$0xff] %v4907_v47  ;;  %v4930_v44 = vadd.f32 %v5733_v3, %v1690_v41  ;;  %v4935_v16 = vmul.f32 %v4899_v33, %v5724_v30  ;;  %v4939_v24 = vmul.f32 %v4902_v57, %v5725_v60  ;;  %v4942_v2 = vadd.f32 %v5736_v37, %v550_v58  ;;  %v5737_v3 = vld [vmem:[#allocation54_spill] sm:$0xff]  ;;  %v5739_v37 = vld [vmem:[#allocation4_spill] sm:$0xff] }
 0x1c5   :  { %v1492_v7 = vpop.f32.mrf.mxu2  ;;  %5730 = vst [vmem:[#allocation63_spill] sm:$0xff] %v4913_v1  ;;  %v1207_v49 = vadd.f32 %v1206_v38, %v1176_v56  ;;  %v2171_v56 = vmul.f32 %v4696_v13, %v4907_v47  ;;  %v1138_v38 = vadd.f32 %v1137_v10, %v1107_v6  ;;  %v1178_v30 = vmul.f32 %v1108_v43, %v4888_v31 }
 0x1c6   :  { %v4851_v53 = vpop.f32.mrf.mxu3  ;;  %v4854_v55 = vpop.f32.mrf.mxu1  ;;  %v1693_v5 = vadd.f32 %v5731_v18, %v1492_v7  ;;  %5734 = vst [vmem:[#allocation28_spill] sm:$0xff] %v4930_v44  ;;  %v5735_v7 = vld [vmem:[#allocation60_spill] sm:$0xff]  ;;  %v4954_v60 = vmul.f32 %v4923_v28, %v4663_v61  ;;  %v4957_v58 = vmul.f32 %v2109_v45, %v4674_v54  ;;  %v552_v13 = vadd.f32 %v4689_v62, %v5739_v37  ;;  %v5742_v45 = vld [vmem:[#allocation78_spill] sm:$0xff]  ;;  %v5743_v62 = vld [vmem:[#allocation5_spill] sm:$0xff] }
 0x1c7   :  { %v4867_v0 = vpop.f32.mrf.mxu0  ;;  %v1208_v41 = vadd.f32 %v1207_v49, %v1177_v52  ;;  %v2230_v6 = vmul.f32 %v2172_v15, %v4892_v23  ;;  %v5741_v49 = vld [vmem:[#allocation66_spill] sm:$0xff]  ;;  %v1139_v61 = vadd.f32 %v1138_v38, %v1108_v43  ;;  %v1109_v31 = vmul.f32 %v5742_v45, %v4942_v2 }
 0x1c8   :  { %v2229_v63 = vmul.f32 %v2171_v56, %v4907_v47  ;;  %v555_v37 = vadd.f32 %v4732_v29, %v5743_v62  ;;  %v2197_v19 = vadd.f32 %v2172_v15, %v2171_v56  ;;  %v4985_v38 = vmul.f32 %v4957_v58, %v4674_v54  ;;  %v5747_v29 = vld [vmem:[#allocation11_spill] sm:$0xff]  ;;  %v2114_v47 = vpop.permute.xlu1 %2113 }
 0x1c9   :  { %v1209_v43 = vadd.f32 %v1208_v41, %v1178_v30  ;;  %v1720_v62 = vadd.f32 %v4728_v20, %v5747_v29  ;;  %v1140_v30 = vadd.f32 %v1139_v61, %v1109_v31  ;;  %v1179_v41 = vmul.f32 %v1109_v31, %v4942_v2 }
 0x1ca   :  { %v2255_v56 = vadd.f32 %v2230_v6, %v2229_v63  ;;  %v5009_v61 = vmul.f32 %v2114_v47, %v4698_v22  ;;  %v5751_v6 = vld [vmem:[#allocation13_spill] sm:$0xff] }
 0x1cb   :  { %v5012_v31 = vadd.f32 %v4700_v51, %v1720_v62  ;;  %v5755_v51 = vld [vmem:[#allocation7_spill] sm:$0xff] }
 0x1cc   :  { %v560_v62 = vadd.f32 %v4821_v48, %v5755_v51  ;;  %v5758_v51 = vld [vmem:[#allocation55_spill] sm:$0xff] }
 0x1cd   :  { %v1494_v8 = vpop.f32.mrf.mxu2 }
 0x1ce   :  { %v4896_v39 = vpop.f32.mrf.mxu3  ;;  %v4909_v12 = vpop.f32.mrf.mxu1  ;;  %v1695_v18 = vadd.f32 %v5735_v7, %v1494_v8  ;;  %v2173_v8 = vmul.f32 %v4740_v59, %v4913_v1  ;;  %v4949_v7 = vadd.f32 %v5737_v3, %v1693_v5  ;;  %v2174_v59 = vmul.f32 %v4750_v42, %v4930_v44  ;;  %v5740_v5 = vld [vmem:[#allocation57_spill] sm:$0xff] }
 0x1cf   :  { %v4925_v36 = vpop.f32.mrf.mxu0 }
 0x1d0   :  { %5738 = vst [vmem:[#allocation33_spill] sm:$0xff] %v4949_v7  ;;  %v4965_v52 = vadd.f32 %v5740_v5, %v1695_v18  ;;  %v2231_v42 = vmul.f32 %v2173_v8, %v4913_v1  ;;  %v2175_v18 = vmul.f32 %v4768_v46, %v4949_v7  ;;  %v2198_v1 = vadd.f32 %v2197_v19, %v2173_v8  ;;  %v5750_v8 = vld [vmem:[#allocation80_spill] sm:$0xff] }
 0x1d1   :  { %v2232_v46 = vmul.f32 %v2174_v59, %v4930_v44 }
 0x1d2   :  { %v2256_v20 = vadd.f32 %v2255_v56, %v2231_v42  ;;  %v2199_v29 = vadd.f32 %v2198_v1, %v2174_v59  ;;  %v2233_v63 = vmul.f32 %v2175_v18, %v4949_v7  ;;  %v5752_v56 = vld [vmem:[#allocation71_spill] sm:$0xff]  ;;  %v5754_v7 = vld [vmem:[#allocation52_spill] sm:$0xff] }
 0x1d4   :  { %v2257_v42 = vadd.f32 %v2256_v20, %v2232_v46  ;;  %v2200_v1 = vadd.f32 %v2199_v29, %v2175_v18  ;;  %v5756_v29 = vld [vmem:[#allocation67_spill] sm:$0xff] }
 0x1d5   :  { %v1497_v10 = vpop.f32.mrf.mxu2 }
 0x1d6   :  { %v1698_v3 = vadd.f32 %v5741_v49, %v1497_v10  ;;  %v4968_v21 = vpop.f32.mrf.mxu3  ;;  %v4975_v23 = vpop.f32.mrf.mxu1  ;;  %v5744_v10 = vld [vmem:[#allocation62_spill] sm:$0xff]  ;;  %v2258_v46 = vadd.f32 %v2257_v42, %v2233_v63 }
 0x1d7   :  { %v5746_v49 = vld [vmem:[#allocation46_spill] sm:$0xff]  ;;  %v4992_v15 = vpop.f32.mrf.mxu0 }
 0x1d8   :  { %v4981_v5 = vadd.f32 %v5744_v10, %v1698_v3  ;;  %v4988_v45 = vadd.f32 %v5746_v49, %v552_v13  ;;  %v2176_v3 = vmul.f32 %v4791_v34, %v4965_v52  ;;  %v5748_v10 = vld [vmem:[#allocation49_spill] sm:$0xff]  ;;  %v5749_v13 = vld [vmem:[#allocation6_spill] sm:$0xff] }
 0x1d9   :  { %v4999_v54 = vadd.f32 %v5748_v10, %v555_v37  ;;  %v557_v49 = vadd.f32 %v4779_v17, %v5749_v13  ;;  %v1723_v17 = vadd.f32 %v4770_v4, %v5751_v6  ;;  %v1210_v13 = vadd.f32 %v1209_v43, %v1179_v41  ;;  %v2119_v6 = vpop.permute.xlu2 %2118 }
 0x1da   :  { %5745 = vst [vmem:[#allocation65_spill] sm:$0xff] %v4981_v5  ;;  %v2177_v19 = vmul.f32 %v4801_v40, %v4981_v5  ;;  %v1110_v34 = vmul.f32 %v5750_v8, %v4988_v45  ;;  %v2234_v59 = vmul.f32 %v2176_v3, %v4965_v52  ;;  %v5753_v8 = vld [vmem:[#allocation82_spill] sm:$0xff]  ;;  %v2201_v18 = vadd.f32 %v2200_v1, %v2176_v3 }
 0x1db   :  { %v1111_v47 = vmul.f32 %v5753_v8, %v4999_v54  ;;  %v5023_v44 = vadd.f32 %v5754_v7, %v557_v49  ;;  %v5034_v41 = vmul.f32 %v5009_v61, %v4698_v22  ;;  %v5037_v7 = vmul.f32 %v2119_v6, %v5012_v31  ;;  %v5757_v49 = vld [vmem:[#allocation15_spill] sm:$0xff]  ;;  %v5759_v6 = vld [vmem:[#allocation8_spill] sm:$0xff] }
 0x1dc   :  { %v2235_v20 = vmul.f32 %v2177_v19, %v4981_v5  ;;  %v1180_v43 = vmul.f32 %v1110_v34, %v4988_v45  ;;  %v1725_v48 = vadd.f32 %v4813_v32, %v5757_v49  ;;  %v5044_v3 = vadd.f32 %v4744_v25, %v1723_v17  ;;  %v2124_v32 = vpop.permute.xlu0 %2123  ;;  %v5760_v49 = vld [vmem:[#allocation84_spill] sm:$0xff] }
 0x1dd   :  { %v1499_v37 = vpop.f32.mrf.mxu2  ;;  %v2259_v63 = vadd.f32 %v2258_v46, %v2234_v59  ;;  %v2202_v42 = vadd.f32 %v2201_v18, %v2177_v19  ;;  %v1181_v8 = vmul.f32 %v1111_v47, %v4999_v54  ;;  %v562_v22 = vadd.f32 %v4854_v55, %v5759_v6  ;;  %v2129_v6 = vpop.permute.xlu1 %2128 }
 0x1de   :  { %v1700_v10 = vadd.f32 %v5752_v56, %v1499_v37  ;;  %v5018_v40 = vpop.f32.mrf.mxu3  ;;  %v569_v4 = vpop.f32.mrf.mxu1  ;;  %v1112_v5 = vmul.f32 %v5760_v49, %v5023_v44  ;;  %v1211_v59 = vadd.f32 %v1210_v13, %v1180_v43  ;;  %v5066_v55 = vmul.f32 %v5037_v7, %v5012_v31  ;;  %v5763_v43 = vld [vmem:[#allocation86_spill] sm:$0xff] }
 0x1df   :  { %v5041_v56 = vpop.f32.mrf.mxu0  ;;  %v2260_v25 = vadd.f32 %v2259_v63, %v2235_v20  ;;  %v5069_v18 = vmul.f32 %v2124_v32, %v5044_v3 }
 0x1e0   :  { %v5029_v37 = vadd.f32 %v5756_v29, %v1700_v10  ;;  %v1141_v10 = vadd.f32 %v1140_v30, %v1110_v34  ;;  %v5050_v29 = vadd.f32 %v5758_v51, %v560_v62  ;;  %v5761_v30 = vld [vmem:[#allocation18_spill] sm:$0xff]  ;;  %v5762_v62 = vld [vmem:[#allocation9_spill] sm:$0xff]  ;;  %v1212_v49 = vadd.f32 %v1211_v59, %v1181_v8 }
 0x1e1   :  { %v1728_v34 = vadd.f32 %v4851_v53, %v5761_v30  ;;  %v565_v46 = vadd.f32 %v4909_v12, %v5762_v62  ;;  %v5764_v53 = vld [vmem:[#allocation59_spill] sm:$0xff]  ;;  %v5765_v12 = vld [vmem:[#allocation10_spill] sm:$0xff]  ;;  %v1182_v32 = vmul.f32 %v1112_v5, %v5023_v44  ;;  %v5096_v8 = vmul.f32 %v5069_v18, %v5044_v3 }
 0x1e2   :  { %v2178_v1 = vmul.f32 %v4823_v27, %v5029_v37  ;;  %v5058_v27 = vadd.f32 %v4789_v9, %v1725_v48  ;;  %v1142_v9 = vadd.f32 %v1141_v10, %v1111_v47  ;;  %v1113_v48 = vmul.f32 %v5763_v43, %v5050_v29  ;;  %v5771_v43 = vld [vmem:[#allocation21_spill] sm:$0xff] }
 0x1e3   :  { %v5088_v10 = vadd.f32 %v4833_v50, %v1728_v34  ;;  %v5768_v50 = vld [vmem:[#allocation88_spill] sm:$0xff] }
 0x1e4   :  { %v2203_v17 = vadd.f32 %v2202_v42, %v2178_v1  ;;  %v2236_v19 = vmul.f32 %v2178_v1, %v5029_v37  ;;  %v5077_v42 = vadd.f32 %v5764_v53, %v562_v22  ;;  %v567_v1 = vadd.f32 %v4975_v23, %v5765_v12  ;;  %v5766_v22 = vld [vmem:[#allocation64_spill] sm:$0xff] }
 0x1e5   :  { %v5085_v47 = vmul.f32 %v2129_v6, %v5058_v27  ;;  %v1143_v30 = vadd.f32 %v1142_v9, %v1112_v5  ;;  %v1183_v62 = vmul.f32 %v1113_v48, %v5050_v29  ;;  %v1213_v9 = vadd.f32 %v1212_v49, %v1182_v32  ;;  %v5774_v32 = vld [vmem:[#allocation25_spill] sm:$0xff] }
 0x1e6   :  { %v2204_v20 = vadd.f32 %v2203_v17, %v4863_v11  ;;  %v2261_v63 = vadd.f32 %v2260_v25, %v2236_v19  ;;  %v5072_v13 = vpop.f32.mrf.mxu3  ;;  %v571_v51 = vpop.f32.mrf.mxu1  ;;  %v5091_v17 = vadd.f32 %v5766_v22, %v565_v46  ;;  %v5767_v19 = vld [vmem:[#allocation12_spill] sm:$0xff]  ;;  %v1114_v34 = vmul.f32 %v5768_v50, %v5077_v42  ;;  %v5769_v46 = vld [vmem:[#allocation70_spill] sm:$0xff] }
 0x1e7   :  { %v570_v23 = vadd.f32 %v569_v4, %v5767_v19  ;;  %v5100_v59 = vpop.f32.mrf.mxu0  ;;  %v5770_v4 = vld [vmem:[#allocation14_spill] sm:$0xff]  ;;  %v1730_v53 = vadd.f32 %v4896_v39, %v5771_v43  ;;  %v2246_v12 = vmul.f32 %v5085_v47, %v5058_v27  ;;  %v1144_v49 = vadd.f32 %v1143_v30, %v1113_v48  ;;  %v5775_v50 = vld [vmem:[#allocation92_spill] sm:$0xff] }
 0x1e8   :  { %v2205_v11 = vadd.f32 %v2204_v20, %v4885_v26  ;;  %v2262_v25 = vadd.f32 %v2261_v63, %v4882_v35  ;;  %v5106_v20 = vadd.f32 %v5769_v46, %v567_v1  ;;  %v572_v5 = vadd.f32 %v571_v51, %v5770_v4  ;;  %v2134_v63 = vpop.permute.xlu2 %2133  ;;  %v2139_v51 = vpop.permute.xlu0 %2138  ;;  %v5776_v4 = vld [vmem:[#allocation79_spill] sm:$0xff]  ;;  %v5777_v30 = vld [vmem:[#allocation16_spill] sm:$0xff] }
 0x1e9   :  { %v2189_v6 = vmul.f32 %v2134_v63, %v5088_v10  ;;  %v1733_v39 = vadd.f32 %v4968_v21, %v5774_v32  ;;  %v5132_v48 = vadd.f32 %v4867_v0, %v1730_v53  ;;  %v1145_v43 = vadd.f32 %v1144_v49, %v1114_v34  ;;  %v5780_v49 = vld [vmem:[#allocation29_spill] sm:$0xff] }
 0x1ea   :  { %v2206_v26 = vadd.f32 %v2205_v11, %v4899_v33  ;;  %v2263_v35 = vadd.f32 %v2262_v25, %v4918_v14  ;;  %v5772_v11 = vld [vmem:[#allocation90_spill] sm:$0xff]  ;;  %v5773_v25 = vld [vmem:[#allocation75_spill] sm:$0xff]  ;;  %v1116_v46 = vmul.f32 %v5775_v50, %v5106_v20  ;;  %v5129_v63 = vadd.f32 %v5776_v4, %v572_v5 }
 0x1eb   :  { %v1115_v1 = vmul.f32 %v5772_v11, %v5091_v17  ;;  %v5119_v22 = vadd.f32 %v5773_v25, %v570_v23  ;;  %v5142_v5 = vadd.f32 %v4925_v36, %v1733_v39  ;;  %v1735_v32 = vadd.f32 %v5018_v40, %v5780_v49 }
 0x1ec   :  { %v2207_v33 = vadd.f32 %v2206_v26, %v4902_v57  ;;  %v2264_v14 = vadd.f32 %v2263_v35, %v4935_v16  ;;  %v1214_v26 = vadd.f32 %v1213_v9, %v1183_v62  ;;  %v1184_v35 = vmul.f32 %v1114_v34, %v5077_v42 }
 0x1ed   :  { %v2247_v62 = vmul.f32 %v2189_v6, %v5088_v10  ;;  %v1185_v9 = vmul.f32 %v1115_v1, %v5091_v17  ;;  %v1186_v34 = vmul.f32 %v1116_v46, %v5106_v20  ;;  %v1146_v50 = vadd.f32 %v1145_v43, %v1115_v1 }
 0x1ee   :  { %v2208_v57 = vadd.f32 %v2207_v33, %v4923_v28  ;;  %v2265_v16 = vadd.f32 %v2264_v14, %v4939_v24  ;;  %v1739_v19 = vpop.f32.mrf.mxu3  ;;  %v574_v23 = vpop.f32.mrf.mxu1  ;;  %v5778_v33 = vld [vmem:[#allocation93_spill] sm:$0xff]  ;;  %v1215_v25 = vadd.f32 %v1214_v26, %v1184_v35  ;;  %v2190_v36 = vmul.f32 %v2139_v51, %v5132_v48  ;;  %v5782_v26 = vld [vmem:[#allocation32_spill] sm:$0xff] }
 0x1ef   :  { %v575_v24 = vadd.f32 %v574_v23, %v5777_v30  ;;  %v1117_v14 = vmul.f32 %v5778_v33, %v5119_v22  ;;  %v1984_v39 = vpop.f32.mrf.mxu0  ;;  %v1738_v35 = vadd.f32 %v5072_v13, %v5782_v26  ;;  %v1147_v30 = vadd.f32 %v1146_v50, %v1116_v46  ;;  %v5784_v33 = vld [vmem:[#allocation35_spill] sm:$0xff] }
 0x1f0   :  { %v2209_v21 = vadd.f32 %v2208_v57, %v4957_v58  ;;  %v2266_v28 = vadd.f32 %v2265_v16, %v4954_v60  ;;  %v5779_v58 = vld [vmem:[#allocation85_spill] sm:$0xff]  ;;  %v2144_v60 = vpop.permute.xlu1 %2143  ;;  %v5781_v57 = vld [vmem:[#allocation95_spill] sm:$0xff]  ;;  %v1216_v4 = vadd.f32 %v1215_v25, %v1185_v9  ;;  %v5166_v43 = vadd.f32 %v4992_v15, %v1735_v32 }
 0x1f1   :  { %v5147_v11 = vadd.f32 %v5779_v58, %v575_v24  ;;  %v1118_v16 = vmul.f32 %v5781_v57, %v5129_v63  ;;  %v1187_v23 = vmul.f32 %v1117_v14, %v5119_v22  ;;  %v2191_v1 = vmul.f32 %v2144_v60, %v5142_v5  ;;  %v5785_v25 = vld [vmem:[#allocation19_spill] sm:$0xff] }
 0x1f2   :  { %v2267_v0 = vadd.f32 %v2266_v28, %v4985_v38  ;;  %v2210_v53 = vadd.f32 %v2209_v21, %v5009_v61  ;;  %v5783_v21 = vld [vmem:[#allocation97_spill] sm:$0xff]  ;;  %v2149_v28 = vpop.permute.xlu2 %2148  ;;  %v1740_v13 = vadd.f32 %v1739_v19, %v5784_v33  ;;  %v1148_v58 = vadd.f32 %v1147_v30, %v1117_v14 }
 0x1f3   :  { %v1119_v40 = vmul.f32 %v5783_v21, %v5147_v11  ;;  %v1188_v9 = vmul.f32 %v1118_v16, %v5129_v63 }
 0x1f4   :  { %v2211_v38 = vadd.f32 %v2210_v53, %v5037_v7  ;;  %v2268_v61 = vadd.f32 %v2267_v0, %v5034_v41  ;;  %v1217_v41 = vadd.f32 %v1216_v4, %v1186_v34  ;;  %v2154_v53 = vpop.permute.xlu0 %2153  ;;  %v5786_v34 = vld [vmem:[#allocation38_spill] sm:$0xff]  ;;  %v1149_v19 = vadd.f32 %v1148_v58, %v1118_v16 }
 0x1f5   :  { %v1189_v15 = vmul.f32 %v1119_v40, %v5147_v11  ;;  %v5184_v4 = vadd.f32 %v5100_v59, %v1740_v13 }
 0x1f6   :  { %v2212_v51 = vadd.f32 %v2211_v38, %v5069_v18  ;;  %v2269_v7 = vadd.f32 %v2268_v61, %v5066_v55  ;;  %v1742_v24 = vpop.f32.mrf.mxu3  ;;  %v576_v0 = vpop.f32.mrf.mxu1  ;;  %v1218_v49 = vadd.f32 %v1217_v41, %v1187_v23  ;;  %v5174_v55 = vadd.f32 %v5041_v56, %v1738_v35  ;;  %v5787_v38 = vld [vmem:[#allocation89_spill] sm:$0xff]  ;;  %v5788_v35 = vld [vmem:[#allocation99_spill] sm:$0xff] }
 0x1f7   :  { %v577_v18 = vadd.f32 %v576_v0, %v5785_v25  ;;  %v1743_v32 = vadd.f32 %v1742_v24, %v5786_v34  ;;  %v1150_v26 = vadd.f32 %v1149_v19, %v1119_v40 }
 0x1f8   :  { %v2213_v46 = vadd.f32 %v2212_v51, %v5085_v47  ;;  %v2270_v60 = vadd.f32 %v2269_v7, %v5096_v8  ;;  %v2248_v47 = vmul.f32 %v2190_v36, %v5132_v48  ;;  %v2192_v8 = vmul.f32 %v2149_v28, %v5166_v43 }
 0x1f9   :  { %v5179_v61 = vadd.f32 %v5787_v38, %v577_v18  ;;  %v1219_v14 = vadd.f32 %v1218_v49, %v1188_v9  ;;  %v2193_v16 = vmul.f32 %v2154_v53, %v5174_v55  ;;  %v5190_v51 = vadd.f32 %v1984_v39, %v1743_v32  ;;  %v5789_v9 = vld [vmem:[#allocation41_spill] sm:$0xff]  ;;  %v5790_v39 = vld [vmem:[#allocation22_spill] sm:$0xff] }
 0x1fa   :  { %v2214_v57 = vadd.f32 %v2213_v46, %v2189_v6  ;;  %v2271_v50 = vadd.f32 %v2270_v60, %v2246_v12  ;;  %v2159_v6 = vpop.permute.xlu1 %2158  ;;  %v2249_v12 = vmul.f32 %v2191_v1, %v5142_v5  ;;  %v2164_v0 = vpop.permute.xlu2 %2163  ;;  %v5792_v32 = vld [vmem:[#allocation94_spill] sm:$0xff] }
 0x1fb   :  { %v1120_v21 = vmul.f32 %v5788_v35, %v5179_v61  ;;  %v1220_v30 = vadd.f32 %v1219_v14, %v1189_v15  ;;  %v2194_v40 = vmul.f32 %v2159_v6, %v5184_v4  ;;  %v2251_v34 = vmul.f32 %v2193_v16, %v5174_v55 }
 0x1fc   :  { %v2215_v56 = vadd.f32 %v2214_v57, %v2190_v36  ;;  %v2272_v23 = vadd.f32 %v2271_v50, %v2247_v62  ;;  %v1986_v36 = vpop.f32.mrf.mxu0  ;;  %v2250_v62 = vmul.f32 %v2192_v8, %v5166_v43  ;;  %v2169_v18 = vpop.permute.xlu0 %2168 }
 0x1fd   :  { %v1151_v24 = vadd.f32 %v1150_v26, %v1120_v21  ;;  %v1190_v59 = vmul.f32 %v1120_v21, %v5179_v61 }
 0x1fe   :  { %v2216_v7 = vadd.f32 %v2215_v56, %v2191_v1  ;;  %v2273_v28 = vadd.f32 %v2272_v23, %v2248_v47  ;;  %v1744_v41 = vpop.f32.mrf.mxu3  ;;  %v579_v13 = vpop.f32.mrf.mxu1  ;;  %v2195_v1 = vmul.f32 %v2164_v0, %v5190_v51  ;;  %v2252_v47 = vmul.f32 %v2194_v40, %v5184_v4 }
 0x1ff   :  { %v1745_v33 = vadd.f32 %v1744_v41, %v5789_v9  ;;  %v1221_v46 = vadd.f32 %v1220_v30, %v1190_v59  ;;  %v580_v60 = vadd.f32 %v579_v13, %v5790_v39  ;;  %v5796_v13 = vld [vmem:[#allocation102_spill] sm:$0xff] }
 0x200   :  { %v2217_v58 = vadd.f32 %v2216_v7, %v2192_v8  ;;  %v2274_v53 = vadd.f32 %v2273_v28, %v2249_v12  ;;  %v5793_v8 = vld [vmem:[#allocation101_spill] sm:$0xff]  ;;  %v2253_v56 = vmul.f32 %v2195_v1, %v5190_v51  ;;  %v5794_v28 = vld [vmem:[#allocation26_spill] sm:$0xff] }
 0x201   :  { %v5198_v25 = vadd.f32 %v1986_v36, %v1745_v33  ;;  %v5202_v57 = vadd.f32 %v5792_v32, %v580_v60 }
 0x202   :  { %v2275_v49 = vadd.f32 %v2274_v53, %v2250_v62  ;;  %v2218_v15 = vadd.f32 %v2217_v58, %v2193_v16  ;;  %v5795_v62 = vld [vmem:[#allocation98_spill] sm:$0xff] }
 0x203   :  { %5791 = vst [vmem:[#allocation31_spill] sm:$0xff] %v5198_v25  ;;  %v2196_v50 = vmul.f32 %v2169_v18, %v5198_v25  ;;  %v1121_v14 = vmul.f32 %v5793_v8, %v5202_v57 }
 0x204   :  { %v2276_v19 = vadd.f32 %v2275_v49, %v2251_v34  ;;  %v2219_v38 = vadd.f32 %v2218_v15, %v2194_v40 }
 0x205   :  { %v1152_v35 = vadd.f32 %v1151_v24, %v1121_v14  ;;  %v1191_v21 = vmul.f32 %v1121_v14, %v5202_v57  ;;  %v2254_v6 = vmul.f32 %v2196_v50, %v5198_v25 }
 0x206   :  { %v2277_v23 = vadd.f32 %v2276_v19, %v2252_v47  ;;  %v2220_v26 = vadd.f32 %v2219_v38, %v2195_v1  ;;  %v581_v12 = vpop.f32.mrf.mxu1 }
 0x207   :  { %v1222_v30 = vadd.f32 %v1221_v46, %v1191_v21  ;;  %v582_v59 = vadd.f32 %v581_v12, %v5794_v28 }
 0x208   :  { %v2278_v16 = vadd.f32 %v2277_v23, %v2253_v56  ;;  %v2221_v7 = vadd.f32 %v2220_v26, %v2196_v50 }
 0x209   :  { %v5213_v40 = vadd.f32 %v5795_v62, %v582_v59 }
 0x20a   :  { %v2222_v41 = vrot.slane %v2221_v7, 4  ;;  %v2279_v36 = vadd.f32 %v2278_v16, %v2254_v6 }
 0x20b   :  { %v1122_v24 = vmul.f32 %v5796_v13, %v5213_v40 }
 0x20c   :  { %v2223_v9 = vadd.f32 %v2222_v41, %v2221_v7  ;;  %v2280_v33 = vrot.slane %v2279_v36, 4 }
 0x20d   :  { %v1153_v53 = vadd.f32 %v1152_v35, %v1122_v24  ;;  %v1192_v39 = vmul.f32 %v1122_v24, %v5213_v40 }
 0x20e   :  { %v2224_v0 = vrot.slane %v2223_v9, 2  ;;  %v2281_v58 = vadd.f32 %v2280_v33, %v2279_v36 }
 0x20f   :  { %v1154_v46 = vrot.slane %v1153_v53, 4  ;;  %v1223_v1 = vadd.f32 %v1222_v30, %v1192_v39 }
 0x210   :  { %v2282_v60 = vrot.slane %v2281_v58, 2  ;;  %v2225_v18 = vadd.f32 %v2224_v0, %v2223_v9  ;;  %v2318_v0 = vld [vmem:[%s5534_s2] sm:$0x1] }
 0x211   :  { %v1155_v49 = vadd.f32 %v1154_v46, %v1153_v53  ;;  %v1224_v15 = vrot.slane %v1223_v1, 4 }
 0x212   :  { %v2283_v34 = vadd.f32 %v2282_v60, %v2281_v58  ;;  %v2226_v19 = vrot.slane %v2225_v18, 1  ;;  %v2331_v60 = vld [vmem:[%s5535_s3] sm:$0x1] }
 0x213   :  { %v1156_v32 = vrot.slane %v1155_v49, 2  ;;  %v1225_v50 = vadd.f32 %v1224_v15, %v1223_v1 }
 0x214   :  { %v2284_v8 = vrot.slane %v2283_v34, 1  ;;  %v2227_v23 = vadd.f32 %v2226_v19, %v2225_v18 }
 0x215   :  { %v1157_v38 = vadd.f32 %v1156_v32, %v1155_v49  ;;  %v1226_v47 = vrot.slane %v1225_v50, 2  ;;  %v5797_v49 = vld [vmem:[#allocation105_spill] sm:$0xff] }
 0x216   :  { %v2285_v21 = vadd.f32 %v2284_v8, %v2283_v34  ;;  %v5798_v34 = vld [vmem:[#allocation103_spill] sm:$0xff]  ;;  %v5801_v8 = vld [vmem:[#allocation108_spill] sm:$0xff] }
 0x217   :  { %v1158_v14 = vrot.slane %v1157_v38, 1  ;;  %v1227_v56 = vadd.f32 %v1226_v47, %v1225_v50  ;;  %v5799_v50 = vld [vmem:[#allocation106_spill] sm:$0xff] }
 0x219   :  { %v1159_v26 = vadd.f32 %v1158_v14, %v1157_v38  ;;  %v1228_v35 = vrot.slane %v1227_v56, 1  ;;  %v5800_v38 = vld [vmem:[#allocation107_spill] sm:$0xff] }
 0x21b   :  { %v1229_v6 = vadd.f32 %v1228_v35, %v1227_v56  ;;  %v2228_v12 = vadd.f32 %v2227_v23, %v1159_v26  ;;  %v5802_v56 = vld [vmem:[#allocation109_spill] sm:$0xff]  ;;  %v5803_v26 = vld [vmem:[#allocation110_spill] sm:$0xff] }
 0x21d   :  { %v2286_v16 = vadd.f32 %v2285_v21, %v1229_v6  ;;  %v2313_v30 = vmul.f32 0.00295858, %v2228_v12  ;;  %v5804_v21 = vld [vmem:[#allocation111_spill] sm:$0xff]  ;;  %v5805_v12 = vld [vmem:[#allocation112_spill] sm:$0xff] }
 0x21f   :  { %v2314_v7 = vmul.f32 0.00295858, %v2286_v16  ;;  %v2315_v28 = vmul.f32 %v2313_v30, %v2313_v30 }
 0x221   :  { %v2316_v59 = vsub.f32 %v2314_v7, %v2315_v28  ;;  %v5807_v28 = vld [vmem:[#allocation17_spill] sm:$0xff] }
 0x223   :  { %v2317_v41 = vmax.f32 %v2316_v59, 0.0 }
 0x225   :  { %v2319_v36 = vadd.f32 1e-05, %v2317_v41  ;;  %v5808_v41 = vld [vmem:[#allocation23_spill] sm:$0xff] }
 0x227   :  { %3740 = vrsqrt.f32 %v2319_v36  ;;  %vm2326_vm1 = vweird.f32 %v2319_v36 }
 0x22d   :  { %v3741_v62 = vpop.eup %3740 }
 0x22e   :  { %v2321_v9 = vmul.f32 %v3741_v62, %v2319_v36  ;;  %vm2327_vm0 = vweird.f32 %v3741_v62 }
 0x22f   :  { %vm2328_vm2 = vmor %vm2326_vm1, %vm2327_vm0 }
 0x230   :  { %v2322_v33 = vmul.f32 %v3741_v62, %v2321_v9 }
 0x232   :  { %v2323_v13 = vmul.f32 0.5, %v2322_v33  ;;  %v5810_v33 = vld [vmem:[#allocation58_spill] sm:$0xff] }
 0x234   :  { %v2324_v24 = vsub.f32 1.5, %v2323_v13 }
 0x236   :  { %v2325_v58 = vmul.f32 %v3741_v62, %v2324_v24  ;;  %v5811_v24 = vld [vmem:[#allocation20_spill] sm:$0xff] }
 0x238   :  { %v2329_v53 = vsel %vm2328_vm2, %v3741_v62, %v2325_v58  ;;  %v5809_v62 = vld [vmem:[#allocation72_spill] sm:$0xff]  ;;  %v5812_v58 = vld [vmem:[#allocation27_spill] sm:$0xff] }
 0x239   :  { %v2330_v39 = vmul.f32 %v2329_v53, %v2318_v0 }
 0x23b   :  { %v2332_v46 = vmul.f32 %v2330_v39, %v2313_v30  ;;  %v5224_v1 = vperm.slane %v2330_v39, 0  ;;  %v5806_v30 = vld [vmem:[#allocation113_spill] sm:$0xff] }
 0x23c   :  { %v5813_v39 = vld [vmem:[#allocation61_spill] sm:$0xff] }
 0x23d   :  { %v2333_v18 = vsub.f32 %v2331_v60, %v2332_v46  ;;  %v2369_v15 = vmul.f32 %v5224_v1, %v5797_v49  ;;  %v2370_v32 = vmul.f32 %v5224_v1, %v5798_v34  ;;  %v2371_v19 = vmul.f32 %v5224_v1, %v5799_v50  ;;  %v5814_v46 = vld [vmem:[#allocation24_spill] sm:$0xff] }
 0x23e   :  { %v2372_v47 = vmul.f32 %v5224_v1, %v5800_v38  ;;  %v2373_v14 = vmul.f32 %v5224_v1, %v5801_v8  ;;  %v2374_v23 = vmul.f32 %v5224_v1, %v5802_v56  ;;  %v2375_v35 = vmul.f32 %v5224_v1, %v5803_v26 }
 0x23f   :  { %v2376_v6 = vmul.f32 %v5224_v1, %v5804_v21  ;;  %v2377_v16 = vmul.f32 %v5224_v1, %v5805_v12  ;;  %v2378_v7 = vmul.f32 %v5224_v1, %v5806_v30  ;;  %v2379_v59 = vmul.f32 %v5224_v1, %v5807_v28  ;;  %v5818_v30 = vld [vmem:[#allocation30_spill] sm:$0xff] }
 0x240   :  { %v2380_v36 = vmul.f32 %v5224_v1, %v5808_v41  ;;  %v2381_v9 = vmul.f32 %v5224_v1, %v5809_v62  ;;  %v2382_v13 = vmul.f32 %v5224_v1, %v5810_v33  ;;  %v2383_v0 = vmul.f32 %v5224_v1, %v5811_v24  ;;  %v5824_v41 = vld [vmem:[#allocation33_spill] sm:$0xff] }
 0x241   :  { %v2384_v53 = vmul.f32 %v5224_v1, %v5812_v58  ;;  %v2385_v60 = vmul.f32 %v5224_v1, %v5813_v39  ;;  %v2386_v49 = vmul.f32 %v5224_v1, %v5814_v46  ;;  %v2387_v34 = vmul.f32 %v5224_v1, %v4942_v2 }
 0x242   :  { %v2388_v50 = vmul.f32 %v5224_v1, %v4988_v45  ;;  %v2389_v38 = vmul.f32 %v5224_v1, %v4999_v54  ;;  %v2390_v8 = vmul.f32 %v5224_v1, %v5023_v44  ;;  %v2391_v56 = vmul.f32 %v5224_v1, %v5050_v29 }
 0x243   :  { %v2392_v26 = vmul.f32 %v5224_v1, %v5077_v42  ;;  %v2393_v21 = vmul.f32 %v5224_v1, %v5091_v17  ;;  %v2394_v2 = vmul.f32 %v5224_v1, %v5106_v20  ;;  %v2395_v45 = vmul.f32 %v5224_v1, %v5119_v22  ;;  %v5816_v20 = vld [vmem:[#allocation81_spill] sm:$0xff] }
 0x244   :  { %v2396_v54 = vmul.f32 %v5224_v1, %v5129_v63  ;;  %v2397_v44 = vmul.f32 %v5224_v1, %v5147_v11  ;;  %v2398_v29 = vmul.f32 %v5224_v1, %v5179_v61  ;;  %v2399_v42 = vmul.f32 %v5224_v1, %v5202_v57  ;;  %v5820_v11 = vld [vmem:[#allocation63_spill] sm:$0xff]  ;;  %v5822_v61 = vld [vmem:[#allocation28_spill] sm:$0xff] }
 0x245   :  { %v2400_v17 = vmul.f32 %v5224_v1, %v5213_v40  ;;  %v5290_v12 = vperm.slane %v2333_v18, 0  ;;  %v5294_v22 = vmul.f32 %v5224_v1, %v5816_v20  ;;  %v5298_v63 = vmul.f32 %v5224_v1, %v5818_v30 }
 0x246   :  { %v5302_v28 = vmul.f32 %v5224_v1, %v5820_v11  ;;  %v5306_v57 = vmul.f32 %v5224_v1, %v5822_v61  ;;  %v5310_v40 = vmul.f32 %v5224_v1, %v5824_v41  ;;  %v5314_v18 = vmul.f32 %v5224_v1, %v4965_v52 }
 0x247   :  { %5815 = vst [vmem:[#allocation36_spill] sm:$0xff] %v5290_v12  ;;  %v5317_v62 = vadd.f32 %v5290_v12, %v2369_v15  ;;  %v5320_v33 = vadd.f32 %v5290_v12, %v2370_v32  ;;  %v5323_v24 = vadd.f32 %v5290_v12, %v2371_v19  ;;  %v5326_v58 = vadd.f32 %v5290_v12, %v2372_v47 }
 0x248   :  { %5817 = vst [vmem:[#allocation68_spill] sm:$0xff] %v5294_v22  ;;  %v5329_v39 = vadd.f32 %v5290_v12, %v2373_v14  ;;  %v5332_v46 = vadd.f32 %v5290_v12, %v2374_v23  ;;  %v5335_v52 = vadd.f32 %v5290_v12, %v2375_v35  ;;  %v2411_v15 = vadd.f32 %v5290_v12, %v2376_v6 }
 0x249   :  { %5819 = vst [vmem:[#allocation34_spill] sm:$0xff] %v5298_v63  ;;  %v2412_v32 = vadd.f32 %v5290_v12, %v2377_v16  ;;  %v2413_v20 = vadd.f32 %v5290_v12, %v2378_v7  ;;  %v2414_v19 = vadd.f32 %v5290_v12, %v2379_v59  ;;  %v2415_v47 = vadd.f32 %v5290_v12, %v2380_v36 }
 0x24a   :  { %5821 = vst [vmem:[#allocation69_spill] sm:$0xff] %v5302_v28  ;;  %v2416_v30 = vadd.f32 %v5290_v12, %v2381_v9  ;;  %v2417_v14 = vadd.f32 %v5290_v12, %v2382_v13  ;;  %v2418_v23 = vadd.f32 %v5290_v12, %v2383_v0  ;;  %v2419_v11 = vadd.f32 %v5290_v12, %v2384_v53 }
 0x24b   :  { %5823 = vst [vmem:[#allocation37_spill] sm:$0xff] %v5306_v57  ;;  %v2420_v35 = vadd.f32 %v5290_v12, %v2385_v60  ;;  %v2421_v6 = vadd.f32 %v5290_v12, %v2386_v49  ;;  %v2422_v16 = vadd.f32 %v5290_v12, %v2387_v34  ;;  %v2423_v7 = vadd.f32 %v5290_v12, %v2388_v50 }
 0x24c   :  { %5825 = vst [vmem:[#allocation39_spill] sm:$0xff] %v5310_v40  ;;  %v2424_v59 = vadd.f32 %v5290_v12, %v2389_v38  ;;  %v2425_v36 = vadd.f32 %v5290_v12, %v2390_v8  ;;  %v2426_v9 = vadd.f32 %v5290_v12, %v2391_v56  ;;  %v2427_v13 = vadd.f32 %v5290_v12, %v2392_v26 }
 0x24d   :  { %5826 = vst [vmem:[#allocation73_spill] sm:$0xff] %v5314_v18  ;;  %v2428_v0 = vadd.f32 %v5290_v12, %v2393_v21  ;;  %v2429_v53 = vadd.f32 %v5290_v12, %v2394_v2  ;;  %v2430_v60 = vadd.f32 %v5290_v12, %v2395_v45  ;;  %v2431_v49 = vadd.f32 %v5290_v12, %v2396_v54 }
 0x24e   :  { %v2432_v34 = vadd.f32 %v5290_v12, %v2397_v44  ;;  %v2433_v50 = vadd.f32 %v5290_v12, %v2398_v29  ;;  %v2434_v38 = vadd.f32 %v5290_v12, %v2399_v42  ;;  %v2435_v8 = vadd.f32 %v5290_v12, %v2400_v17 }
 0x24f   :  { %v2436_v56 = vmax.f32 %v5317_v62, 0.0  ;;  %v2437_v26 = vmax.f32 %v5320_v33, 0.0  ;;  %v2438_v21 = vmax.f32 %v5323_v24, 0.0  ;;  %v2439_v2 = vmax.f32 %v5326_v58, 0.0 }
 0x250   :  { %v2440_v45 = vmax.f32 %v5329_v39, 0.0  ;;  %v2441_v54 = vmax.f32 %v5332_v46, 0.0  ;;  %v2442_v44 = vmax.f32 %v5335_v52, 0.0  ;;  %v2443_v61 = vmax.f32 %v2411_v15, 0.0 }
 0x251   :  { %v2444_v29 = vmax.f32 %v2412_v32, 0.0  ;;  %v2445_v41 = vmax.f32 %v2413_v20, 0.0  ;;  %v2446_v42 = vmax.f32 %v2414_v19, 0.0  ;;  %v2447_v18 = vmax.f32 %v2415_v47, 0.0 }
 0x252   :  { %v2448_v17 = vmax.f32 %v2416_v30, 0.0  ;;  %v2449_v40 = vmax.f32 %v2417_v14, 0.0  ;;  %v2450_v62 = vmax.f32 %v2418_v23, 0.0  ;;  %v2451_v57 = vmax.f32 %v2419_v11, 0.0 }
 0x253   :  { %v2452_v33 = vmax.f32 %v2420_v35, 0.0  ;;  %v2453_v28 = vmax.f32 %v2421_v6, 0.0  ;;  %v2454_v24 = vmax.f32 %v2422_v16, 0.0  ;;  %v2455_v63 = vmax.f32 %v2423_v7, 0.0 }
 0x254   :  { %v2456_v58 = vmax.f32 %v2424_v59, 0.0  ;;  %v2457_v22 = vmax.f32 %v2425_v36, 0.0  ;;  %v2458_v39 = vmax.f32 %v2426_v9, 0.0  ;;  %v2459_v12 = vmax.f32 %v2427_v13, 0.0 }
 0x255   :  { %v2460_v46 = vmax.f32 %v2428_v0, 0.0  ;;  %v2461_v25 = vmax.f32 %v2429_v53, 0.0  ;;  %v2462_v52 = vmax.f32 %v2430_v60, 0.0  ;;  %v2463_v15 = vmax.f32 %v2431_v49, 0.0 }
 0x256   :  { %v2464_v32 = vmax.f32 %v2432_v34, 0.0  ;;  %v2465_v20 = vmax.f32 %v2433_v50, 0.0  ;;  %v2466_v19 = vmax.f32 %v2434_v38, 0.0  ;;  %v2467_v47 = vmax.f32 %v2435_v8, 0.0  ;;  %v5831_v50 = vld [vmem:[#allocation91_spill] sm:$0xff]  ;;  %v5832_v8 = vld [vmem:[#allocation96_spill] sm:$0xff] }
 0x257   :  { %v3550_v30 = vpack.c.bf16 %v2437_v26, %v2436_v56  ;;  %v3555_v14 = vpack.c.bf16 %v2439_v2, %v2438_v21  ;;  %v3560_v23 = vpack.c.bf16 %v2441_v54, %v2440_v45  ;;  %v3565_v11 = vpack.c.bf16 %v2443_v61, %v2442_v44  ;;  %v5834_v21 = vld [vmem:[#allocation104_spill] sm:$0xff] }
 0x258   :  { %v3570_v35 = vpack.c.bf16 %v2445_v41, %v2444_v29  ;;  %v3575_v6 = vpack.c.bf16 %v2447_v18, %v2446_v42  ;;  %v3580_v16 = vpack.c.bf16 %v2449_v40, %v2448_v17  ;;  %v3585_v7 = vpack.c.bf16 %v2451_v57, %v2450_v62  ;;  %v5827_v57 = vld [vmem:[#allocation65_spill] sm:$0xff]  ;;  %v5830_v18 = vld [vmem:[#allocation87_spill] sm:$0xff]  ;;  %v5838_v62 = vld [vmem:[#allocation34_spill] sm:$0xff] }
 0x259   :  { %3551 = vst [vmem:[%s5536_s5] sm:$0xff] %v3550_v30   ;;  %v3590_v59 = vpack.c.bf16 %v2453_v28, %v2452_v33  ;;  %v3595_v36 = vpack.c.bf16 %v2455_v63, %v2454_v24  ;;  %v3600_v9 = vpack.c.bf16 %v2457_v22, %v2456_v58  ;;  %v3605_v13 = vpack.c.bf16 %v2459_v12, %v2458_v39  ;;  %v5828_v12 = vld [vmem:[#allocation77_spill] sm:$0xff]  ;;  %v5829_v28 = vld [vmem:[#allocation83_spill] sm:$0xff] }
 0x25a   :  { %3692 = vst [vmem:[%s5536_s5 + $0x8] sm:$0xff] %v3555_v14   ;;  %v3610_v0 = vpack.c.bf16 %v2461_v25, %v2460_v46  ;;  %v3615_v53 = vpack.c.bf16 %v2463_v15, %v2462_v52  ;;  %v3620_v60 = vpack.c.bf16 %v2465_v20, %v2464_v32  ;;  %v5375_v49 = vpack.c.bf16 %v2467_v47, %v2466_v19  ;;  %v5842_v39 = vld [vmem:[#allocation73_spill] sm:$0xff] }
 0x25b   :  { %3693 = vst [vmem:[%s5536_s5 + $0x10] sm:$0xff] %v3560_v23   ;;  %v2564_v40 = vmul.f32 %v5224_v1, %v5827_v57  ;;  %v2565_v22 = vmul.f32 %v5224_v1, %v5029_v37  ;;  %v2566_v63 = vmul.f32 %v5224_v1, %v5828_v12  ;;  %v2567_v25 = vmul.f32 %v5224_v1, %v5829_v28  ;;  %v5833_v37 = vld [vmem:[#allocation100_spill] sm:$0xff] }
 0x25c   :  { %3694 = vst [vmem:[%s5536_s5 + $0x18] sm:$0xff] %v3565_v11   ;;  %v2568_v34 = vmul.f32 %v5224_v1, %v5830_v18  ;;  %v2569_v38 = vmul.f32 %v5224_v1, %v5831_v50  ;;  %v2570_v56 = vmul.f32 %v5224_v1, %v5832_v8  ;;  %v2571_v26 = vmul.f32 %v5224_v1, %v5833_v37 }
 0x25d   :  { %3695 = vst [vmem:[%s5536_s5 + $0x20] sm:$0xff] %v3570_v35   ;;  %v2572_v2 = vmul.f32 %v5224_v1, %v5834_v21  ;;  %v2573_v45 = vmul.f32 %v5224_v1, %v5012_v31  ;;  %v2574_v54 = vmul.f32 %v5224_v1, %v5044_v3  ;;  %v2575_v44 = vmul.f32 %v5224_v1, %v5058_v27 }
 0x25e   :  { %3696 = vst [vmem:[%s5536_s5 + $0x28] sm:$0xff] %v3575_v6   ;;  %v2576_v61 = vmul.f32 %v5224_v1, %v5088_v10  ;;  %v2577_v29 = vmul.f32 %v5224_v1, %v5132_v48  ;;  %v2578_v41 = vmul.f32 %v5224_v1, %v5142_v5  ;;  %v2579_v31 = vmul.f32 %v5224_v1, %v5166_v43  ;;  %v5835_v48 = vld [vmem:[#allocation31_spill] sm:$0xff]  ;;  %v5836_v5 = vld [vmem:[#allocation36_spill] sm:$0xff] }
 0x25f   :  { %3697 = vst [vmem:[%s5536_s5 + $0x30] sm:$0xff] %v3580_v16   ;;  %v2580_v3 = vmul.f32 %v5224_v1, %v5174_v55  ;;  %v2581_v27 = vmul.f32 %v5224_v1, %v5184_v4  ;;  %v2582_v10 = vmul.f32 %v5224_v1, %v5190_v51  ;;  %v2583_v42 = vmul.f32 %v5224_v1, %v5835_v48  ;;  %v5837_v43 = vld [vmem:[#allocation68_spill] sm:$0xff]  ;;  %v5839_v55 = vld [vmem:[#allocation69_spill] sm:$0xff]  ;;  %v5841_v51 = vld [vmem:[#allocation39_spill] sm:$0xff] }
 0x260   :  { %3698 = vst [vmem:[%s5536_s5 + $0x38] sm:$0xff] %v3585_v7   ;;  %v2584_v17 = vadd.f32 %v5837_v43, %v5836_v5  ;;  %v2585_v33 = vadd.f32 %v5838_v62, %v5836_v5  ;;  %v2586_v24 = vadd.f32 %v5839_v55, %v5836_v5  ;;  %v5840_v4 = vld [vmem:[#allocation37_spill] sm:$0xff]  ;;  %v2588_v1 = vadd.f32 %v5841_v51, %v5836_v5 }
 0x261   :  { %v2587_v58 = vadd.f32 %v5840_v4, %v5836_v5  ;;  %3699 = vst [vmem:[%s5536_s5 + $0x40] sm:$0xff] %v3590_v59   ;;  %v2589_v46 = vadd.f32 %v5842_v39, %v5836_v5  ;;  %v2590_v52 = vadd.f32 %v2564_v40, %v5836_v5  ;;  %v2591_v15 = vadd.f32 %v2565_v22, %v5836_v5 }
 0x262   :  { %3700 = vst [vmem:[%s5536_s5 + $0x48] sm:$0xff] %v3595_v36   ;;  %v2592_v32 = vadd.f32 %v2566_v63, %v5836_v5  ;;  %v2593_v20 = vadd.f32 %v2567_v25, %v5836_v5  ;;  %v2594_v19 = vadd.f32 %v2568_v34, %v5836_v5  ;;  %v2595_v47 = vadd.f32 %v2569_v38, %v5836_v5 }
 0x263   :  { %3701 = vst [vmem:[%s5536_s5 + $0x50] sm:$0xff] %v3600_v9   ;;  %v2596_v30 = vadd.f32 %v2570_v56, %v5836_v5  ;;  %v2597_v14 = vadd.f32 %v2571_v26, %v5836_v5  ;;  %v2598_v23 = vadd.f32 %v2572_v2, %v5836_v5  ;;  %v2599_v11 = vadd.f32 %v2573_v45, %v5836_v5 }
 0x264   :  { %3702 = vst [vmem:[%s5536_s5 + $0x58] sm:$0xff] %v3605_v13   ;;  %v2600_v35 = vadd.f32 %v2574_v54, %v5836_v5  ;;  %v2601_v6 = vadd.f32 %v2575_v44, %v5836_v5  ;;  %v2602_v16 = vadd.f32 %v2576_v61, %v5836_v5  ;;  %v2603_v7 = vadd.f32 %v2577_v29, %v5836_v5 }
 0x265   :  { %3703 = vst [vmem:[%s5536_s5 + $0x60] sm:$0xff] %v3610_v0   ;;  %v2604_v59 = vadd.f32 %v2578_v41, %v5836_v5  ;;  %v2605_v36 = vadd.f32 %v2579_v31, %v5836_v5  ;;  %v2606_v9 = vadd.f32 %v2580_v3, %v5836_v5  ;;  %v2607_v13 = vadd.f32 %v2581_v27, %v5836_v5 }
 0x266   :  { %3704 = vst [vmem:[%s5536_s5 + $0x68] sm:$0xff] %v3615_v53   ;;  %v2608_v57 = vadd.f32 %v2582_v10, %v5836_v5  ;;  %v2609_v40 = vadd.f32 %v2583_v42, %v5836_v5  ;;  %v2610_v22 = vmax.f32 %v2584_v17, 0.0  ;;  %v2611_v12 = vmax.f32 %v2585_v33, 0.0 }
 0x267   :  { %3705 = vst [vmem:[%s5536_s5 + $0x70] sm:$0xff] %v3620_v60   ;;  %v2612_v0 = vmax.f32 %v2586_v24, 0.0  ;;  %v2613_v63 = vmax.f32 %v2587_v58, 0.0  ;;  %v2614_v28 = vmax.f32 %v2588_v1, 0.0  ;;  %v2615_v25 = vmax.f32 %v2589_v46, 0.0 }
 0x268   :  { %3706 = vst [vmem:[%s5536_s5 + $0x78] sm:$0xff] %v5375_v49   ;;  %v2616_v53 = vmax.f32 %v2590_v52, 0.0  ;;  %v2617_v18 = vmax.f32 %v2591_v15, 0.0  ;;  %v2618_v34 = vmax.f32 %v2592_v32, 0.0  ;;  %v2619_v50 = vmax.f32 %v2593_v20, 0.0 }
 0x269   :  { %v2620_v38 = vmax.f32 %v2594_v19, 0.0  ;;  %v2621_v8 = vmax.f32 %v2595_v47, 0.0  ;;  %v2622_v56 = vmax.f32 %v2596_v30, 0.0  ;;  %v2623_v37 = vmax.f32 %v2597_v14, 0.0 }
 0x26a   :  { %v2624_v26 = vmax.f32 %v2598_v23, 0.0  ;;  %v2625_v21 = vmax.f32 %v2599_v11, 0.0  ;;  %v2626_v60 = vmax.f32 %v2600_v35, 0.0  ;;  %v2627_v2 = vmax.f32 %v2601_v6, 0.0 }
 0x26b   :  { %v2628_v45 = vmax.f32 %v2602_v16, 0.0  ;;  %v2629_v54 = vmax.f32 %v2603_v7, 0.0  ;;  %v2630_v44 = vmax.f32 %v2604_v59, 0.0  ;;  %v2631_v61 = vmax.f32 %v2605_v36, 0.0 }
 0x26c   :  { %v2632_v29 = vmax.f32 %v2606_v9, 0.0  ;;  %v2633_v41 = vmax.f32 %v2607_v13, 0.0  ;;  %v2634_v31 = vmax.f32 %v2608_v57, 0.0  ;;  %v2635_v49 = vmax.f32 %v2609_v40, 0.0 }
 0x26d   :  { %v3630_v3 = vpack.c.bf16 %v2611_v12, %v2610_v22  ;;  %v3635_v27 = vpack.c.bf16 %v2613_v63, %v2612_v0  ;;  %v3640_v10 = vpack.c.bf16 %v2615_v25, %v2614_v28  ;;  %v3645_v48 = vpack.c.bf16 %v2617_v18, %v2616_v53 }
 0x26e   :  { %v3650_v42 = vpack.c.bf16 %v2619_v50, %v2618_v34  ;;  %v3655_v5 = vpack.c.bf16 %v2621_v8, %v2620_v38  ;;  %v3660_v43 = vpack.c.bf16 %v2623_v37, %v2622_v56  ;;  %v3665_v17 = vpack.c.bf16 %v2625_v21, %v2624_v26 }
 0x26f   :  { %3707 = vst [vmem:[%s5536_s5 + $0x80] sm:$0xff] %v3630_v3   ;;  %v3670_v62 = vpack.c.bf16 %v2627_v2, %v2626_v60  ;;  %v3675_v33 = vpack.c.bf16 %v2629_v54, %v2628_v45  ;;  %v3680_v55 = vpack.c.bf16 %v2631_v61, %v2630_v44  ;;  %v3685_v24 = vpack.c.bf16 %v2633_v41, %v2632_v29 }
 0x270   :  { %3708 = vst [vmem:[%s5536_s5 + $0x88] sm:$0xff] %v3635_v27   ;;  %v3690_v4 = vpack.c.bf16 %v2635_v49, %v2634_v31 }
 0x271   :  { %3709 = vst [vmem:[%s5536_s5 + $0x90] sm:$0xff] %v3640_v10  }
 0x272   :  { %3710 = vst [vmem:[%s5536_s5 + $0x98] sm:$0xff] %v3645_v48  }
 0x273   :  { %3711 = vst [vmem:[%s5536_s5 + $0xa0] sm:$0xff] %v3650_v42  }
 0x274   :  { %3712 = vst [vmem:[%s5536_s5 + $0xa8] sm:$0xff] %v3655_v5  }
 0x275   :  { %3713 = vst [vmem:[%s5536_s5 + $0xb0] sm:$0xff] %v3660_v43  }
 0x276   :  { %3714 = vst [vmem:[%s5536_s5 + $0xb8] sm:$0xff] %v3665_v17  }
 0x277   :  { %3715 = vst [vmem:[%s5536_s5 + $0xc0] sm:$0xff] %v3670_v62  }
 0x278   :  { %3716 = vst [vmem:[%s5536_s5 + $0xc8] sm:$0xff] %v3675_v33  }
 0x279   :  { %3717 = vst [vmem:[%s5536_s5 + $0xd0] sm:$0xff] %v3680_v55  }
 0x27a   :  { %3718 = vst [vmem:[%s5536_s5 + $0xd8] sm:$0xff] %v3685_v24  }
 0x27b   :  { %3719 = vst [vmem:[%s5536_s5 + $0xe0] sm:$0xff] %v3690_v4  }

// kernel: forward.7
= control target key start
LH: loop header
LB: loop body
LE: loop exit
PB: predicated region body
PF: predicated region fallthrough
CT: control target
= control target key end

     0   :  { %s1954_s0 = inlined_call_operand.vmem [shape: bf16[2,2048,128], index: 0, kind: input, shape index: {}]   ;;  %s1955_s1 = inlined_call_operand.vmem [shape: bf16[2,128,128], index: 1, kind: input, shape index: {}]   ;;  %s1956_s2 = inlined_call_operand.<no memory space> [shape: f32[1,1], index: 2, kind: input, shape index: {}]   ;;  %s1957_s3 = inlined_call_operand.vmem [shape: f32[2048,1], index: 3, kind: output, shape index: {}]  }
   0x1   :  { %v8_v0 = vstv %s1956_s2 }
   0x2   :  { %9 = vst [vmem:[#allocation2] sm:$0x1] %v8_v0 }
   0x3   :  { %s1652_s14 = smov 0   ;;  %s1654_s15 = smov 0  }
   0x4   :  { %s1656_s16 = smov 0  }
   0x5 LB: > { %s1198_s2 = sadd.s32 4294967295, %s1627_s16   ;;  %s1669_s17 = sadd.s32 1, %s1627_s16   ;;  %s1627_s16 = sphi %s1656_s16, %s1960_s16   ;;  %s1623_s15 = sphi %s1654_s15, %s1959_s15   ;;  %s1619_s14 = sphi %s1652_s14, %s1958_s14  }
   0x6   : > { %s19_s18 = ssub.s32 %s1627_s16, %s1669_s17  ;;  %s22_s19 = sadd.s32 1, %s1623_s15 }
   0x7   : > { %p20_p0 = scmp.eq.s32.totalorder %s19_s18, 0  ;;  %p29_p1 = scmp.ne.s32.totalorder %s1623_s15, %s1619_s14 }
   0x8   : > { %p30_p2 = scmp.eq.s32.totalorder %s1627_s16, 0  ;;  %p1201_p4 = scmp.ge.s32.totalorder %s1627_s16, 8 }
   0x9   : > { %s1678_s20 = scalar_select %p20_p0, %s1623_s15, %s22_s19  }
   0xa   : > { %p31_p3 = por %p30_p2, %p29_p1  ;;  %129 = sbr.rel (%p1201_p4) target bundleno = 51 (0x33), region = 24 }
   0xf   : > { %132 = sbr.rel (!%p31_p3) target bundleno = 51 (0x33), region = 28  ;;  %s134_s21 = sand.u32 (%p31_p3), 1, %s1623_s15  }
  0x10   : > { %s1451_s22 = sshll.u32 (%p31_p3), %s1627_s16, 7  ;;  %s1202_s23 = sshll.u32 (%p31_p3), %s134_s21, 8 }
  0x11   : > { %s1686_s26 = scalar_lea.vmem (%p31_p3), %s1954_s0, %s1451_s22  ;;  %s1691_s27 = scalar_lea.vmem (%p31_p3), [#allocation3], %s1202_s23 }
  0x12   : > { %v156_v1 = vld [vmem:[%s1686_s26] sm:$0xff] (%p31_p3)   ;;  %v160_v2 = vld [vmem:[%s1686_s26 + $0x8] sm:$0xff] (%p31_p3)   ;;  %v164_v3 = vld [vmem:[%s1686_s26 + $0x10] sm:$0xff] (%p31_p3)  }
  0x13   : > { %157 = vst [vmem:[%s1691_s27] sm:$0xff] (%p31_p3), %v156_v1   ;;  %v168_v4 = vld [vmem:[%s1686_s26 + $0x18] sm:$0xff] (%p31_p3)   ;;  %v172_v5 = vld [vmem:[%s1686_s26 + $0x20] sm:$0xff] (%p31_p3)   ;;  %v176_v6 = vld [vmem:[%s1686_s26 + $0x28] sm:$0xff] (%p31_p3)  }
  0x14   : > { %161 = vst [vmem:[%s1691_s27 + $0x8] sm:$0xff] %v160_v2   ;;  %v180_v7 = vld [vmem:[%s1686_s26 + $0x30] sm:$0xff]   ;;  %v184_v8 = vld [vmem:[%s1686_s26 + $0x38] sm:$0xff]   ;;  %v188_v9 = vld [vmem:[%s1686_s26 + $0x40] sm:$0xff]  }
  0x15   : > { %165 = vst [vmem:[%s1691_s27 + $0x10] sm:$0xff] %v164_v3   ;;  %v192_v10 = vld [vmem:[%s1686_s26 + $0x48] sm:$0xff]   ;;  %v196_v11 = vld [vmem:[%s1686_s26 + $0x50] sm:$0xff]   ;;  %v200_v12 = vld [vmem:[%s1686_s26 + $0x58] sm:$0xff]  }
  0x16   : > { %169 = vst [vmem:[%s1691_s27 + $0x18] sm:$0xff] %v168_v4   ;;  %v204_v13 = vld [vmem:[%s1686_s26 + $0x60] sm:$0xff]   ;;  %v208_v14 = vld [vmem:[%s1686_s26 + $0x68] sm:$0xff]   ;;  %v212_v15 = vld [vmem:[%s1686_s26 + $0x70] sm:$0xff]  }
  0x17   : > { %173 = vst [vmem:[%s1691_s27 + $0x20] sm:$0xff] %v172_v5   ;;  %v216_v16 = vld [vmem:[%s1686_s26 + $0x78] sm:$0xff]   ;;  %v220_v17 = vld [vmem:[%s1686_s26 + $0x400] sm:$0xff]   ;;  %v224_v18 = vld [vmem:[%s1686_s26 + $0x408] sm:$0xff]  }
  0x18   : > { %177 = vst [vmem:[%s1691_s27 + $0x28] sm:$0xff] %v176_v6   ;;  %v228_v19 = vld [vmem:[%s1686_s26 + $0x410] sm:$0xff]   ;;  %v232_v20 = vld [vmem:[%s1686_s26 + $0x418] sm:$0xff]   ;;  %v236_v21 = vld [vmem:[%s1686_s26 + $0x420] sm:$0xff]  }
  0x19   : > { %181 = vst [vmem:[%s1691_s27 + $0x30] sm:$0xff] %v180_v7   ;;  %v240_v22 = vld [vmem:[%s1686_s26 + $0x428] sm:$0xff]   ;;  %v244_v23 = vld [vmem:[%s1686_s26 + $0x430] sm:$0xff]   ;;  %v248_v24 = vld [vmem:[%s1686_s26 + $0x438] sm:$0xff]  }
  0x1a   : > { %185 = vst [vmem:[%s1691_s27 + $0x38] sm:$0xff] %v184_v8   ;;  %v252_v25 = vld [vmem:[%s1686_s26 + $0x440] sm:$0xff]   ;;  %v256_v26 = vld [vmem:[%s1686_s26 + $0x448] sm:$0xff]   ;;  %v260_v27 = vld [vmem:[%s1686_s26 + $0x450] sm:$0xff]  }
  0x1b   : > { %189 = vst [vmem:[%s1691_s27 + $0x40] sm:$0xff] %v188_v9   ;;  %v264_v28 = vld [vmem:[%s1686_s26 + $0x458] sm:$0xff]   ;;  %v268_v29 = vld [vmem:[%s1686_s26 + $0x460] sm:$0xff]   ;;  %v272_v30 = vld [vmem:[%s1686_s26 + $0x468] sm:$0xff]  }
  0x1c   : > { %193 = vst [vmem:[%s1691_s27 + $0x48] sm:$0xff] %v192_v10   ;;  %v276_v31 = vld [vmem:[%s1686_s26 + $0x470] sm:$0xff]   ;;  %v280_v32 = vld [vmem:[%s1686_s26 + $0x478] sm:$0xff]  }
  0x1d   : > { %197 = vst [vmem:[%s1691_s27 + $0x50] sm:$0xff] %v196_v11  }
  0x1e   : > { %201 = vst [vmem:[%s1691_s27 + $0x58] sm:$0xff] %v200_v12  }
  0x1f   : > { %205 = vst [vmem:[%s1691_s27 + $0x60] sm:$0xff] %v204_v13  }
  0x20   : > { %209 = vst [vmem:[%s1691_s27 + $0x68] sm:$0xff] %v208_v14  }
  0x21   : > { %213 = vst [vmem:[%s1691_s27 + $0x70] sm:$0xff] %v212_v15  }
  0x22   : > { %217 = vst [vmem:[%s1691_s27 + $0x78] sm:$0xff] %v216_v16  }
  0x23   : > { %221 = vst [vmem:[%s1691_s27 + $0x80] sm:$0xff] %v220_v17  }
  0x24   : > { %225 = vst [vmem:[%s1691_s27 + $0x88] sm:$0xff] %v224_v18  }
  0x25   : > { %229 = vst [vmem:[%s1691_s27 + $0x90] sm:$0xff] %v228_v19  }
  0x26   : > { %233 = vst [vmem:[%s1691_s27 + $0x98] sm:$0xff] %v232_v20  }
  0x27   : > { %237 = vst [vmem:[%s1691_s27 + $0xa0] sm:$0xff] %v236_v21  }
  0x28   : > { %241 = vst [vmem:[%s1691_s27 + $0xa8] sm:$0xff] %v240_v22  }
  0x29   : > { %245 = vst [vmem:[%s1691_s27 + $0xb0] sm:$0xff] %v244_v23  }
  0x2a   : > { %249 = vst [vmem:[%s1691_s27 + $0xb8] sm:$0xff] %v248_v24  }
  0x2b   : > { %253 = vst [vmem:[%s1691_s27 + $0xc0] sm:$0xff] %v252_v25  }
  0x2c   : > { %257 = vst [vmem:[%s1691_s27 + $0xc8] sm:$0xff] %v256_v26  }
  0x2d   : > { %261 = vst [vmem:[%s1691_s27 + $0xd0] sm:$0xff] %v260_v27  }
  0x2e   : > { %265 = vst [vmem:[%s1691_s27 + $0xd8] sm:$0xff] %v264_v28  }
  0x2f   : > { %269 = vst [vmem:[%s1691_s27 + $0xe0] sm:$0xff] %v268_v29  }
  0x30   : > { %273 = vst [vmem:[%s1691_s27 + $0xe8] sm:$0xff] %v272_v30  }
  0x31   : > { %277 = vst [vmem:[%s1691_s27 + $0xf0] sm:$0xff] %v276_v31  }
  0x32   : > { %281 = vst [vmem:[%s1691_s27 + $0xf8] sm:$0xff] %v280_v32  }
  0x33 PF: > { %p1205_p5 = scmp.ge.s32.totalorder %s1627_s16, 1  ;;  %p434_p6 = scmp.lt.s32.totalorder %s1627_s16, 9 }
  0x35   : > { %p435_p7 = pnand %p1205_p5, %p434_p6 }
  0x36   : > { %s441_s30 = sand.u32 (!%p435_p7), 1, %s1619_s14   ;;  %s1207_s13 = sshll.u32 (!%p435_p7), %s1198_s2, 5 }
  0x37   : > { %438 = sbr.rel (%p435_p7) target bundleno = 357 (0x165), region = 69  ;;  %s1206_s8 = sshll.u32 (!%p435_p7), %s441_s30, 8 }
  0x38   : > { %s1805_s12 = scalar_lea.vmem (!%p435_p7), [#allocation3], %s1206_s8  ;;  %p466_p8 = scmp.lt.s32.totalorder (!%p435_p7), %s1207_s13, 255 }
  0x3c   : > { %v1499_v33 = vld [vmem:[%s1955_s1 + $0x78] sm:$0xff]  ;;  %v1498_v35 = vld [vmem:[%s1955_s1 + $0x70] sm:$0xff]  ;;  %v1497_v37 = vld [vmem:[%s1955_s1 + $0x68] sm:$0xff]  ;;  %s1962_s13 = smov (!%p466_p8, %s1207_s13), 255  ;;  %vm1103_vm0 = vcmask 7168  }
  0x3d   : > { %v1475_v34 = vld [vmem:[%s1955_s1 + $0x38] sm:$0xff]  ;;  %713 = vmatpush.bf16.msra.mxu0 %v1499_v33  ;;  %1500 = vmatpush.bf16.msra.mxu2 %v1499_v33  ;;  %v1474_v36 = vld [vmem:[%s1955_s1 + $0x30] sm:$0xff]  ;;  %v1473_v38 = vld [vmem:[%s1955_s1 + $0x28] sm:$0xff]  ;;  %s1208_s18 = sshll.u32 %s1962_s13, 3 }
  0x3e   : > { %946 = vmatpush.bf16.msra.mxu1 %v1475_v34  ;;  %1508 = vmatpush.bf16.msra.mxu3 %v1475_v34  ;;  %v1496_v39 = vld [vmem:[%s1955_s1 + $0x60] sm:$0xff]  ;;  %v1495_v41 = vld [vmem:[%s1955_s1 + $0x58] sm:$0xff]  ;;  %v1494_v43 = vld [vmem:[%s1955_s1 + $0x50] sm:$0xff]  ;;  %s1847_s16 = scalar_lea.vmem %s1957_s3, %s1208_s18 }
  0x3f   : > { %v1472_v40 = vld [vmem:[%s1955_s1 + $0x20] sm:$0xff]  ;;  %v1471_v42 = vld [vmem:[%s1955_s1 + $0x18] sm:$0xff]  ;;  %v1470_v44 = vld [vmem:[%s1955_s1 + $0x10] sm:$0xff] }
  0x40   : > { %v1493_v45 = vld [vmem:[%s1955_s1 + $0x48] sm:$0xff]  ;;  %v1492_v47 = vld [vmem:[%s1955_s1 + $0x40] sm:$0xff]  ;;  %v1478_v57 = vld [vmem:[%s1805_s12 + $0x90] sm:$0xff] }
  0x41   : > { %714 = vmatpush.bf16.msra.mxu0 %v1498_v35  ;;  %1501 = vmatpush.bf16.msra.mxu2 %v1498_v35  ;;  %v1469_v46 = vld [vmem:[%s1955_s1 + $0x8] sm:$0xff]  ;;  %v1468_v48 = vld [vmem:[%s1955_s1] sm:$0xff]  ;;  %v1486_v58 = vld [vmem:[%s1805_s12 + $0xd0] sm:$0xff] }
  0x42   : > { %947 = vmatpush.bf16.msra.mxu1 %v1474_v36  ;;  %1509 = vmatpush.bf16.msra.mxu3 %v1474_v36  ;;  %v1476_v49 = vld [vmem:[%s1805_s12 + $0x80] sm:$0xff]  ;;  %v1477_v53 = vld [vmem:[%s1805_s12 + $0x88] sm:$0xff]  ;;  %v1454_v59 = vld [vmem:[%s1805_s12 + $0x10] sm:$0xff] }
  0x43   : > { %v1484_v50 = vld [vmem:[%s1805_s12 + $0xc0] sm:$0xff]  ;;  %v1485_v54 = vld [vmem:[%s1805_s12 + $0xc8] sm:$0xff]  ;;  %v1462_v60 = vld [vmem:[%s1805_s12 + $0x50] sm:$0xff] }
  0x44   : > { %v1452_v51 = vld [vmem:[%s1805_s12] sm:$0xff]  ;;  %v1453_v55 = vld [vmem:[%s1805_s12 + $0x8] sm:$0xff]  ;;  %v1479_v61 = vld [vmem:[%s1805_s12 + $0x98] sm:$0xff] }
  0x45   : > { %715 = vmatpush.bf16.msra.mxu0 %v1497_v37  ;;  %1502 = vmatpush.bf16.msra.mxu2 %v1497_v37  ;;  %v1460_v52 = vld [vmem:[%s1805_s12 + $0x40] sm:$0xff]  ;;  %v1461_v56 = vld [vmem:[%s1805_s12 + $0x48] sm:$0xff]  ;;  %v1487_v62 = vld [vmem:[%s1805_s12 + $0xd8] sm:$0xff] }
  0x46   : > { %948 = vmatpush.bf16.msra.mxu1 %v1473_v38  ;;  %1510 = vmatpush.bf16.msra.mxu3 %v1473_v38  ;;  %v1455_v63 = vld [vmem:[%s1805_s12 + $0x18] sm:$0xff]  ;;  %v1480_v1 = vld [vmem:[%s1805_s12 + $0xa0] sm:$0xff]  ;;  %v1481_v5 = vld [vmem:[%s1805_s12 + $0xa8] sm:$0xff] }
  0x47   : > { %v1463_v0 = vld [vmem:[%s1805_s12 + $0x58] sm:$0xff]  ;;  %v1488_v2 = vld [vmem:[%s1805_s12 + $0xe0] sm:$0xff]  ;;  %v1489_v6 = vld [vmem:[%s1805_s12 + $0xe8] sm:$0xff] }
  0x48   : > { %v1456_v3 = vld [vmem:[%s1805_s12 + $0x20] sm:$0xff]  ;;  %v1457_v7 = vld [vmem:[%s1805_s12 + $0x28] sm:$0xff]  ;;  %v1482_v9 = vld [vmem:[%s1805_s12 + $0xb0] sm:$0xff] }
  0x49   : > { %716 = vmatpush.bf16.msra.mxu0 %v1496_v39  ;;  %1503 = vmatpush.bf16.msra.mxu2 %v1496_v39  ;;  %v1464_v4 = vld [vmem:[%s1805_s12 + $0x60] sm:$0xff]  ;;  %v1465_v8 = vld [vmem:[%s1805_s12 + $0x68] sm:$0xff]  ;;  %v1490_v10 = vld [vmem:[%s1805_s12 + $0xf0] sm:$0xff] }
  0x4a   : > { %949 = vmatpush.bf16.msra.mxu1 %v1472_v40  ;;  %1511 = vmatpush.bf16.msra.mxu3 %v1472_v40  ;;  %v1458_v11 = vld [vmem:[%s1805_s12 + $0x30] sm:$0xff]  ;;  %v1483_v13 = vld [vmem:[%s1805_s12 + $0xb8] sm:$0xff] }
  0x4b   : > { %v1466_v12 = vld [vmem:[%s1805_s12 + $0x70] sm:$0xff]  ;;  %v1491_v14 = vld [vmem:[%s1805_s12 + $0xf8] sm:$0xff] }
  0x4c   : > { %v1459_v15 = vld [vmem:[%s1805_s12 + $0x38] sm:$0xff] }
  0x4d   : > { %717 = vmatpush.bf16.msra.mxu0 %v1495_v41  ;;  %1504 = vmatpush.bf16.msra.mxu2 %v1495_v41  ;;  %v1467_v16 = vld [vmem:[%s1805_s12 + $0x78] sm:$0xff] }
  0x4e   : > { %950 = vmatpush.bf16.msra.mxu1 %v1471_v42  ;;  %1512 = vmatpush.bf16.msra.mxu3 %v1471_v42  ;;  %v1841_v18 = vld [vmem:[#allocation2] ss:$0 sm:$0xff] }
  0x51   : > { %718 = vmatpush.bf16.msra.mxu0 %v1494_v43  ;;  %1505 = vmatpush.bf16.msra.mxu2 %v1494_v43 }
  0x52   : > { %951 = vmatpush.bf16.msra.mxu1 %v1470_v44  ;;  %1513 = vmatpush.bf16.msra.mxu3 %v1470_v44 }
  0x55   : > { %719 = vmatpush.bf16.msra.mxu0 %v1493_v45  ;;  %1506 = vmatpush.bf16.msra.mxu2 %v1493_v45 }
  0x56   : > { %952 = vmatpush.bf16.msra.mxu1 %v1469_v46  ;;  %1514 = vmatpush.bf16.msra.mxu3 %v1469_v46 }
  0x59   : > { %720 = vmatpush.bf16.msra.mxu0 %v1492_v47  ;;  %1507 = vmatpush.bf16.msra.mxu2 %v1492_v47 }
  0x5a   : > { %953 = vmatpush.bf16.msra.mxu1 %v1468_v48  ;;  %1515 = vmatpush.bf16.msra.mxu3 %v1468_v48 }
  0x5c   : > { %721 = vmatmul.bf16.vlgmr.msra.gmra.mxu0 %v1476_v49  ;;  %761 = vmatmul.bf16.vlgmr.msra.gmra.mxu2 %v1484_v50 }
  0x5d   : > { %954 = vmatmul.bf16.vlgmr.msra.gmra.mxu1 %v1452_v51  ;;  %994 = vmatmul.bf16.vlgmr.msra.gmra.mxu3 %v1460_v52 }
  0x6c   : > { %726 = vmatmul.bf16.gmra.mxu0 %v1477_v53  ;;  %766 = vmatmul.bf16.gmra.mxu2 %v1485_v54 }
  0x6d   : > { %959 = vmatmul.bf16.gmra.mxu1 %v1453_v55  ;;  %999 = vmatmul.bf16.gmra.mxu3 %v1461_v56 }
  0x7c   : > { %731 = vmatmul.bf16.gmra.mxu0 %v1478_v57  ;;  %771 = vmatmul.bf16.gmra.mxu2 %v1486_v58 }
  0x7d   : > { %964 = vmatmul.bf16.gmra.mxu1 %v1454_v59  ;;  %1004 = vmatmul.bf16.gmra.mxu3 %v1462_v60 }
  0x8c   : > { %736 = vmatmul.bf16.gmra.mxu0 %v1479_v61  ;;  %776 = vmatmul.bf16.gmra.mxu2 %v1487_v62 }
  0x8d   : > { %969 = vmatmul.bf16.gmra.mxu1 %v1455_v63  ;;  %1009 = vmatmul.bf16.gmra.mxu3 %v1463_v0 }
  0x9c   : > { %741 = vmatmul.bf16.gmra.mxu0 %v1480_v1  ;;  %781 = vmatmul.bf16.gmra.mxu2 %v1488_v2 }
  0x9d   : > { %974 = vmatmul.bf16.gmra.mxu1 %v1456_v3  ;;  %1014 = vmatmul.bf16.gmra.mxu3 %v1464_v4 }
  0xac   : > { %746 = vmatmul.bf16.gmra.mxu0 %v1481_v5  ;;  %786 = vmatmul.bf16.gmra.mxu2 %v1489_v6 }
  0xad   : > { %979 = vmatmul.bf16.gmra.mxu1 %v1457_v7  ;;  %1019 = vmatmul.bf16.gmra.mxu3 %v1465_v8 }
  0xbc   : > { %751 = vmatmul.bf16.gmra.mxu0 %v1482_v9  ;;  %791 = vmatmul.bf16.gmra.mxu2 %v1490_v10 }
  0xbd   : > { %984 = vmatmul.bf16.gmra.mxu1 %v1458_v11  ;;  %1024 = vmatmul.bf16.gmra.mxu3 %v1466_v12 }
  0xcc   : > { %756 = vmatmul.bf16.gmra.mxu0 %v1483_v13  ;;  %796 = vmatmul.bf16.gmra.mxu2 %v1491_v14 }
  0xcd   : > { %989 = vmatmul.bf16.gmra.mxu1 %v1459_v15  ;;  %1029 = vmatmul.bf16.gmra.mxu3 %v1467_v16 }
  0xd9   : > { %v722_v17 = vpop.f32.mrf.mxu0 }
  0xda   : > { %v955_v19 = vpop.f32.mrf.mxu1 }
  0xdb   : > { %v956_v20 = vadd.f32 %v955_v19, %v722_v17 }
  0xdd   : > { %v1039_v21 = vadd.f32 %v1841_v18, %v956_v20 }
  0xdf   : > { %1541 = vtanh.f32 %v1039_v21  ;;  %v762_v22 = vpop.f32.mrf.mxu2 }
  0xe0   : > { %v995_v23 = vpop.f32.mrf.mxu3 }
  0xe1   : > { %v996_v24 = vadd.f32 %v995_v23, %v762_v22  ;;  %v724_v25 = vpop.f32.mrf.mxu0 }
  0xe2   : > { %v957_v26 = vpop.f32.mrf.mxu1 }
  0xe3   : > { %v1055_v27 = vadd.f32 %v1841_v18, %v996_v24  ;;  %v958_v28 = vadd.f32 %v957_v26, %v724_v25 }
  0xe5   : > { %v1542_v29 = vpop.eup %1541  ;;  %1543 = vtanh.f32 %v1055_v27  ;;  %v1040_v30 = vadd.f32 %v1841_v18, %v958_v28 }
  0xe6   : > { %1104 = vst.msk [vmem:[%s1847_s16] sm:$0xff] %vm1103_vm0, %v1542_v29 }
  0xe7   : > { %1545 = vtanh.f32 %v1040_v30  ;;  %v764_v31 = vpop.f32.mrf.mxu2 }
  0xe8   : > { %v997_v32 = vpop.f32.mrf.mxu3 }
  0xe9   : > { %v998_v33 = vadd.f32 %v997_v32, %v764_v31  ;;  %v727_v34 = vpop.f32.mrf.mxu0 }
  0xea   : > { %v960_v35 = vpop.f32.mrf.mxu1 }
  0xeb   : > { %v1544_v36 = vpop.eup %1543  ;;  %v1056_v37 = vadd.f32 %v1841_v18, %v998_v33  ;;  %v961_v38 = vadd.f32 %v960_v35, %v727_v34 }
  0xec   : > { %1120 = vst.msk [vmem:[%s1847_s16 + $0x80] sm:$0xff] %vm1103_vm0, %v1544_v36 }
  0xed   : > { %v1546_v39 = vpop.eup %1545  ;;  %1547 = vtanh.f32 %v1056_v37  ;;  %v1041_v40 = vadd.f32 %v1841_v18, %v961_v38 }
  0xee   : > { %1105 = vst.msk [vmem:[%s1847_s16 + $0x8] sm:$0xff] %vm1103_vm0, %v1546_v39 }
  0xef   : > { %1549 = vtanh.f32 %v1041_v40  ;;  %v767_v41 = vpop.f32.mrf.mxu2 }
  0xf0   : > { %v1000_v42 = vpop.f32.mrf.mxu3 }
  0xf1   : > { %v1001_v43 = vadd.f32 %v1000_v42, %v767_v41  ;;  %v729_v44 = vpop.f32.mrf.mxu0 }
  0xf2   : > { %v962_v45 = vpop.f32.mrf.mxu1 }
  0xf3   : > { %v1548_v46 = vpop.eup %1547  ;;  %v1057_v47 = vadd.f32 %v1841_v18, %v1001_v43  ;;  %v963_v48 = vadd.f32 %v962_v45, %v729_v44 }
  0xf4   : > { %1121 = vst.msk [vmem:[%s1847_s16 + $0x88] sm:$0xff] %vm1103_vm0, %v1548_v46 }
  0xf5   : > { %v1550_v49 = vpop.eup %1549  ;;  %1551 = vtanh.f32 %v1057_v47  ;;  %v1042_v50 = vadd.f32 %v1841_v18, %v963_v48 }
  0xf6   : > { %1106 = vst.msk [vmem:[%s1847_s16 + $0x10] sm:$0xff] %vm1103_vm0, %v1550_v49 }
  0xf7   : > { %1553 = vtanh.f32 %v1042_v50  ;;  %v769_v51 = vpop.f32.mrf.mxu2 }
  0xf8   : > { %v1002_v52 = vpop.f32.mrf.mxu3 }
  0xf9   : > { %v1003_v53 = vadd.f32 %v1002_v52, %v769_v51  ;;  %v732_v54 = vpop.f32.mrf.mxu0 }
  0xfa   : > { %v965_v55 = vpop.f32.mrf.mxu1 }
  0xfb   : > { %v1552_v56 = vpop.eup %1551  ;;  %v1058_v57 = vadd.f32 %v1841_v18, %v1003_v53  ;;  %v966_v58 = vadd.f32 %v965_v55, %v732_v54 }
  0xfc   : > { %1122 = vst.msk [vmem:[%s1847_s16 + $0x90] sm:$0xff] %vm1103_vm0, %v1552_v56 }
  0xfd   : > { %v1554_v59 = vpop.eup %1553  ;;  %1555 = vtanh.f32 %v1058_v57  ;;  %v1043_v60 = vadd.f32 %v1841_v18, %v966_v58 }
  0xfe   : > { %1107 = vst.msk [vmem:[%s1847_s16 + $0x18] sm:$0xff] %vm1103_vm0, %v1554_v59 }
  0xff   : > { %1557 = vtanh.f32 %v1043_v60  ;;  %v772_v61 = vpop.f32.mrf.mxu2 }
 0x100   : > { %v1005_v62 = vpop.f32.mrf.mxu3 }
 0x101   : > { %v1006_v63 = vadd.f32 %v1005_v62, %v772_v61  ;;  %v734_v0 = vpop.f32.mrf.mxu0 }
 0x102   : > { %v967_v1 = vpop.f32.mrf.mxu1 }
 0x103   : > { %v1556_v2 = vpop.eup %1555  ;;  %v1059_v3 = vadd.f32 %v1841_v18, %v1006_v63  ;;  %v968_v4 = vadd.f32 %v967_v1, %v734_v0 }
 0x104   : > { %1123 = vst.msk [vmem:[%s1847_s16 + $0x98] sm:$0xff] %vm1103_vm0, %v1556_v2 }
 0x105   : > { %v1558_v5 = vpop.eup %1557  ;;  %1559 = vtanh.f32 %v1059_v3  ;;  %v1044_v6 = vadd.f32 %v1841_v18, %v968_v4 }
 0x106   : > { %1108 = vst.msk [vmem:[%s1847_s16 + $0x20] sm:$0xff] %vm1103_vm0, %v1558_v5 }
 0x107   : > { %1561 = vtanh.f32 %v1044_v6  ;;  %v774_v7 = vpop.f32.mrf.mxu2 }
 0x108   : > { %v1007_v8 = vpop.f32.mrf.mxu3 }
 0x109   : > { %v1008_v9 = vadd.f32 %v1007_v8, %v774_v7  ;;  %v737_v10 = vpop.f32.mrf.mxu0 }
 0x10a   : > { %v970_v11 = vpop.f32.mrf.mxu1 }
 0x10b   : > { %v1560_v12 = vpop.eup %1559  ;;  %v1060_v13 = vadd.f32 %v1841_v18, %v1008_v9  ;;  %v971_v14 = vadd.f32 %v970_v11, %v737_v10 }
 0x10c   : > { %1124 = vst.msk [vmem:[%s1847_s16 + $0xa0] sm:$0xff] %vm1103_vm0, %v1560_v12 }
 0x10d   : > { %v1562_v15 = vpop.eup %1561  ;;  %1563 = vtanh.f32 %v1060_v13  ;;  %v1045_v16 = vadd.f32 %v1841_v18, %v971_v14 }
 0x10e   : > { %1109 = vst.msk [vmem:[%s1847_s16 + $0x28] sm:$0xff] %vm1103_vm0, %v1562_v15 }
 0x10f   : > { %1565 = vtanh.f32 %v1045_v16  ;;  %v777_v17 = vpop.f32.mrf.mxu2 }
 0x110   : > { %v1010_v19 = vpop.f32.mrf.mxu3 }
 0x111   : > { %v1011_v20 = vadd.f32 %v1010_v19, %v777_v17  ;;  %v739_v21 = vpop.f32.mrf.mxu0 }
 0x112   : > { %v972_v22 = vpop.f32.mrf.mxu1 }
 0x113   : > { %v1564_v23 = vpop.eup %1563  ;;  %v1061_v24 = vadd.f32 %v1841_v18, %v1011_v20  ;;  %v973_v25 = vadd.f32 %v972_v22, %v739_v21 }
 0x114   : > { %1125 = vst.msk [vmem:[%s1847_s16 + $0xa8] sm:$0xff] %vm1103_vm0, %v1564_v23 }
 0x115   : > { %v1566_v26 = vpop.eup %1565  ;;  %1567 = vtanh.f32 %v1061_v24  ;;  %v1046_v27 = vadd.f32 %v1841_v18, %v973_v25 }
 0x116   : > { %1110 = vst.msk [vmem:[%s1847_s16 + $0x30] sm:$0xff] %vm1103_vm0, %v1566_v26 }
 0x117   : > { %1569 = vtanh.f32 %v1046_v27  ;;  %v779_v28 = vpop.f32.mrf.mxu2 }
 0x118   : > { %v1012_v29 = vpop.f32.mrf.mxu3 }
 0x119   : > { %v1013_v30 = vadd.f32 %v1012_v29, %v779_v28  ;;  %v742_v31 = vpop.f32.mrf.mxu0 }
 0x11a   : > { %v975_v32 = vpop.f32.mrf.mxu1 }
 0x11b   : > { %v1568_v33 = vpop.eup %1567  ;;  %v1062_v34 = vadd.f32 %v1841_v18, %v1013_v30  ;;  %v976_v35 = vadd.f32 %v975_v32, %v742_v31 }
 0x11c   : > { %1126 = vst.msk [vmem:[%s1847_s16 + $0xb0] sm:$0xff] %vm1103_vm0, %v1568_v33 }
 0x11d   : > { %v1570_v36 = vpop.eup %1569  ;;  %1571 = vtanh.f32 %v1062_v34  ;;  %v1047_v37 = vadd.f32 %v1841_v18, %v976_v35 }
 0x11e   : > { %1111 = vst.msk [vmem:[%s1847_s16 + $0x38] sm:$0xff] %vm1103_vm0, %v1570_v36 }
 0x11f   : > { %1573 = vtanh.f32 %v1047_v37  ;;  %v782_v38 = vpop.f32.mrf.mxu2 }
 0x120   : > { %v1015_v39 = vpop.f32.mrf.mxu3 }
 0x121   : > { %v1016_v40 = vadd.f32 %v1015_v39, %v782_v38  ;;  %v744_v41 = vpop.f32.mrf.mxu0 }
 0x122   : > { %v977_v42 = vpop.f32.mrf.mxu1 }
 0x123   : > { %v1572_v43 = vpop.eup %1571  ;;  %v1063_v44 = vadd.f32 %v1841_v18, %v1016_v40  ;;  %v978_v45 = vadd.f32 %v977_v42, %v744_v41 }
 0x124   : > { %1127 = vst.msk [vmem:[%s1847_s16 + $0xb8] sm:$0xff] %vm1103_vm0, %v1572_v43 }
 0x125   : > { %v1574_v46 = vpop.eup %1573  ;;  %1575 = vtanh.f32 %v1063_v44  ;;  %v1048_v47 = vadd.f32 %v1841_v18, %v978_v45 }
 0x126   : > { %1112 = vst.msk [vmem:[%s1847_s16 + $0x40] sm:$0xff] %vm1103_vm0, %v1574_v46 }
 0x127   : > { %1577 = vtanh.f32 %v1048_v47  ;;  %v784_v48 = vpop.f32.mrf.mxu2 }
 0x128   : > { %v1017_v49 = vpop.f32.mrf.mxu3 }
 0x129   : > { %v1018_v50 = vadd.f32 %v1017_v49, %v784_v48  ;;  %v747_v51 = vpop.f32.mrf.mxu0 }
 0x12a   : > { %v980_v52 = vpop.f32.mrf.mxu1 }
 0x12b   : > { %v1576_v53 = vpop.eup %1575  ;;  %v1064_v54 = vadd.f32 %v1841_v18, %v1018_v50  ;;  %v981_v55 = vadd.f32 %v980_v52, %v747_v51 }
 0x12c   : > { %1128 = vst.msk [vmem:[%s1847_s16 + $0xc0] sm:$0xff] %vm1103_vm0, %v1576_v53 }
 0x12d   : > { %v1578_v56 = vpop.eup %1577  ;;  %1579 = vtanh.f32 %v1064_v54  ;;  %v1049_v57 = vadd.f32 %v1841_v18, %v981_v55 }
 0x12e   : > { %1113 = vst.msk [vmem:[%s1847_s16 + $0x48] sm:$0xff] %vm1103_vm0, %v1578_v56 }
 0x12f   : > { %1581 = vtanh.f32 %v1049_v57  ;;  %v787_v58 = vpop.f32.mrf.mxu2 }
 0x130   : > { %v1020_v59 = vpop.f32.mrf.mxu3 }
 0x131   : > { %v1021_v60 = vadd.f32 %v1020_v59, %v787_v58  ;;  %v749_v61 = vpop.f32.mrf.mxu0 }
 0x132   : > { %v982_v62 = vpop.f32.mrf.mxu1 }
 0x133   : > { %v1580_v63 = vpop.eup %1579  ;;  %v1065_v0 = vadd.f32 %v1841_v18, %v1021_v60  ;;  %v983_v1 = vadd.f32 %v982_v62, %v749_v61 }
 0x134   : > { %1129 = vst.msk [vmem:[%s1847_s16 + $0xc8] sm:$0xff] %vm1103_vm0, %v1580_v63 }
 0x135   : > { %v1582_v2 = vpop.eup %1581  ;;  %1583 = vtanh.f32 %v1065_v0  ;;  %v1050_v3 = vadd.f32 %v1841_v18, %v983_v1 }
 0x136   : > { %1114 = vst.msk [vmem:[%s1847_s16 + $0x50] sm:$0xff] %vm1103_vm0, %v1582_v2 }
 0x137   : > { %1585 = vtanh.f32 %v1050_v3  ;;  %v789_v4 = vpop.f32.mrf.mxu2 }
 0x138   : > { %v1022_v5 = vpop.f32.mrf.mxu3 }
 0x139   : > { %v1023_v6 = vadd.f32 %v1022_v5, %v789_v4  ;;  %v752_v7 = vpop.f32.mrf.mxu0 }
 0x13a   : > { %v985_v8 = vpop.f32.mrf.mxu1 }
 0x13b   : > { %v1584_v9 = vpop.eup %1583  ;;  %v1066_v10 = vadd.f32 %v1841_v18, %v1023_v6  ;;  %v986_v11 = vadd.f32 %v985_v8, %v752_v7 }
 0x13c   : > { %1130 = vst.msk [vmem:[%s1847_s16 + $0xd0] sm:$0xff] %vm1103_vm0, %v1584_v9 }
 0x13d   : > { %v1586_v12 = vpop.eup %1585  ;;  %1587 = vtanh.f32 %v1066_v10  ;;  %v1051_v13 = vadd.f32 %v1841_v18, %v986_v11 }
 0x13e   : > { %1115 = vst.msk [vmem:[%s1847_s16 + $0x58] sm:$0xff] %vm1103_vm0, %v1586_v12 }
 0x13f   : > { %1589 = vtanh.f32 %v1051_v13  ;;  %v792_v14 = vpop.f32.mrf.mxu2 }
 0x140   : > { %v1025_v15 = vpop.f32.mrf.mxu3 }
 0x141   : > { %v1026_v16 = vadd.f32 %v1025_v15, %v792_v14  ;;  %v754_v17 = vpop.f32.mrf.mxu0 }
 0x142   : > { %v987_v19 = vpop.f32.mrf.mxu1 }
 0x143   : > { %v1588_v20 = vpop.eup %1587  ;;  %v1067_v21 = vadd.f32 %v1841_v18, %v1026_v16  ;;  %v988_v22 = vadd.f32 %v987_v19, %v754_v17 }
 0x144   : > { %1131 = vst.msk [vmem:[%s1847_s16 + $0xd8] sm:$0xff] %vm1103_vm0, %v1588_v20 }
 0x145   : > { %v1590_v23 = vpop.eup %1589  ;;  %1591 = vtanh.f32 %v1067_v21  ;;  %v1052_v24 = vadd.f32 %v1841_v18, %v988_v22 }
 0x146   : > { %1116 = vst.msk [vmem:[%s1847_s16 + $0x60] sm:$0xff] %vm1103_vm0, %v1590_v23 }
 0x147   : > { %1593 = vtanh.f32 %v1052_v24  ;;  %v794_v25 = vpop.f32.mrf.mxu2 }
 0x148   : > { %v1027_v26 = vpop.f32.mrf.mxu3 }
 0x149   : > { %v1028_v27 = vadd.f32 %v1027_v26, %v794_v25  ;;  %v757_v28 = vpop.f32.mrf.mxu0 }
 0x14a   : > { %v990_v29 = vpop.f32.mrf.mxu1 }
 0x14b   : > { %v1592_v30 = vpop.eup %1591  ;;  %v1068_v31 = vadd.f32 %v1841_v18, %v1028_v27  ;;  %v991_v32 = vadd.f32 %v990_v29, %v757_v28 }
 0x14c   : > { %1132 = vst.msk [vmem:[%s1847_s16 + $0xe0] sm:$0xff] %vm1103_vm0, %v1592_v30 }
 0x14d   : > { %v1594_v33 = vpop.eup %1593  ;;  %1595 = vtanh.f32 %v1068_v31  ;;  %v1053_v34 = vadd.f32 %v1841_v18, %v991_v32 }
 0x14e   : > { %1117 = vst.msk [vmem:[%s1847_s16 + $0x68] sm:$0xff] %vm1103_vm0, %v1594_v33 }
 0x14f   : > { %1597 = vtanh.f32 %v1053_v34  ;;  %v797_v35 = vpop.f32.mrf.mxu2 }
 0x150   : > { %v1030_v36 = vpop.f32.mrf.mxu3 }
 0x151   : > { %v1031_v37 = vadd.f32 %v1030_v36, %v797_v35  ;;  %v759_v38 = vpop.f32.mrf.mxu0 }
 0x152   : > { %v992_v39 = vpop.f32.mrf.mxu1 }
 0x153   : > { %v1596_v40 = vpop.eup %1595  ;;  %v1069_v41 = vadd.f32 %v1841_v18, %v1031_v37  ;;  %v993_v42 = vadd.f32 %v992_v39, %v759_v38 }
 0x154   : > { %1133 = vst.msk [vmem:[%s1847_s16 + $0xe8] sm:$0xff] %vm1103_vm0, %v1596_v40 }
 0x155   : > { %v1598_v43 = vpop.eup %1597  ;;  %1599 = vtanh.f32 %v1069_v41  ;;  %v1054_v44 = vadd.f32 %v1841_v18, %v993_v42 }
 0x156   : > { %1118 = vst.msk [vmem:[%s1847_s16 + $0x70] sm:$0xff] %vm1103_vm0, %v1598_v43 }
 0x157   : > { %1601 = vtanh.f32 %v1054_v44  ;;  %v799_v45 = vpop.f32.mrf.mxu2 }
 0x158   : > { %v1032_v46 = vpop.f32.mrf.mxu3 }
 0x159   : > { %v1033_v47 = vadd.f32 %v1032_v46, %v799_v45 }
 0x15b   : > { %v1600_v48 = vpop.eup %1599  ;;  %v1070_v49 = vadd.f32 %v1841_v18, %v1033_v47 }
 0x15c   : > { %1134 = vst.msk [vmem:[%s1847_s16 + $0xf0] sm:$0xff] %vm1103_vm0, %v1600_v48 }
 0x15d   : > { %v1602_v50 = vpop.eup %1601  ;;  %1603 = vtanh.f32 %v1070_v49 }
 0x15e   : > { %1119 = vst.msk [vmem:[%s1847_s16 + $0x78] sm:$0xff] %vm1103_vm0, %v1602_v50 }
 0x163   : > { %v1604_v51 = vpop.eup %1603 }
 0x164   : > { %1135 = vst.msk [vmem:[%s1847_s16 + $0xf8] sm:$0xff] %vm1103_vm0, %v1604_v51 }
 0x165 PF: > { %p12_p9 = scmp.ge.s32.totalorder %s1669_s17, 10   ;;  %s1958_s14 = smov %s1623_s15 }
 0x166   : > { %s1959_s15 = smov %s1678_s20  ;;  %s1960_s16 = smov %s1669_s17 }
 0x167   :  { %14 = sbr.rel (!%p12_p9) target bundleno = 5 (0x5), region = 110 }

</bundles_post_ra>
